<compile_context>
chip_gen: v5e
topology: v5e:2x2
jax: 0.10.0
libtpu: 0.0.40
codegen_flags: <defaults>
</compile_context>

<pallas_src>
import numpy as np

import jax
import jax.numpy as jnp
from jax import lax
from jax.experimental import pallas as pl
from jax.experimental.pallas import tpu as pltpu


SAMPLES_PER_BLOCK = 8   # conv1 M = 256 rows -> fills v6e/v7x MXU; fine on v5e too.


# ----------------------------- in-kernel helpers ----------------------------

def _shift_rows(a, k):
    """result[r] = a[(r + k) % R].  Valid rows never rely on the wraparound."""
    if k == 0:
        return a
    return pltpu.roll(a, shift=a.shape[0] - k, axis=0)


def _fold_taps(a, kh):
    """(R, L) -> (R, kh*L): lane block k holds `a` shifted up by k rows.

    Folds the kh conv row-taps into one wide contraction so each conv layer is
    a single MXU dot per output parity instead of kh small-K dots."""
    return jnp.concatenate([_shift_rows(a, k) for k in range(kh)], axis=1)


# ----------------------------- fused kernel ---------------------------------

def _lenet5_kernel(x_ref, m1e_ref, m1o_ref, b1_ref, sel1_ref,
                   m2e_ref, m2o_ref, b2_ref, selh_ref,
                   f1_ref, bf1_ref, w2_ref, bf2_ref, w3_ref, bf3_ref,
                   out_ref):
    f32, bf16 = jnp.float32, jnp.bfloat16
    S = out_ref.shape[0]                                   # samples in this block

    def dot(a, b):                                         # bf16 MXU dot, f32 acc
        return jnp.dot(a.astype(bf16), b.astype(bf16),
                       preferred_element_type=f32)

    # ---- conv1 + ReLU: 5 row taps folded into K=160; even/odd output columns.
    x = x_ref[...]                                         # (S*32, 32) f32
    lhs1 = _fold_taps(x, 5)                                # (S*32, 160)
    a1e = jnp.maximum(dot(lhs1, m1e_ref[...]) + b1_ref[...], 0.0)   # (S*32, 84)
    a1o = jnp.maximum(dot(lhs1, m1o_ref[...]) + b1_ref[...], 0.0)

    # ---- pool1: column max (even vs odd cols), row max (roll), even-row compaction.
    cm1 = jnp.maximum(a1e, a1o)
    rm1 = jnp.maximum(cm1, _shift_rows(cm1, 1))            # max(row r, row r+1)
    p1 = dot(sel1_ref[...], rm1)                           # (S*16, 84), 14 valid rows/sample

    # ---- conv2 + ReLU: 5 row taps folded into K=420; even/odd output columns.
    lhs2 = _fold_taps(p1, 5)                               # (S*16, 420)
    a2e = jnp.maximum(dot(lhs2, m2e_ref[...]) + b2_ref[...], 0.0)   # (S*16, 80)
    a2o = jnp.maximum(dot(lhs2, m2o_ref[...]) + b2_ref[...], 0.0)

    # ---- pool2 + flatten: column max, row max, gather the 5 pooled rows per
    #      sample (grouped by row h) and move them into the lane axis.
    cm2 = jnp.maximum(a2e, a2o)
    rm2 = jnp.maximum(cm2, _shift_rows(cm2, 1))
    q = dot(selh_ref[...], rm2)                            # (5*S, 80)
    z = jnp.concatenate([q[h * S:(h + 1) * S] for h in range(5)], axis=1)  # (S, 400)

    # ---- fc1 / fc2 / fc3 (logits padded to 128 lanes for a dense store).
    a3 = jnp.maximum(dot(z, f1_ref[...]) + bf1_ref[...], 0.0)        # (S, 120)
    a4 = jnp.maximum(dot(a3, w2_ref[...]) + bf2_ref[...], 0.0)       # (S, 84)
    out_ref[...] = dot(a4, w3_ref[...]) + bf3_ref[...]               # (S, 128)


# ----------------------------- wrapper ---------------------------------------

def lenet5_forward(x, prep):
    """x: (B, 1, 28, 28) NCHW float32.  prep: output of prepare_params()."""
    B = x.shape[0]
    S = prep["sel1"].shape[0] // 16                        # samples per block (static)
    nblk = (B + S - 1) // S
    Bp = nblk * S

    # Pad spatial to 32x32 (conv1 padding=2) and batch up to a multiple of S,
    # then merge (batch, row) -> rows: each sample owns 32 consecutive rows.
    xp = jnp.pad(x[:, 0], ((0, Bp - B), (2, 2), (2, 2)))   # (Bp, 32, 32)
    xr = xp.reshape(Bp * 32, 32)

    def fixed(a):                                          # whole-array, grid-invariant
        return pl.BlockSpec(a.shape, lambda b, _nd=a.ndim: (0,) * _nd)

    names = ("m1e", "m1o", "b1", "sel1", "m2e", "m2o", "b2", "selh",
             "f1", "bf1", "w2", "bf2", "w3", "bf3")
    weights = [prep[n] for n in names]

    out = pl.pallas_call(
        _lenet5_kernel,
        out_shape=jax.ShapeDtypeStruct((Bp, 128), jnp.float32),
        grid=(nblk,),
        in_specs=[pl.BlockSpec((S * 32, 32), lambda b: (b, 0))]
                 + [fixed(a) for a in weights],
        out_specs=pl.BlockSpec((S, 128), lambda b: (b, 0)),
        compiler_params=pltpu.CompilerParams(
            dimension_semantics=("parallel",)),
    )(xr, *weights)
    return out[:B, :10]


# ----------------------------- one-time weight folding -----------------------

def prepare_params(p, samples_per_block=SAMPLES_PER_BLOCK):
    """Fold conv weights into tap-banded, parity-split matrices, precompute the
    pooling row-selection matrices, fold the torch flatten order into fc1, pad
    fc3 to 128 lanes, and cast all matmul operands to bf16.  Done once."""
    S = int(samples_per_block)
    f32 = np.float32

    w1 = np.asarray(p["conv1_w"], f32)[:, 0]               # (6, 5, 5)      [co, i, j]
    w2c = np.asarray(p["conv2_w"], f32)                    # (16, 6, 5, 5)  [co, c, i, j]

    # conv1: LHS lane 32*i + wcol holds x[row+i, wcol]; output lane 6*w + co for
    # spatial column ow = 2*w + parity.
    m1 = np.zeros((2, 5, 32, 14, 6), f32)                  # [par, i, wcol, w, co]
    for par in range(2):
        for i in range(5):
            for w in range(14):
                ow = 2 * w + par
                for j in range(5):
                    m1[par, i, ow + j, w, :] = w1[:, i, j]
    m1 = m1.reshape(2, 160, 84)
    b1 = np.tile(np.asarray(p["conv1_b"], f32), 14).reshape(1, 84)

    # conv2: LHS lane 84*i + 6*iw + c holds pool1[row+i, 6*iw + c]; output lane
    # 16*pw + co for spatial column ow = 2*pw + parity.
    m2 = np.zeros((2, 5, 14, 6, 5, 16), f32)               # [par, i, iw, c, pw, co]
    for par in range(2):
        for i in range(5):
            for pw in range(5):
                ow = 2 * pw + par
                for j in range(5):
                    for c in range(6):
                        m2[par, i, ow + j, c, pw, :] = w2c[:, c, i, j]
    m2 = m2.reshape(2, 420, 80)
    b2 = np.tile(np.asarray(p["conv2_b"], f32), 5).reshape(1, 80)

    # pool1 even-row compaction: row s*16 + t <- row s*32 + 2t  (t = 0..13).
    sel1 = np.zeros((S * 16, S * 32), f32)
    for s in range(S):
        for t in range(14):
            sel1[s * 16 + t, s * 32 + 2 * t] = 1.0

    # pool2 pooled-row gather grouped by h: row h*S + s <- row s*16 + 2h.
    selh = np.zeros((5 * S, S * 16), f32)
    for h in range(5):
        for s in range(S):
            selh[h * S + s, s * 16 + 2 * h] = 1.0

    # fc1: z lane 80*h + 16*pw + co corresponds to torch-flat index co*25 + h*5 + pw.
    fc1_w = np.asarray(p["fc1_w"], f32)                    # (400, 120), (in, out)
    f1 = np.zeros((5, 5, 16, 120), f32)                    # [h, pw, co, out]
    for h in range(5):
        for pw in range(5):
            for co in range(16):
                f1[h, pw, co] = fc1_w[co * 25 + h * 5 + pw]
    f1 = f1.reshape(400, 120)

    # fc3 padded to 128 output lanes for a dense store.
    w3 = np.zeros((84, 128), f32)
    w3[:, :10] = np.asarray(p["fc3_w"], f32)
    b3 = np.zeros((1, 128), f32)
    b3[0, :10] = np.asarray(p["fc3_b"], f32)

    bf16 = jnp.bfloat16
    return {
        "m1e": jnp.asarray(m1[0], bf16), "m1o": jnp.asarray(m1[1], bf16),
        "b1": jnp.asarray(b1),
        "sel1": jnp.asarray(sel1, bf16),
        "m2e": jnp.asarray(m2[0], bf16), "m2o": jnp.asarray(m2[1], bf16),
        "b2": jnp.asarray(b2),
        "selh": jnp.asarray(selh, bf16),
        "f1": jnp.asarray(f1, bf16),
        "bf1": jnp.asarray(np.asarray(p["fc1_b"], f32).reshape(1, 120)),
        "w2": jnp.asarray(np.asarray(p["fc2_w"], f32), bf16),
        "bf2": jnp.asarray(np.asarray(p["fc2_b"], f32).reshape(1, 84)),
        "w3": jnp.asarray(w3, bf16),
        "bf3": jnp.asarray(b3),
    }


# ----------------------------- reference & init ------------------------------

def reference_forward(x, p):
    """Pure-JAX (f32) reference for correctness checking."""
    def conv(x, w, b, pad):
        y = lax.conv_general_dilated(
            x, w, window_strides=(1, 1), padding=[(pad, pad), (pad, pad)],
            dimension_numbers=("NCHW", "OIHW", "NCHW"))
        return y + b[None, :, None, None]

    def maxpool2(x):
        B, C, H, W = x.shape
        return x.reshape(B, C, H // 2, 2, W // 2, 2).max(axis=(3, 5))

    y = jax.nn.relu(conv(x, p["conv1_w"], p["conv1_b"], pad=2))
    y = maxpool2(y)
    y = jax.nn.relu(conv(y, p["conv2_w"], p["conv2_b"], pad=0))
    y = maxpool2(y)
    y = y.reshape(x.shape[0], 16 * 5 * 5)
    y = jax.nn.relu(y @ p["fc1_w"] + p["fc1_b"])
    y = jax.nn.relu(y @ p["fc2_w"] + p["fc2_b"])
    return y @ p["fc3_w"] + p["fc3_b"]


def init_params(key):
    ks = jax.random.split(key, 10)

    def u(k, shape, fan_in):
        bound = float(fan_in) ** -0.5
        return jax.random.uniform(k, shape, jnp.float32, -bound, bound)

    return {
        "conv1_w": u(ks[0], (6, 1, 5, 5), 1 * 5 * 5),
        "conv1_b": u(ks[1], (6,), 1 * 5 * 5),
        "conv2_w": u(ks[2], (16, 6, 5, 5), 6 * 5 * 5),
        "conv2_b": u(ks[3], (16,), 6 * 5 * 5),
        # fc weights stored as (in, out); equivalent to torch's (out, in).T
        "fc1_w": u(ks[4], (400, 120), 400),
        "fc1_b": u(ks[5], (120,), 400),
        "fc2_w": u(ks[6], (120, 84), 120),
        "fc2_b": u(ks[7], (84,), 120),
        "fc3_w": u(ks[8], (84, 10), 84),
        "fc3_b": u(ks[9], (10,), 84),
    }


if __name__ == "__main__":
    key = jax.random.PRNGKey(0)
    k_x, k_p = jax.random.split(key)
    # LeNet-5 geometry fixes spatial size to 28x28 (fc1 expects 16*5*5).
    # B=16 -> two grid blocks of 8 samples (both TensorCores busy on v7x).
    B = 16
    x = jax.random.normal(k_x, (B, 1, 28, 28), jnp.float32)
    params = init_params(k_p)
    prep = prepare_params(params)            # one-time weight folding

    fwd = jax.jit(lenet5_forward)
    out = jax.block_until_ready(fwd(x, prep))
    assert out.shape == (B, 10)

    ref = reference_forward(x, params)
    # bf16 matmul operands (f32 accumulation) vs. an f32 reference.
    np.testing.assert_allclose(np.asarray(out), np.asarray(ref),
                               rtol=5e-2, atol=5e-2)
    print("KERNEL_OK")
</pallas_src>

<mosaic_0001>
module attributes {stable_mosaic.version = 11 : i64} {
  func.func @_lenet5_kernel(%arg0: i32, %arg1: memref<256x32xf32, #tpu.memory_space<vmem>>, %arg2: memref<160x84xbf16, #tpu.memory_space<vmem>>, %arg3: memref<160x84xbf16, #tpu.memory_space<vmem>>, %arg4: memref<1x84xf32, #tpu.memory_space<vmem>>, %arg5: memref<128x256xbf16, #tpu.memory_space<vmem>>, %arg6: memref<420x80xbf16, #tpu.memory_space<vmem>>, %arg7: memref<420x80xbf16, #tpu.memory_space<vmem>>, %arg8: memref<1x80xf32, #tpu.memory_space<vmem>>, %arg9: memref<40x128xbf16, #tpu.memory_space<vmem>>, %arg10: memref<400x120xbf16, #tpu.memory_space<vmem>>, %arg11: memref<1x120xf32, #tpu.memory_space<vmem>>, %arg12: memref<120x84xbf16, #tpu.memory_space<vmem>>, %arg13: memref<1x84xf32, #tpu.memory_space<vmem>>, %arg14: memref<84x128xbf16, #tpu.memory_space<vmem>>, %arg15: memref<1x128xf32, #tpu.memory_space<vmem>>, %arg16: memref<8x128xf32, #tpu.memory_space<vmem>>) attributes {dimension_semantics = [#tpu.dimension_semantics<parallel>], iteration_bounds = array<i64: 2>, scalar_prefetch = 0 : i64, scratch_operands = 0 : i64, tpu.core_type = #tpu.core_type<tc>, window_params = [{transform_indices = @transform_0, window_bounds = array<i64: 256, 32>}, {pipeline_mode = #tpu.pipeline_mode<synchronous>, transform_indices = @transform_1, window_bounds = array<i64: 160, 84>}, {pipeline_mode = #tpu.pipeline_mode<synchronous>, transform_indices = @transform_2, window_bounds = array<i64: 160, 84>}, {pipeline_mode = #tpu.pipeline_mode<synchronous>, transform_indices = @transform_3, window_bounds = array<i64: 1, 84>}, {pipeline_mode = #tpu.pipeline_mode<synchronous>, transform_indices = @transform_4, window_bounds = array<i64: 128, 256>}, {pipeline_mode = #tpu.pipeline_mode<synchronous>, transform_indices = @transform_5, window_bounds = array<i64: 420, 80>}, {pipeline_mode = #tpu.pipeline_mode<synchronous>, transform_indices = @transform_6, window_bounds = array<i64: 420, 80>}, {pipeline_mode = #tpu.pipeline_mode<synchronous>, transform_indices = @transform_7, window_bounds = array<i64: 1, 80>}, {pipeline_mode = #tpu.pipeline_mode<synchronous>, transform_indices = @transform_8, window_bounds = array<i64: 40, 128>}, {pipeline_mode = #tpu.pipeline_mode<synchronous>, transform_indices = @transform_9, window_bounds = array<i64: 400, 120>}, {pipeline_mode = #tpu.pipeline_mode<synchronous>, transform_indices = @transform_10, window_bounds = array<i64: 1, 120>}, {pipeline_mode = #tpu.pipeline_mode<synchronous>, transform_indices = @transform_11, window_bounds = array<i64: 120, 84>}, {pipeline_mode = #tpu.pipeline_mode<synchronous>, transform_indices = @transform_12, window_bounds = array<i64: 1, 84>}, {pipeline_mode = #tpu.pipeline_mode<synchronous>, transform_indices = @transform_13, window_bounds = array<i64: 84, 128>}, {pipeline_mode = #tpu.pipeline_mode<synchronous>, transform_indices = @transform_14, window_bounds = array<i64: 1, 128>}, {transform_indices = @transform_15, window_bounds = array<i64: 8, 128>}]} {
    %c0 = arith.constant 0 : index
    %c0_0 = arith.constant 0 : index
    %0 = vector.load %arg1[%c0, %c0_0] : memref<256x32xf32, #tpu.memory_space<vmem>>, vector<256x32xf32>
    %c255_i32 = arith.constant 255 : i32
    %1 = tpu.dynamic_rotate %0 by %c255_i32 dim 0 : vector<256x32xf32>, i32 -> vector<256x32xf32>
    %c254_i32 = arith.constant 254 : i32
    %2 = tpu.dynamic_rotate %0 by %c254_i32 dim 0 : vector<256x32xf32>, i32 -> vector<256x32xf32>
    %c253_i32 = arith.constant 253 : i32
    %3 = tpu.dynamic_rotate %0 by %c253_i32 dim 0 : vector<256x32xf32>, i32 -> vector<256x32xf32>
    %c252_i32 = arith.constant 252 : i32
    %4 = tpu.dynamic_rotate %0 by %c252_i32 dim 0 : vector<256x32xf32>, i32 -> vector<256x32xf32>
    %5 = tpu.concatenate %0, %1, %2, %3, %4 in 1 : vector<256x32xf32>, vector<256x32xf32>, vector<256x32xf32>, vector<256x32xf32>, vector<256x32xf32> -> vector<256x160xf32>
    %c0_1 = arith.constant 0 : index
    %c0_2 = arith.constant 0 : index
    %6 = vector.load %arg2[%c0_1, %c0_2] : memref<160x84xbf16, #tpu.memory_space<vmem>>, vector<160x84xbf16>
    %7 = arith.truncf %5 : vector<256x160xf32> to vector<256x160xbf16>
    %cst = arith.constant dense<0.000000e+00> : vector<256x84xf32>
    %8 = tpu.matmul %7, %6, %cst {dimension_numbers = #tpu.dot_dimension_numbers<[1], [0], [0], [1], [0, 0, 1, 1], [], []>} : vector<256x160xbf16>, vector<160x84xbf16>, vector<256x84xf32> -> vector<256x84xf32>
    %c0_3 = arith.constant 0 : index
    %c0_4 = arith.constant 0 : index
    %9 = vector.load %arg4[%c0_3, %c0_4] : memref<1x84xf32, #tpu.memory_space<vmem>>, vector<1x84xf32>
    %10 = vector.broadcast %9 : vector<1x84xf32> to vector<256x84xf32>
    %11 = arith.addf %8, %10 : vector<256x84xf32>
    %cst_5 = arith.constant 0.000000e+00 : f32
    %12 = vector.broadcast %cst_5 : f32 to vector<256x84xf32>
    %13 = arith.maximumf %11, %12 : vector<256x84xf32>
    %c0_6 = arith.constant 0 : index
    %c0_7 = arith.constant 0 : index
    %14 = vector.load %arg3[%c0_6, %c0_7] : memref<160x84xbf16, #tpu.memory_space<vmem>>, vector<160x84xbf16>
    %15 = arith.truncf %5 : vector<256x160xf32> to vector<256x160xbf16>
    %cst_8 = arith.constant dense<0.000000e+00> : vector<256x84xf32>
    %16 = tpu.matmul %15, %14, %cst_8 {dimension_numbers = #tpu.dot_dimension_numbers<[1], [0], [0], [1], [0, 0, 1, 1], [], []>} : vector<256x160xbf16>, vector<160x84xbf16>, vector<256x84xf32> -> vector<256x84xf32>
    %c0_9 = arith.constant 0 : index
    %c0_10 = arith.constant 0 : index
    %17 = vector.load %arg4[%c0_9, %c0_10] : memref<1x84xf32, #tpu.memory_space<vmem>>, vector<1x84xf32>
    %18 = vector.broadcast %17 : vector<1x84xf32> to vector<256x84xf32>
    %19 = arith.addf %16, %18 : vector<256x84xf32>
    %cst_11 = arith.constant 0.000000e+00 : f32
    %20 = vector.broadcast %cst_11 : f32 to vector<256x84xf32>
    %21 = arith.maximumf %19, %20 : vector<256x84xf32>
    %22 = arith.maximumf %13, %21 : vector<256x84xf32>
    %c255_i32_12 = arith.constant 255 : i32
    %23 = tpu.dynamic_rotate %22 by %c255_i32_12 dim 0 : vector<256x84xf32>, i32 -> vector<256x84xf32>
    %24 = arith.maximumf %22, %23 : vector<256x84xf32>
    %c0_13 = arith.constant 0 : index
    %c0_14 = arith.constant 0 : index
    %25 = vector.load %arg5[%c0_13, %c0_14] : memref<128x256xbf16, #tpu.memory_space<vmem>>, vector<128x256xbf16>
    %26 = arith.truncf %24 : vector<256x84xf32> to vector<256x84xbf16>
    %cst_15 = arith.constant dense<0.000000e+00> : vector<128x84xf32>
    %27 = tpu.matmul %25, %26, %cst_15 {dimension_numbers = #tpu.dot_dimension_numbers<[1], [0], [0], [1], [0, 0, 1, 1], [], []>} : vector<128x256xbf16>, vector<256x84xbf16>, vector<128x84xf32> -> vector<128x84xf32>
    %c127_i32 = arith.constant 127 : i32
    %28 = tpu.dynamic_rotate %27 by %c127_i32 dim 0 : vector<128x84xf32>, i32 -> vector<128x84xf32>
    %c126_i32 = arith.constant 126 : i32
    %29 = tpu.dynamic_rotate %27 by %c126_i32 dim 0 : vector<128x84xf32>, i32 -> vector<128x84xf32>
    %c125_i32 = arith.constant 125 : i32
    %30 = tpu.dynamic_rotate %27 by %c125_i32 dim 0 : vector<128x84xf32>, i32 -> vector<128x84xf32>
    %c124_i32 = arith.constant 124 : i32
    %31 = tpu.dynamic_rotate %27 by %c124_i32 dim 0 : vector<128x84xf32>, i32 -> vector<128x84xf32>
    %32 = tpu.concatenate %27, %28, %29, %30, %31 in 1 : vector<128x84xf32>, vector<128x84xf32>, vector<128x84xf32>, vector<128x84xf32>, vector<128x84xf32> -> vector<128x420xf32>
    %c0_16 = arith.constant 0 : index
    %c0_17 = arith.constant 0 : index
    %33 = vector.load %arg6[%c0_16, %c0_17] : memref<420x80xbf16, #tpu.memory_space<vmem>>, vector<420x80xbf16>
    %34 = arith.truncf %32 : vector<128x420xf32> to vector<128x420xbf16>
    %cst_18 = arith.constant dense<0.000000e+00> : vector<128x80xf32>
    %35 = tpu.matmul %34, %33, %cst_18 {dimension_numbers = #tpu.dot_dimension_numbers<[1], [0], [0], [1], [0, 0, 1, 1], [], []>} : vector<128x420xbf16>, vector<420x80xbf16>, vector<128x80xf32> -> vector<128x80xf32>
    %c0_19 = arith.constant 0 : index
    %c0_20 = arith.constant 0 : index
    %36 = vector.load %arg8[%c0_19, %c0_20] : memref<1x80xf32, #tpu.memory_space<vmem>>, vector<1x80xf32>
    %37 = vector.broadcast %36 : vector<1x80xf32> to vector<128x80xf32>
    %38 = arith.addf %35, %37 : vector<128x80xf32>
    %cst_21 = arith.constant 0.000000e+00 : f32
    %39 = vector.broadcast %cst_21 : f32 to vector<128x80xf32>
    %40 = arith.maximumf %38, %39 : vector<128x80xf32>
    %c0_22 = arith.constant 0 : index
    %c0_23 = arith.constant 0 : index
    %41 = vector.load %arg7[%c0_22, %c0_23] : memref<420x80xbf16, #tpu.memory_space<vmem>>, vector<420x80xbf16>
    %42 = arith.truncf %32 : vector<128x420xf32> to vector<128x420xbf16>
    %cst_24 = arith.constant dense<0.000000e+00> : vector<128x80xf32>
    %43 = tpu.matmul %42, %41, %cst_24 {dimension_numbers = #tpu.dot_dimension_numbers<[1], [0], [0], [1], [0, 0, 1, 1], [], []>} : vector<128x420xbf16>, vector<420x80xbf16>, vector<128x80xf32> -> vector<128x80xf32>
    %c0_25 = arith.constant 0 : index
    %c0_26 = arith.constant 0 : index
    %44 = vector.load %arg8[%c0_25, %c0_26] : memref<1x80xf32, #tpu.memory_space<vmem>>, vector<1x80xf32>
    %45 = vector.broadcast %44 : vector<1x80xf32> to vector<128x80xf32>
    %46 = arith.addf %43, %45 : vector<128x80xf32>
    %cst_27 = arith.constant 0.000000e+00 : f32
    %47 = vector.broadcast %cst_27 : f32 to vector<128x80xf32>
    %48 = arith.maximumf %46, %47 : vector<128x80xf32>
    %49 = arith.maximumf %40, %48 : vector<128x80xf32>
    %c127_i32_28 = arith.constant 127 : i32
    %50 = tpu.dynamic_rotate %49 by %c127_i32_28 dim 0 : vector<128x80xf32>, i32 -> vector<128x80xf32>
    %51 = arith.maximumf %49, %50 : vector<128x80xf32>
    %c0_29 = arith.constant 0 : index
    %c0_30 = arith.constant 0 : index
    %52 = vector.load %arg9[%c0_29, %c0_30] : memref<40x128xbf16, #tpu.memory_space<vmem>>, vector<40x128xbf16>
    %53 = arith.truncf %51 : vector<128x80xf32> to vector<128x80xbf16>
    %cst_31 = arith.constant dense<0.000000e+00> : vector<40x80xf32>
    %54 = tpu.matmul %52, %53, %cst_31 {dimension_numbers = #tpu.dot_dimension_numbers<[1], [0], [0], [1], [0, 0, 1, 1], [], []>} : vector<40x128xbf16>, vector<128x80xbf16>, vector<40x80xf32> -> vector<40x80xf32>
    %55 = vector.extract_strided_slice %54 {offsets = [0, 0], sizes = [8, 80], strides = [1, 1]} : vector<40x80xf32> to vector<8x80xf32>
    %56 = vector.extract_strided_slice %54 {offsets = [8, 0], sizes = [8, 80], strides = [1, 1]} : vector<40x80xf32> to vector<8x80xf32>
    %57 = vector.extract_strided_slice %54 {offsets = [16, 0], sizes = [8, 80], strides = [1, 1]} : vector<40x80xf32> to vector<8x80xf32>
    %58 = vector.extract_strided_slice %54 {offsets = [24, 0], sizes = [8, 80], strides = [1, 1]} : vector<40x80xf32> to vector<8x80xf32>
    %59 = vector.extract_strided_slice %54 {offsets = [32, 0], sizes = [8, 80], strides = [1, 1]} : vector<40x80xf32> to vector<8x80xf32>
    %60 = tpu.concatenate %55, %56, %57, %58, %59 in 1 : vector<8x80xf32>, vector<8x80xf32>, vector<8x80xf32>, vector<8x80xf32>, vector<8x80xf32> -> vector<8x400xf32>
    %c0_32 = arith.constant 0 : index
    %c0_33 = arith.constant 0 : index
    %61 = vector.load %arg10[%c0_32, %c0_33] : memref<400x120xbf16, #tpu.memory_space<vmem>>, vector<400x120xbf16>
    %62 = arith.truncf %60 : vector<8x400xf32> to vector<8x400xbf16>
    %cst_34 = arith.constant dense<0.000000e+00> : vector<8x120xf32>
    %63 = tpu.matmul %62, %61, %cst_34 {dimension_numbers = #tpu.dot_dimension_numbers<[1], [0], [0], [1], [0, 0, 1, 1], [], []>} : vector<8x400xbf16>, vector<400x120xbf16>, vector<8x120xf32> -> vector<8x120xf32>
    %c0_35 = arith.constant 0 : index
    %c0_36 = arith.constant 0 : index
    %64 = vector.load %arg11[%c0_35, %c0_36] : memref<1x120xf32, #tpu.memory_space<vmem>>, vector<1x120xf32>
    %65 = vector.broadcast %64 : vector<1x120xf32> to vector<8x120xf32>
    %66 = arith.addf %63, %65 : vector<8x120xf32>
    %cst_37 = arith.constant 0.000000e+00 : f32
    %67 = vector.broadcast %cst_37 : f32 to vector<8x120xf32>
    %68 = arith.maximumf %66, %67 : vector<8x120xf32>
    %c0_38 = arith.constant 0 : index
    %c0_39 = arith.constant 0 : index
    %69 = vector.load %arg12[%c0_38, %c0_39] : memref<120x84xbf16, #tpu.memory_space<vmem>>, vector<120x84xbf16>
    %70 = arith.truncf %68 : vector<8x120xf32> to vector<8x120xbf16>
    %cst_40 = arith.constant dense<0.000000e+00> : vector<8x84xf32>
    %71 = tpu.matmul %70, %69, %cst_40 {dimension_numbers = #tpu.dot_dimension_numbers<[1], [0], [0], [1], [0, 0, 1, 1], [], []>} : vector<8x120xbf16>, vector<120x84xbf16>, vector<8x84xf32> -> vector<8x84xf32>
    %c0_41 = arith.constant 0 : index
    %c0_42 = arith.constant 0 : index
    %72 = vector.load %arg13[%c0_41, %c0_42] : memref<1x84xf32, #tpu.memory_space<vmem>>, vector<1x84xf32>
    %73 = vector.broadcast %72 : vector<1x84xf32> to vector<8x84xf32>
    %74 = arith.addf %71, %73 : vector<8x84xf32>
    %cst_43 = arith.constant 0.000000e+00 : f32
    %75 = vector.broadcast %cst_43 : f32 to vector<8x84xf32>
    %76 = arith.maximumf %74, %75 : vector<8x84xf32>
    %c0_44 = arith.constant 0 : index
    %c0_45 = arith.constant 0 : index
    %77 = vector.load %arg14[%c0_44, %c0_45] : memref<84x128xbf16, #tpu.memory_space<vmem>>, vector<84x128xbf16>
    %78 = arith.truncf %76 : vector<8x84xf32> to vector<8x84xbf16>
    %cst_46 = arith.constant dense<0.000000e+00> : vector<8x128xf32>
    %79 = tpu.matmul %78, %77, %cst_46 {dimension_numbers = #tpu.dot_dimension_numbers<[1], [0], [0], [1], [0, 0, 1, 1], [], []>} : vector<8x84xbf16>, vector<84x128xbf16>, vector<8x128xf32> -> vector<8x128xf32>
    %c0_47 = arith.constant 0 : index
    %c0_48 = arith.constant 0 : index
    %80 = vector.load %arg15[%c0_47, %c0_48] : memref<1x128xf32, #tpu.memory_space<vmem>>, vector<1x128xf32>
    %81 = vector.broadcast %80 : vector<1x128xf32> to vector<8x128xf32>
    %82 = arith.addf %79, %81 : vector<8x128xf32>
    %c0_49 = arith.constant 0 : index
    %c0_50 = arith.constant 0 : index
    %83 = vector.load %arg16[%c0_49, %c0_50] : memref<8x128xf32, #tpu.memory_space<vmem>>, vector<8x128xf32>
    tpu.vector_store %arg16[%c0_49, %c0_50], %82 {strides = array<i32>} : memref<8x128xf32, #tpu.memory_space<vmem>>, vector<8x128xf32>,
    return
  }
  func.func @transform_0(%arg0: i32) -> (i32, i32) {
    %c0_i32 = arith.constant 0 : i32
    %c0_i32_0 = arith.constant 0 : i32
    return %arg0, %c0_i32 : i32, i32
  }
  func.func @transform_1(%arg0: i32) -> (i32, i32) {
    %c0_i32 = arith.constant 0 : i32
    %c0_i32_0 = arith.constant 0 : i32
    %c0_i32_1 = arith.constant 0 : i32
    return %c0_i32, %c0_i32_0 : i32, i32
  }
  func.func @transform_2(%arg0: i32) -> (i32, i32) {
    %c0_i32 = arith.constant 0 : i32
    %c0_i32_0 = arith.constant 0 : i32
    %c0_i32_1 = arith.constant 0 : i32
    return %c0_i32, %c0_i32_0 : i32, i32
  }
  func.func @transform_3(%arg0: i32) -> (i32, i32) {
    %c0_i32 = arith.constant 0 : i32
    %c0_i32_0 = arith.constant 0 : i32
    %c0_i32_1 = arith.constant 0 : i32
    return %c0_i32, %c0_i32_0 : i32, i32
  }
  func.func @transform_4(%arg0: i32) -> (i32, i32) {
    %c0_i32 = arith.constant 0 : i32
    %c0_i32_0 = arith.constant 0 : i32
    %c0_i32_1 = arith.constant 0 : i32
    return %c0_i32, %c0_i32_0 : i32, i32
  }
  func.func @transform_5(%arg0: i32) -> (i32, i32) {
    %c0_i32 = arith.constant 0 : i32
    %c0_i32_0 = arith.constant 0 : i32
    %c0_i32_1 = arith.constant 0 : i32
    return %c0_i32, %c0_i32_0 : i32, i32
  }
  func.func @transform_6(%arg0: i32) -> (i32, i32) {
    %c0_i32 = arith.constant 0 : i32
    %c0_i32_0 = arith.constant 0 : i32
    %c0_i32_1 = arith.constant 0 : i32
    return %c0_i32, %c0_i32_0 : i32, i32
  }
  func.func @transform_7(%arg0: i32) -> (i32, i32) {
    %c0_i32 = arith.constant 0 : i32
    %c0_i32_0 = arith.constant 0 : i32
    %c0_i32_1 = arith.constant 0 : i32
    return %c0_i32, %c0_i32_0 : i32, i32
  }
  func.func @transform_8(%arg0: i32) -> (i32, i32) {
    %c0_i32 = arith.constant 0 : i32
    %c0_i32_0 = arith.constant 0 : i32
    %c0_i32_1 = arith.constant 0 : i32
    return %c0_i32, %c0_i32_0 : i32, i32
  }
  func.func @transform_9(%arg0: i32) -> (i32, i32) {
    %c0_i32 = arith.constant 0 : i32
    %c0_i32_0 = arith.constant 0 : i32
    %c0_i32_1 = arith.constant 0 : i32
    return %c0_i32, %c0_i32_0 : i32, i32
  }
  func.func @transform_10(%arg0: i32) -> (i32, i32) {
    %c0_i32 = arith.constant 0 : i32
    %c0_i32_0 = arith.constant 0 : i32
    %c0_i32_1 = arith.constant 0 : i32
    return %c0_i32, %c0_i32_0 : i32, i32
  }
  func.func @transform_11(%arg0: i32) -> (i32, i32) {
    %c0_i32 = arith.constant 0 : i32
    %c0_i32_0 = arith.constant 0 : i32
    %c0_i32_1 = arith.constant 0 : i32
    return %c0_i32, %c0_i32_0 : i32, i32
  }
  func.func @transform_12(%arg0: i32) -> (i32, i32) {
    %c0_i32 = arith.constant 0 : i32
    %c0_i32_0 = arith.constant 0 : i32
    %c0_i32_1 = arith.constant 0 : i32
    return %c0_i32, %c0_i32_0 : i32, i32
  }
  func.func @transform_13(%arg0: i32) -> (i32, i32) {
    %c0_i32 = arith.constant 0 : i32
    %c0_i32_0 = arith.constant 0 : i32
    %c0_i32_1 = arith.constant 0 : i32
    return %c0_i32, %c0_i32_0 : i32, i32
  }
  func.func @transform_14(%arg0: i32) -> (i32, i32) {
    %c0_i32 = arith.constant 0 : i32
    %c0_i32_0 = arith.constant 0 : i32
    %c0_i32_1 = arith.constant 0 : i32
    return %c0_i32, %c0_i32_0 : i32, i32
  }
  func.func @transform_15(%arg0: i32) -> (i32, i32) {
    %c0_i32 = arith.constant 0 : i32
    %c0_i32_0 = arith.constant 0 : i32
    return %arg0, %c0_i32 : i32, i32
  }
}

</mosaic_0001>

<bundles_post_ra>
// kernel: lenet5_forward.1
= control target key start
LH: loop header
LB: loop body
LE: loop exit
PB: predicated region body
PF: predicated region fallthrough
CT: control target
= control target key end

     0   :  { %s7853_s0 = inlined_call_operand.vmem [shape: f32[512,32], index: 0, kind: input, shape index: {}]   ;;  %s7854_s1 = inlined_call_operand.vmem [shape: bf16[160,84], index: 1, kind: input, shape index: {}]   ;;  %s7855_s2 = inlined_call_operand.vmem [shape: bf16[160,84], index: 2, kind: input, shape index: {}]   ;;  %s7856_s3 = inlined_call_operand.vmem [shape: f32[1,84], index: 3, kind: input, shape index: {}]   ;;  %s7857_s4 = inlined_call_operand.vmem [shape: bf16[128,256], index: 4, kind: input, shape index: {}]   ;;  %s7858_s5 = inlined_call_operand.vmem [shape: bf16[420,80], index: 5, kind: input, shape index: {}]   ;;  %s7859_s6 = inlined_call_operand.vmem [shape: bf16[420,80], index: 6, kind: input, shape index: {}]   ;;  %s7860_s7 = inlined_call_operand.vmem [shape: f32[1,80], index: 7, kind: input, shape index: {}]   ;;  %s7861_s8 = inlined_call_operand.vmem [shape: bf16[40,128], index: 8, kind: input, shape index: {}]   ;;  %s7862_s9 = inlined_call_operand.vmem [shape: bf16[400,120], index: 9, kind: input, shape index: {}]   ;;  %s7863_s10 = inlined_call_operand.vmem [shape: f32[1,120], index: 10, kind: input, shape index: {}]   ;;  %s7864_s11 = inlined_call_operand.vmem [shape: bf16[120,84], index: 11, kind: input, shape index: {}]   ;;  %s7865_s12 = inlined_call_operand.vmem [shape: f32[1,84], index: 12, kind: input, shape index: {}]   ;;  %s7866_s13 = inlined_call_operand.vmem [shape: bf16[84,128], index: 13, kind: input, shape index: {}]   ;;  %s7867_s14 = inlined_call_operand.vmem [shape: f32[1,128], index: 14, kind: input, shape index: {}]   ;;  %s7868_s15 = inlined_call_operand.hbm [shape: f32[16,128], index: 15, kind: output, shape index: {}]  }
   0x1   :  { %7886 = sst [smem:[#allocation8_spill]] %s7853_s0 }
   0x2   :  { %7887 = sst [smem:[#allocation9_spill]] %s7854_s1 }
   0x3   :  { %7888 = sst [smem:[#allocation10_spill]] %s7855_s2 }
   0x4   :  { %7889 = sst [smem:[#allocation11_spill]] %s7856_s3 }
   0x5   :  { %20 = vsyncpa [#allocation3], 0 }
   0x6   :  { %22 = vsyncpa [#allocation3 + $0x1], 0  ;;  %s5578_s18 = smov 0   ;;  %s5580_s19 = smov 0  }
   0x7   :  { %s5582_s20 = smov 0   ;;  %s5584_s21 = smov 0  }
   0x8 LB: > { %7890 = sst [smem:[#allocation5_spill]] %s5484_s20  ;;  %s5599_s22 = sadd.s32 4294967295, %s5488_s21   ;;  %s5488_s21 = sphi %s5584_s21, %s7906_s21   ;;  %s5484_s20 = sphi %s5582_s20, %s7908_s20   ;;  %s5480_s19 = sphi %s5580_s19, %s7910_s19   ;;  %s5476_s18 = sphi %s5578_s18, %s7909_s18  }
   0x9   : > { %s4276_s23 = sadd.s32 4294967294, %s5488_s21   ;;  %s5603_s24 = sadd.s32 1, %s5488_s21  }
   0xa   : > { %7891 = sst [smem:[#allocation6_spill]] %s5603_s24  ;;  %s355_s25 = sadd.s32 1, %s5484_s20 }
   0xb   : > { %s352_s26 = ssub.s32 %s5488_s21, %s5603_s24  ;;  %p365_p0 = scmp.ne.s32.totalorder %s5484_s20, %s5480_s19 }
   0xc   : > { %p353_p1 = scmp.eq.s32.totalorder %s352_s26, 0  ;;  %p366_p2 = scmp.eq.s32.totalorder %s5599_s22, 1 }
   0xd   : > { %p371_p3 = scmp.ne.s32.totalorder %s5480_s19, %s5476_s18  ;;  %p372_p4 = scmp.eq.s32.totalorder %s4276_s23, 1 }
   0xe   : > { %s5614_s27 = scalar_select %p353_p1, %s5484_s20, %s355_s25  }
   0xf   : > { %p5616_p5 = por %p366_p2, %p365_p0  ;;  %p5620_p6 = por %p372_p4, %p371_p3 }
  0x10   : > { %7892 = sst [smem:[#allocation7_spill]] %s5614_s27  ;;  %p4279_p7 = scmp.ge.s32.totalorder %s5488_s21, 1 }
  0x11   : > { %p441_p8 = scmp.lt.s32.totalorder %s5488_s21, 3 }
  0x13   : > { %p442_p9 = pnand %p4279_p7, %p441_p8 }
  0x14   : > { %s4281_s30 = sshll.u32 (!%p442_p9), %s5599_s22, 5  ;;  %s7895_s0 = sld [smem:[#allocation8_spill]] (!%p442_p9) }
  0x15   : > { %445 = sbr.rel (%p442_p9) target bundleno = 1991 (0x7c7), region = 80  ;;  %p490_p10 = scmp.lt.s32.totalorder (!%p442_p9), %s4281_s30, 63 }
  0x16   : > { %s7873_s26 = smov (!%p442_p9), 32   ;;  %s7896_s1 = sld [smem:[#allocation9_spill]] (!%p442_p9) }
  0x17   : > { %s7897_s2 = sld [smem:[#allocation10_spill]] (!%p442_p9)  ;;  %s7899_s17 = smov (!%p442_p9), 64  }
  0x18   : > { %s7901_s3 = sld [smem:[#allocation11_spill]] (!%p442_p9)  ;;  %s7880_s20 = smov (!%p442_p9), 124  }
  0x19   : > { %s7905_s23 = smov (!%p442_p9), 40   ;;  %s4843_s24 = sshll.u32 (!%p442_p9), %s5599_s22, 3 }
  0x1a   : > { %v560_v0 = vlaneseq  ;;  %s7912_s30 = smov (!%p490_p10, %s4281_s30), 63  ;;  %vm1174_vm4 = vcmask 261120   ;;  %vm1207_vm5 = vcmask 523264   ;;  %vm1240_vm6 = vcmask 785408   ;;  %s5446_s27 = scalar_lea.hbm %s7868_s15, 16 }
  0x1b   : > { %s4282_s16 = sshll.u32 %s7912_s30, 3  ;;  %s7869_s30 = smov 96   ;;  %vm3000_vm7 = vcmask 1041408   ;;  %vm2659_vm8 = vcmask 687104   ;;  %vm2676_vm9 = vcmask 326656   ;;  %vm2693_vm10 = vcmask 1014784  }
  0x1c   : > { %v5627_v1 = vshrl.u32 %v560_v0, 7  ;;  %s5632_s25 = scalar_lea.vmem %s7895_s0, %s4282_s16  ;;  %s7871_s16 = smov 64   ;;  %v4853_v48 = vld [vmem:[%s7896_s1 + $0x38] sm:$0xff]  ;;  %v4852_v56 = vld [vmem:[%s7896_s1 + $0x30] sm:$0xff]  ;;  %vm2710_vm11 = vcmask 654336   ;;  %vm2975_vm12 = vcmask 293888  }
  0x1d   : > { %v5635_v2 = vld [vmem:[%s5632_s25] sm:$0xff]  ;;  %v5638_v3 = vld [vmem:[%s5632_s25 + $0x8] sm:$0xff]  ;;  %v5641_v4 = vld [vmem:[%s5632_s25 + $0x10] sm:$0xff]  ;;  %1437 = vmatpush.bf16.msra.mxu0 %v4853_v48  ;;  %s7900_s0 = smov 32   ;;  %vm3777_vm13 = vcmask 916480   ;;  %vm3988_vm14 = vcmask 130048  }
  0x1e   : > { %vm562_vm0 = vcmp.lt.s32.totalorder %v5627_v1, 7  ;;  %vm692_vm1 = vcmp.lt.s32.totalorder %v5627_v1, 5  ;;  %v528_v5 = vrot.slane %v5635_v2, 1  ;;  %v529_v6 = vrot.slane %v5638_v3, 1  ;;  %v5650_v9 = vld [vmem:[%s5632_s25 + $0x18] sm:$0xff]  ;;  %v5657_v13 = vld [vmem:[%s5632_s25 + $0x20] sm:$0xff] }
  0x1f   : > { %v530_v7 = vrot.slane %v5641_v4, 1  ;;  %v660_v8 = vrot.slane %v5635_v2, 3  ;;  %v661_v10 = vrot.slane %v5638_v3, 3  ;;  %v662_v11 = vrot.slane %v5641_v4, 3  ;;  %v5694_v32 = vld [vmem:[%s5632_s25 + $0x28] sm:$0xff]  ;;  %v5697_v33 = vld [vmem:[%s5632_s25 + $0x30] sm:$0xff] }
  0x20   : > { %v595_v12 = vrot.slane %v5635_v2, 2  ;;  %vm627_vm2 = vcmp.lt.s32.totalorder %v5627_v1, 6  ;;  %v593_v15 = vsel %vm562_vm0, %v528_v5, %v529_v6  ;;  %v596_v16 = vrot.slane %v5638_v3, 2  ;;  %v4863_v49 = vld [vmem:[%s7897_s2 + $0x38] sm:$0xff]  ;;  %v5730_v53 = vld [vmem:[%s5632_s25 + $0x40] sm:$0xff]  ;;  %v4862_v57 = vld [vmem:[%s7897_s2 + $0x30] sm:$0xff] }
  0x21   : > { %v592_v14 = vsel %vm562_vm0, %v529_v6, %v530_v7  ;;  %v597_v17 = vrot.slane %v5641_v4, 2  ;;  %v722_v19 = vsel %vm692_vm1, %v661_v10, %v662_v11  ;;  %v723_v20 = vsel %vm692_vm1, %v660_v8, %v661_v10  ;;  %v5727_v52 = vld [vmem:[%s5632_s25 + $0x38] sm:$0xff]  ;;  %1727 = vmatpush.bf16.msra.mxu2 %v4863_v49  ;;  %1438 = vmatpush.bf16.msra.mxu0 %v4852_v56 }
  0x22   : > { %v5020_v18 = vpack.i.bf16 %v592_v14, %v593_v15  ;;  %v531_v21 = vrot.slane %v5650_v9, 1  ;;  %v5030_v22 = vpack.i.bf16 %v722_v19, %v723_v20  ;;  %v532_v23 = vrot.slane %v5657_v13, 1  ;;  %v4851_v14 = vld [vmem:[%s7896_s1 + $0x28] sm:$0xff]  ;;  %v5769_v19 = vld [vmem:[%s5632_s25 + $0x50] sm:$0xff] }
  0x23   : > { %v598_v24 = vrot.slane %v5650_v9, 2  ;;  %v599_v25 = vrot.slane %v5657_v13, 2  ;;  %v657_v26 = vsel %vm627_vm2, %v596_v16, %v597_v17  ;;  %v658_v27 = vsel %vm627_vm2, %v595_v12, %v596_v16  ;;  %v4861_v15 = vld [vmem:[%s7897_s2 + $0x28] sm:$0xff] }
  0x24   : > { %5021 = vrot.lane.b32.xlu0 %v5020_v18, %s7873_s26  ;;  %5031 = vrot.lane.b32.xlu1 %v5030_v22, %s7869_s30  ;;  %v590_v28 = vsel %vm562_vm0, %v531_v21, %v532_v23  ;;  %v591_v29 = vsel %vm562_vm0, %v530_v7, %v531_v21  ;;  %v5025_v35 = vpack.i.bf16 %v657_v26, %v658_v27  ;;  %v663_v36 = vrot.slane %v5650_v9, 3  ;;  %v5766_v18 = vld [vmem:[%s5632_s25 + $0x48] sm:$0xff]  ;;  %v4850_v22 = vld [vmem:[%s7896_s1 + $0x20] sm:$0xff] }
  0x25   : > { %v655_v30 = vsel %vm627_vm2, %v598_v24, %v599_v25  ;;  %v656_v31 = vsel %vm627_vm2, %v597_v17, %v598_v24  ;;  %v664_v37 = vrot.slane %v5657_v13, 3  ;;  %v5035_v38 = vpack.i.bf16 %v590_v28, %v591_v29  ;;  %1728 = vmatpush.bf16.msra.mxu2 %v4862_v57  ;;  %1439 = vmatpush.bf16.msra.mxu0 %v4851_v14 }
  0x26   : > { %v5040_v34 = vpack.i.bf16 %v655_v30, %v656_v31  ;;  %v533_v39 = vrot.slane %v5694_v32, 1  ;;  %v534_v40 = vrot.slane %v5697_v33, 1  ;;  %v600_v41 = vrot.slane %v5694_v32, 2 }
  0x27   : > { %v601_v42 = vrot.slane %v5697_v33, 2  ;;  %v720_v43 = vsel %vm692_vm1, %v663_v36, %v664_v37  ;;  %v721_v44 = vsel %vm692_vm1, %v662_v11, %v663_v36  ;;  %v665_v54 = vrot.slane %v5694_v32, 3 }
  0x28   : > { %5041 = vrot.lane.b32.xlu2 %v5040_v34, %s7871_s16  ;;  %v588_v45 = vsel %vm562_vm0, %v533_v39, %v534_v40  ;;  %v589_v46 = vsel %vm562_vm0, %v532_v23, %v533_v39  ;;  %v5045_v47 = vpack.i.bf16 %v720_v43, %v721_v44  ;;  %v654_v51 = vsel %vm627_vm2, %v599_v25, %v600_v41  ;;  %v4860_v23 = vld [vmem:[%s7897_s2 + $0x20] sm:$0xff]  ;;  %v4849_v34 = vld [vmem:[%s7896_s1 + $0x18] sm:$0xff] }
  0x29   : > { %v653_v50 = vsel %vm627_vm2, %v600_v41, %v601_v42  ;;  %v666_v55 = vrot.slane %v5697_v33, 3  ;;  %v5050_v58 = vpack.i.bf16 %v588_v45, %v589_v46  ;;  %v535_v60 = vrot.slane %v5727_v52, 1  ;;  %1729 = vmatpush.bf16.msra.mxu2 %v4861_v15  ;;  %1440 = vmatpush.bf16.msra.mxu0 %v4850_v22  ;;  %v5805_v41 = vld [vmem:[%s5632_s25 + $0x58] sm:$0xff] }
  0x2a   : > { %v5055_v59 = vpack.i.bf16 %v653_v50, %v654_v51  ;;  %v536_v61 = vrot.slane %v5730_v53, 1  ;;  %v602_v62 = vrot.slane %v5727_v52, 2  ;;  %v603_v63 = vrot.slane %v5730_v53, 2 }
  0x2b   : > { %v718_v0 = vsel %vm692_vm1, %v665_v54, %v666_v55  ;;  %v719_v6 = vsel %vm692_vm1, %v664_v37, %v665_v54  ;;  %v587_v10 = vsel %vm562_vm0, %v534_v40, %v535_v60  ;;  %v667_v20 = vrot.slane %v5727_v52, 3 }
  0x2c   : > { %5026 = vrot.lane.b32.xlu0 %v5025_v35, %s7871_s16  ;;  %5036 = vrot.lane.b32.xlu1 %v5035_v38, %s7873_s26  ;;  %s7898_s16 = smov 96   ;;  %v586_v7 = vsel %vm562_vm0, %v535_v60, %v536_v61  ;;  %v5060_v11 = vpack.i.bf16 %v718_v0, %v719_v6  ;;  %v651_v16 = vsel %vm627_vm2, %v602_v62, %v603_v63  ;;  %v668_v21 = vrot.slane %v5730_v53, 3  ;;  %v4859_v35 = vld [vmem:[%s7897_s2 + $0x18] sm:$0xff]  ;;  %v5832_v60 = vld [vmem:[%s5632_s25 + $0x68] sm:$0xff] }
  0x2d   : > { %v652_v17 = vsel %vm627_vm2, %v601_v42, %v602_v62  ;;  %v5065_v24 = vpack.i.bf16 %v586_v7, %v587_v10  ;;  %v537_v26 = vrot.slane %v5766_v18, 1  ;;  %v538_v27 = vrot.slane %v5769_v19, 1  ;;  %1730 = vmatpush.bf16.msra.mxu2 %v4860_v23  ;;  %v5808_v42 = vld [vmem:[%s5632_s25 + $0x60] sm:$0xff]  ;;  %1441 = vmatpush.bf16.msra.mxu0 %v4849_v34 }
  0x2e   : > { %v5070_v25 = vpack.i.bf16 %v651_v16, %v652_v17  ;;  %v604_v28 = vrot.slane %v5766_v18, 2  ;;  %v605_v29 = vrot.slane %v5769_v19, 2  ;;  %v716_v30 = vsel %vm692_vm1, %v667_v20, %v668_v21 }
  0x2f   : > { %v717_v31 = vsel %vm692_vm1, %v666_v55, %v667_v20  ;;  %v584_v36 = vsel %vm562_vm0, %v537_v26, %v538_v27  ;;  %v585_v37 = vsel %vm562_vm0, %v536_v61, %v537_v26  ;;  %v669_v43 = vrot.slane %v5766_v18, 3  ;;  %v5835_v61 = vld [vmem:[%s5632_s25 + $0x70] sm:$0xff]  ;;  %v5864_v26 = vld [vmem:[%s5632_s25 + $0x78] sm:$0xff] }
  0x30   : > { %5046 = vrot.lane.b32.xlu2 %v5045_v47, %s7898_s16  ;;  %v5075_v38 = vpack.i.bf16 %v716_v30, %v717_v31  ;;  %v649_v39 = vsel %vm627_vm2, %v604_v28, %v605_v29  ;;  %v650_v40 = vsel %vm627_vm2, %v603_v63, %v604_v28  ;;  %v670_v44 = vrot.slane %v5769_v19, 3  ;;  %v4865_v28 = vld [vmem:[%s7897_s2 + $0x48] sm:$0xff] }
  0x31   : > { %1731 = vmatpush.bf16.msra.mxu2 %v4859_v35  ;;  %v5080_v45 = vpack.i.bf16 %v584_v36, %v585_v37  ;;  %v5085_v46 = vpack.i.bf16 %v649_v39, %v650_v40  ;;  %v539_v47 = vrot.slane %v5805_v41, 1  ;;  %v540_v48 = vrot.slane %v5808_v42, 1  ;;  %1822 = vmatpush.bf16.msra.mxu3 %v4865_v28  ;;  %v4848_v35 = vld [vmem:[%s7896_s1 + $0x10] sm:$0xff]  ;;  %v4864_v40 = vld [vmem:[%s7897_s2 + $0x40] sm:$0xff] }
  0x32   : > { %v606_v49 = vrot.slane %v5805_v41, 2  ;;  %v607_v50 = vrot.slane %v5808_v42, 2  ;;  %v714_v51 = vsel %vm692_vm1, %v669_v43, %v670_v44  ;;  %v715_v54 = vsel %vm692_vm1, %v668_v21, %v669_v43  ;;  %v4858_v36 = vld [vmem:[%s7897_s2 + $0x10] sm:$0xff]  ;;  %1442 = vmatpush.bf16.msra.mxu0 %v4848_v35 }
  0x33   : > { %v582_v55 = vsel %vm562_vm0, %v539_v47, %v540_v48  ;;  %v583_v56 = vsel %vm562_vm0, %v538_v27, %v539_v47  ;;  %v5090_v57 = vpack.i.bf16 %v714_v51, %v715_v54  ;;  %v671_v62 = vrot.slane %v5805_v41, 3  ;;  %v5867_v27 = vld [vmem:[%s5632_s25 + $0x80] sm:$0xff]  ;;  %v4847_v47 = vld [vmem:[%s7896_s1 + $0x8] sm:$0xff] }
  0x34   : > { %5051 = vrot.lane.b32.xlu0 %v5050_v58, %s7873_s26  ;;  %5056 = vrot.lane.b32.xlu1 %v5055_v59, %s7899_s17  ;;  %v647_v58 = vsel %vm627_vm2, %v606_v49, %v607_v50  ;;  %v648_v59 = vsel %vm627_vm2, %v605_v29, %v606_v49  ;;  %v672_v63 = vrot.slane %v5808_v42, 3  ;;  %v5095_v0 = vpack.i.bf16 %v582_v55, %v583_v56 }
  0x35   : > { %v5100_v6 = vpack.i.bf16 %v647_v58, %v648_v59  ;;  %v541_v7 = vrot.slane %v5832_v60, 1  ;;  %v542_v10 = vrot.slane %v5835_v61, 1  ;;  %v609_v14 = vrot.slane %v5835_v61, 2  ;;  %1732 = vmatpush.bf16.msra.mxu2 %v4858_v36  ;;  %1823 = vmatpush.bf16.msra.mxu3 %v4864_v40  ;;  %v4854_v58 = vld [vmem:[%s7896_s1 + $0x40] sm:$0xff] }
  0x36   : > { %v712_v15 = vsel %vm692_vm1, %v671_v62, %v672_v63  ;;  %v713_v16 = vsel %vm692_vm1, %v670_v44, %v671_v62  ;;  %v543_v29 = vrot.slane %v5864_v26, 1  ;;  %v544_v30 = vrot.slane %v5867_v27, 1  ;;  %1443 = vmatpush.bf16.msra.mxu0 %v4847_v47  ;;  %v4856_v59 = vld [vmem:[%s7897_s2] sm:$0xff] }
  0x37   : > { %v580_v17 = vsel %vm562_vm0, %v541_v7, %v542_v10  ;;  %v581_v20 = vsel %vm562_vm0, %v540_v48, %v541_v7  ;;  %v5105_v21 = vpack.i.bf16 %v712_v15, %v713_v16  ;;  %v610_v31 = vrot.slane %v5864_v26, 2  ;;  %v4857_v48 = vld [vmem:[%s7897_s2 + $0x8] sm:$0xff]  ;;  %s7878_s2 = smov 84  }
  0x38   : > { %5061 = vrot.lane.b32.xlu2 %v5060_v11, %s7898_s16  ;;  %v608_v11 = vrot.slane %v5832_v60, 2  ;;  %v611_v34 = vrot.slane %v5867_v27, 2  ;;  %v578_v37 = vsel %vm562_vm0, %v543_v29, %v544_v30  ;;  %v725_v49 = vrot.slane %v5635_v2, 4 }
  0x39   : > { %v644_v44 = vsel %vm627_vm2, %v609_v14, %v610_v31  ;;  %v727_v51 = vrot.slane %v5641_v4, 4  ;;  %vm757_vm3 = vcmp.lt.s32.totalorder %v5627_v1, 4  ;;  %1733 = vmatpush.bf16.msra.mxu2 %v4857_v48  ;;  %v673_v62 = vrot.slane %v5832_v60, 3  ;;  %v4935_v1 = vld [vmem:[%s7861_s8 + $0x8] sm:$0xff] }
  0x3a   : > { %v645_v22 = vsel %vm627_vm2, %v608_v11, %v609_v14  ;;  %v646_v23 = vsel %vm627_vm2, %v607_v50, %v608_v11  ;;  %v643_v43 = vsel %vm627_vm2, %v610_v31, %v611_v34  ;;  %v726_v50 = vrot.slane %v5638_v3, 4  ;;  %v5935_v11 = vld [vmem:[%s5632_s25 + $0x88] sm:$0xff]  ;;  %v5938_v14 = vld [vmem:[%s5632_s25 + $0x90] sm:$0xff] }
  0x3b   : > { %v711_v7 = vsel %vm692_vm1, %v672_v63, %v673_v62  ;;  %v728_v15 = vrot.slane %v5650_v9, 4  ;;  %v729_v16 = vrot.slane %v5657_v13, 4  ;;  %v545_v63 = vrot.slane %v5935_v11, 1 }
  0x3c   : > { %5066 = vrot.lane.b32.xlu0 %v5065_v24, %s7873_s26  ;;  %5071 = vrot.lane.b32.xlu1 %v5070_v25, %s7899_s17  ;;  %v5110_v24 = vpack.i.bf16 %v580_v17, %v581_v20  ;;  %v5115_v25 = vpack.i.bf16 %v645_v22, %v646_v23  ;;  %v787_v54 = vsel %vm757_vm3, %v726_v50, %v727_v51  ;;  %v675_v17 = vrot.slane %v5864_v26, 3 }
  0x3d   : > { %v788_v55 = vsel %vm757_vm3, %v725_v49, %v726_v50  ;;  %1734 = vmatpush.bf16.msra.mxu2 %v4856_v59  ;;  %v676_v20 = vrot.slane %v5867_v27, 3  ;;  %v612_v22 = vrot.slane %v5935_v11, 2  ;;  %v613_v23 = vrot.slane %v5938_v14, 2 }
  0x3e   : > { %v1294_v56 = vpack.c.bf16 %v787_v54, %v788_v55  ;;  %v577_v35 = vsel %vm562_vm0, %v544_v30, %v545_v63  ;;  %v5970_v30 = vld [vmem:[%s5632_s25 + $0x98] sm:$0xff]  ;;  %v678_v47 = vrot.slane %v5938_v14, 3  ;;  %vm4114_vm15 = vcmask 1043456  }
  0x3f   : > { %v708_v28 = vsel %vm692_vm1, %v675_v17, %v676_v20  ;;  %v641_v36 = vsel %vm627_vm2, %v612_v22, %v613_v23  ;;  %v547_v50 = vrot.slane %v5970_v30, 1  ;;  %v614_v54 = vrot.slane %v5970_v30, 2 }
  0x40   : > { %5076 = vrot.lane.b32.xlu2 %v5075_v38, %s7898_s16  ;;  %v579_v38 = vsel %vm562_vm0, %v542_v10, %v543_v29  ;;  %4379 = vmatmul.msk.bf16.vlgmr.msra.gmra.mxu3 %vm1174_vm4, %v1294_v56 }
  0x41   : > { %v5125_v39 = vpack.i.bf16 %v578_v37, %v579_v38  ;;  %v642_v37 = vsel %vm627_vm2, %v611_v34, %v612_v22  ;;  %v730_v34 = vrot.slane %v5694_v32, 4 }
  0x44   : > { %5081 = vrot.lane.b32.xlu0 %v5080_v45, %s7873_s26  ;;  %5086 = vrot.lane.b32.xlu1 %v5085_v46, %s7899_s17  ;;  %v4855_v45 = vld [vmem:[%s7896_s1 + $0x48] sm:$0xff]  ;;  %v5130_v46 = vpack.i.bf16 %v643_v43, %v644_v44  ;;  %v5973_v44 = vld [vmem:[%s5632_s25 + $0xa0] sm:$0xff] }
  0x45   : > { %1532 = vmatpush.bf16.msra.mxu1 %v4855_v45  ;;  %v731_v45 = vrot.slane %v5697_v33, 4  ;;  %v615_v55 = vrot.slane %v5973_v44, 2 }
  0x48   : > { %5091 = vrot.lane.b32.xlu2 %v5090_v57, %s7898_s16  ;;  %v4846_v57 = vld [vmem:[%s7896_s1] sm:$0xff]  ;;  %s7884_s1 = smov 40  }
  0x49   : > { %1533 = vmatpush.bf16.msra.mxu1 %v4854_v58  ;;  %1444 = vmatpush.bf16.msra.mxu0 %v4846_v57 }
  0x4c   : > { %5096 = vrot.lane.b32.xlu0 %v5095_v0, %s7873_s26  ;;  %5101 = vrot.lane.b32.xlu1 %v5100_v6, %s7899_s17  ;;  %v674_v0 = vrot.slane %v5835_v61, 3 }
  0x4d   : > { %4323 = vmatmul.msk.bf16.vlgmr.msra.gmra.mxu1 %vm1174_vm4, %v1294_v56 }
  0x4e   : > { %v710_v6 = vsel %vm692_vm1, %v673_v62, %v674_v0  ;;  %v709_v29 = vsel %vm692_vm1, %v674_v0, %v675_v17  ;;  %v639_v62 = vsel %vm627_vm2, %v614_v54, %v615_v55  ;;  %v640_v0 = vsel %vm627_vm2, %v613_v23, %v614_v54 }
  0x4f   : > { %v5120_v10 = vpack.i.bf16 %v710_v6, %v711_v7  ;;  %v5135_v40 = vpack.i.bf16 %v708_v28, %v709_v29  ;;  %v783_v6 = vsel %vm757_vm3, %v730_v34, %v731_v45  ;;  %v784_v7 = vsel %vm757_vm3, %v729_v16, %v730_v34 }
  0x50   : > { %5106 = vrot.lane.b32.xlu2 %v5105_v21, %s7898_s16  ;;  %v546_v21 = vrot.slane %v5938_v14, 1  ;;  %v1298_v17 = vpack.c.bf16 %v783_v6, %v784_v7  ;;  %v733_v54 = vrot.slane %v5730_v53, 4  ;;  %v679_v7 = vrot.slane %v5970_v30, 3 }
  0x52   : > { %v576_v31 = vsel %vm562_vm0, %v545_v63, %v546_v21  ;;  %v575_v58 = vsel %vm562_vm0, %v546_v21, %v547_v50 }
  0x53   : > { %v5140_v38 = vpack.i.bf16 %v576_v31, %v577_v35 }
  0x54   : > { %5111 = vrot.lane.b32.xlu0 %v5110_v24, %s7873_s26  ;;  %5116 = vrot.lane.b32.xlu1 %v5115_v25, %s7899_s17  ;;  %v785_v24 = vsel %vm757_vm3, %v728_v15, %v729_v16  ;;  %v786_v25 = vsel %vm757_vm3, %v727_v51, %v728_v15  ;;  %v548_v51 = vrot.slane %v5973_v44, 1  ;;  %v5160_v15 = vpack.i.bf16 %v639_v62, %v640_v0  ;;  %s7882_s26 = smov 80  }
  0x55   : > { %v1296_v43 = vpack.c.bf16 %v785_v24, %v786_v25 }
  0x56   : > { %v574_v57 = vsel %vm562_vm0, %v547_v50, %v548_v51  ;;  %v732_v50 = vrot.slane %v5727_v52, 4 }
  0x57   : > { %4380 = vmatmul.msk.bf16.gmra.mxu3 %vm1174_vm4, %v1296_v43  ;;  %v5155_v59 = vpack.i.bf16 %v574_v57, %v575_v58 }
  0x58   : > { %5121 = vrot.lane.b32.xlu2 %v5120_v10, %s7898_s16 }
  0x5c   : > { %5126 = vrot.lane.b32.xlu0 %v5125_v39, %s7900_s0  ;;  %5131 = vrot.lane.b32.xlu1 %v5130_v46, %s7899_s17  ;;  %v5145_v39 = vpack.i.bf16 %v641_v36, %v642_v37  ;;  %v677_v46 = vrot.slane %v5935_v11, 3 }
  0x5d   : > { %4324 = vmatmul.msk.bf16.gmra.mxu1 %vm1174_vm4, %v1296_v43 }
  0x5e   : > { %v706_v10 = vsel %vm692_vm1, %v677_v46, %v678_v47  ;;  %v707_v63 = vsel %vm692_vm1, %v676_v20, %v677_v46 }
  0x5f   : > { %v5150_v23 = vpack.i.bf16 %v706_v10, %v707_v63 }
  0x60   : > { %5136 = vrot.lane.b32.xlu2 %v5135_v40, %s7898_s16 }
  0x64   : > { %5141 = vrot.lane.b32.xlu0 %v5140_v38, %s7900_s0  ;;  %5146 = vrot.lane.b32.xlu1 %v5145_v39, %s7899_s17 }
  0x67   : > { %4381 = vmatmul.msk.bf16.gmra.mxu3 %vm1174_vm4, %v1298_v17 }
  0x68   : > { %5151 = vrot.lane.b32.xlu2 %v5150_v23, %s7898_s16 }
  0x6c   : > { %5156 = vrot.lane.b32.xlu0 %v5155_v59, %s7900_s0  ;;  %5161 = vrot.lane.b32.xlu1 %v5160_v15, %s7899_s17 }
  0x6d   : > { %4325 = vmatmul.msk.bf16.gmra.mxu1 %vm1174_vm4, %v1298_v17 }
  0x82   : > { %v5042_v28 = vpop.permute.xlu2 %5041 }
  0x83   : > { %v5044_v10 = vunpack.i.h.bf16 %v5042_v28  ;;  %v5043_v15 = vunpack.i.l.bf16 %v5042_v28 }
  0x8a   : > { %v5047_v62 = vpop.permute.xlu2 %5046 }
  0x96   : > { %v5022_v48 = vpop.permute.xlu0 %5021  ;;  %v5032_v56 = vpop.permute.xlu1 %5031 }
  0x97   : > { %v5024_v21 = vunpack.i.h.bf16 %v5022_v48  ;;  %v5023_v22 = vunpack.i.l.bf16 %v5022_v48  ;;  %v5034_v24 = vunpack.i.h.bf16 %v5032_v56  ;;  %v5033_v25 = vunpack.i.l.bf16 %v5032_v56  ;;  %v6020_v48 = vld [vmem:[%s5632_s25 + $0xb0] sm:$0xff] }
  0x98   : > { %v550_v57 = vrot.slane %v6020_v48, 1  ;;  %v617_v59 = vrot.slane %v6020_v48, 2 }
  0x99   : > { %v1176_v20 = vsel %vm1174_vm4, %v5638_v3, %v5024_v21  ;;  %v1175_v35 = vsel %vm1174_vm4, %v5635_v2, %v5023_v22  ;;  %v6017_v3 = vld [vmem:[%s5632_s25 + $0xa8] sm:$0xff] }
  0x9a   : > { %v549_v56 = vrot.slane %v6017_v3, 1  ;;  %v616_v58 = vrot.slane %v6017_v3, 2 }
  0x9c   : > { %v572_v0 = vsel %vm562_vm0, %v549_v56, %v550_v57  ;;  %v573_v6 = vsel %vm562_vm0, %v548_v51, %v549_v56  ;;  %v637_v63 = vsel %vm627_vm2, %v616_v58, %v617_v59  ;;  %v638_v23 = vsel %vm627_vm2, %v615_v55, %v616_v58 }
  0x9d   : > { %v5170_v17 = vpack.i.bf16 %v572_v0, %v573_v6  ;;  %v781_v51 = vsel %vm757_vm3, %v732_v50, %v733_v54  ;;  %v705_v55 = vsel %vm692_vm1, %v678_v47, %v679_v7  ;;  %v734_v56 = vrot.slane %v5766_v18, 4 }
  0x9e   : > { %v5027_v16 = vpop.permute.xlu0 %5026  ;;  %v5037_v40 = vpop.permute.xlu1 %5036  ;;  %v735_v58 = vrot.slane %v5769_v19, 4 }
  0x9f   : > { %v5029_v29 = vunpack.i.h.bf16 %v5027_v16  ;;  %v5028_v31 = vunpack.i.l.bf16 %v5027_v16  ;;  %v5039_v34 = vunpack.i.h.bf16 %v5037_v40  ;;  %v5038_v46 = vunpack.i.l.bf16 %v5037_v40  ;;  %5171 = vrot.lane.b32.xlu0 %v5170_v17, %s7900_s0 }
  0xa0   : > { %v5048_v16 = vunpack.i.l.bf16 %v5047_v62 }
  0xa1   : > { %v1208_v36 = vsel %vm1207_vm5, %v1175_v35, %v5028_v31  ;;  %v1209_v37 = vsel %vm1207_vm5, %v1176_v20, %v5029_v29  ;;  %v1178_v21 = vsel %vm1174_vm4, %v5650_v9, %v5039_v34  ;;  %v1177_v22 = vsel %vm1174_vm4, %v5641_v4, %v5038_v46  ;;  %v6066_v46 = vld [vmem:[%s5632_s25 + $0xb8] sm:$0xff] }
  0xa2   : > { %v1241_v38 = vsel %vm1240_vm6, %v1208_v36, %v5033_v25  ;;  %v1242_v39 = vsel %vm1240_vm6, %v1209_v37, %v5034_v24  ;;  %v5049_v24 = vunpack.i.h.bf16 %v5047_v62  ;;  %v5175_v25 = vpack.i.bf16 %v637_v63, %v638_v23  ;;  %v5062_v62 = vpop.permute.xlu2 %5061 }
  0xa3   : > { %v1293_v43 = vpack.c.bf16 %v1242_v39, %v1241_v38  ;;  %v782_v9 = vsel %vm757_vm3, %v731_v45, %v732_v50  ;;  %v680_v4 = vrot.slane %v5973_v44, 3  ;;  %v1210_v29 = vsel %vm1207_vm5, %v1177_v22, %v5043_v15  ;;  %v6069_v50 = vld [vmem:[%s5632_s25 + $0xc0] sm:$0xff] }
  0xa4   : > { %v1300_v28 = vpack.c.bf16 %v781_v51, %v782_v9  ;;  %v1211_v31 = vsel %vm1207_vm5, %v1178_v21, %v5044_v10  ;;  %5176 = vrot.lane.b32.xlu1 %v5175_v25, %s7899_s17  ;;  %v1243_v35 = vsel %vm1240_vm6, %v1210_v29, %v5048_v16  ;;  %v551_v0 = vrot.slane %v6066_v46, 1 }
  0xa5   : > { %1445 = vmatmul.bf16.vlgmr.msra.gmra.mxu0 %v1293_v43  ;;  %1735 = vmatmul.bf16.vlgmr.msra.gmra.mxu2 %v1293_v43  ;;  %v704_v20 = vsel %vm692_vm1, %v679_v7, %v680_v4  ;;  %v1244_v36 = vsel %vm1240_vm6, %v1211_v31, %v5049_v24  ;;  %v552_v6 = vrot.slane %v6069_v50, 1  ;;  %v618_v7 = vrot.slane %v6066_v46, 2 }
  0xa6   : > { %4382 = vmatmul.msk.bf16.gmra.mxu3 %vm1174_vm4, %v1300_v28  ;;  %v5165_v45 = vpack.i.bf16 %v704_v20, %v705_v55  ;;  %v5052_v37 = vpop.permute.xlu0 %5051  ;;  %v5057_v47 = vpop.permute.xlu1 %5056  ;;  %v1295_v38 = vpack.c.bf16 %v1244_v36, %v1243_v35  ;;  %4326 = vmatmul.msk.bf16.gmra.mxu1 %vm1174_vm4, %v1300_v28  ;;  %v619_v10 = vrot.slane %v6069_v50, 2  ;;  %v681_v63 = vrot.slane %v6017_v3, 3 }
  0xa7   : > { %v5054_v39 = vunpack.i.h.bf16 %v5052_v37  ;;  %v5053_v40 = vunpack.i.l.bf16 %v5052_v37  ;;  %v5059_v43 = vunpack.i.h.bf16 %v5057_v47  ;;  %v5058_v34 = vunpack.i.l.bf16 %v5057_v47 }
  0xa8   : > { %5166 = vrot.lane.b32.xlu2 %v5165_v45, %s7898_s16  ;;  %v682_v21 = vrot.slane %v6020_v48, 3  ;;  %v570_v22 = vsel %vm562_vm0, %v551_v0, %v552_v6  ;;  %v571_v23 = vsel %vm562_vm0, %v550_v57, %v551_v0  ;;  %v635_v51 = vsel %vm627_vm2, %v618_v7, %v619_v10 }
  0xa9   : > { %v1180_v15 = vsel %vm1174_vm4, %v5694_v32, %v5054_v39  ;;  %v1179_v17 = vsel %vm1174_vm4, %v5657_v13, %v5053_v40  ;;  %v636_v24 = vsel %vm627_vm2, %v617_v59, %v618_v7  ;;  %v5064_v32 = vunpack.i.h.bf16 %v5062_v62  ;;  %v6115_v40 = vld [vmem:[%s5632_s25 + $0xc8] sm:$0xff] }
  0xaa   : > { %v5063_v25 = vunpack.i.l.bf16 %v5062_v62  ;;  %v5185_v9 = vpack.i.bf16 %v570_v22, %v571_v23  ;;  %v5190_v13 = vpack.i.bf16 %v635_v51, %v636_v24  ;;  %v1212_v16 = vsel %vm1207_vm5, %v1179_v17, %v5058_v34  ;;  %v5077_v62 = vpop.permute.xlu2 %5076 }
  0xab   : > { %v1213_v28 = vsel %vm1207_vm5, %v1180_v15, %v5059_v43  ;;  %v779_v55 = vsel %vm757_vm3, %v734_v56, %v735_v58  ;;  %v780_v57 = vsel %vm757_vm3, %v733_v54, %v734_v56  ;;  %v702_v29 = vsel %vm692_vm1, %v681_v63, %v682_v21  ;;  %v6118_v43 = vld [vmem:[%s5632_s25 + $0xd0] sm:$0xff] }
  0xac   : > { %5186 = vrot.lane.b32.xlu0 %v5185_v9, %s7900_s0  ;;  %5191 = vrot.lane.b32.xlu1 %v5190_v13, %s7899_s17  ;;  %v1302_v59 = vpack.c.bf16 %v779_v55, %v780_v57  ;;  %v703_v31 = vsel %vm692_vm1, %v680_v4, %v681_v63  ;;  %v1245_v45 = vsel %vm1240_vm6, %v1212_v16, %v5063_v25  ;;  %v736_v34 = vrot.slane %v5805_v41, 4 }
  0xad   : > { %v5180_v20 = vpack.i.bf16 %v702_v29, %v703_v31  ;;  %v1246_v54 = vsel %vm1240_vm6, %v1213_v28, %v5064_v32  ;;  %v737_v56 = vrot.slane %v5808_v42, 4  ;;  %v553_v0 = vrot.slane %v6115_v40, 1 }
  0xae   : > { %v5067_v35 = vpop.permute.xlu0 %5066  ;;  %v1297_v36 = vpack.c.bf16 %v1246_v54, %v1245_v45  ;;  %v5072_v37 = vpop.permute.xlu1 %5071  ;;  %v554_v7 = vrot.slane %v6118_v43, 1  ;;  %v620_v15 = vrot.slane %v6115_v40, 2  ;;  %v621_v17 = vrot.slane %v6118_v43, 2 }
  0xaf   : > { %v5069_v47 = vunpack.i.h.bf16 %v5067_v35  ;;  %v5074_v4 = vunpack.i.h.bf16 %v5072_v37  ;;  %v5073_v39 = vunpack.i.l.bf16 %v5072_v37  ;;  %v683_v23 = vrot.slane %v6066_v46, 3 }
  0xb0   : > { %5181 = vrot.lane.b32.xlu2 %v5180_v20, %s7898_s16  ;;  %v684_v51 = vrot.slane %v6069_v50, 3  ;;  %v568_v24 = vsel %vm562_vm0, %v553_v0, %v554_v7  ;;  %v569_v32 = vsel %vm562_vm0, %v552_v6, %v553_v0  ;;  %v633_v25 = vsel %vm627_vm2, %v620_v15, %v621_v17 }
  0xb1   : > { %v1182_v63 = vsel %vm1174_vm4, %v5727_v52, %v5069_v47  ;;  %v634_v9 = vsel %vm627_vm2, %v619_v10, %v620_v15  ;;  %v5079_v52 = vunpack.i.h.bf16 %v5077_v62  ;;  %v5078_v13 = vunpack.i.l.bf16 %v5077_v62 }
  0xb2   : > { %v5200_v16 = vpack.i.bf16 %v568_v24, %v569_v32  ;;  %v1215_v55 = vsel %vm1207_vm5, %v1182_v63, %v5074_v4  ;;  %v777_v57 = vsel %vm757_vm3, %v736_v34, %v737_v56  ;;  %v778_v6 = vsel %vm757_vm3, %v735_v58, %v736_v34  ;;  %v6166_v4 = vld [vmem:[%s5632_s25 + $0xd8] sm:$0xff] }
  0xb3   : > { %v1304_v10 = vpack.c.bf16 %v777_v57, %v778_v6  ;;  %v701_v29 = vsel %vm692_vm1, %v682_v21, %v683_v23  ;;  %v1248_v58 = vsel %vm1240_vm6, %v1215_v55, %v5079_v52  ;;  %v738_v34 = vrot.slane %v5832_v60, 4 }
  0xb4   : > { %5201 = vrot.lane.b32.xlu0 %v5200_v16, %s7900_s0  ;;  %v739_v62 = vrot.slane %v5835_v61, 4  ;;  %v685_v0 = vrot.slane %v6115_v40, 3  ;;  %v686_v15 = vrot.slane %v6118_v43, 3 }
  0xb5   : > { %1450 = vmatmul.bf16.gmra.mxu0 %v1295_v38  ;;  %1740 = vmatmul.bf16.gmra.mxu2 %v1295_v38  ;;  %v5068_v38 = vunpack.i.l.bf16 %v5067_v35  ;;  %v776_v6 = vsel %vm757_vm3, %v737_v56, %v738_v34 }
  0xb6   : > { %4383 = vmatmul.msk.bf16.gmra.mxu3 %vm1174_vm4, %v1302_v59  ;;  %4327 = vmatmul.msk.bf16.gmra.mxu1 %vm1174_vm4, %v1302_v59  ;;  %v700_v59 = vsel %vm692_vm1, %v683_v23, %v684_v51  ;;  %v5082_v20 = vpop.permute.xlu0 %5081 }
  0xb7   : > { %v1181_v22 = vsel %vm1174_vm4, %v5697_v33, %v5068_v38  ;;  %v5205_v33 = vpack.i.bf16 %v633_v25, %v634_v9  ;;  %v5195_v31 = vpack.i.bf16 %v700_v59, %v701_v29  ;;  %v5083_v54 = vunpack.i.l.bf16 %v5082_v20  ;;  %v5092_v38 = vpop.permute.xlu2 %5091 }
  0xb8   : > { %v1214_v28 = vsel %vm1207_vm5, %v1181_v22, %v5073_v39  ;;  %v5084_v37 = vunpack.i.h.bf16 %v5082_v20  ;;  %v6169_v39 = vld [vmem:[%s5632_s25 + $0xe0] sm:$0xff]  ;;  %v622_v22 = vrot.slane %v6166_v4, 2  ;;  %v5094_v25 = vunpack.i.h.bf16 %v5092_v38 }
  0xb9   : > { %5206 = vrot.lane.b32.xlu1 %v5205_v33, %s7899_s17  ;;  %v1247_v45 = vsel %vm1240_vm6, %v1214_v28, %v5078_v13  ;;  %5196 = vrot.lane.b32.xlu2 %v5195_v31, %s7898_s16  ;;  %v1183_v47 = vsel %vm1174_vm4, %v5730_v53, %v5083_v54  ;;  %v555_v53 = vrot.slane %v6166_v4, 1  ;;  %v556_v63 = vrot.slane %v6169_v39, 1 }
  0xba   : > { %v1299_v35 = vpack.c.bf16 %v1248_v58, %v1247_v45  ;;  %v623_v23 = vrot.slane %v6169_v39, 2  ;;  %v1184_v24 = vsel %vm1174_vm4, %v5766_v18, %v5084_v37  ;;  %v632_v16 = vsel %vm627_vm2, %v621_v17, %v622_v22  ;;  %v6211_v37 = vld [vmem:[%s5632_s25 + $0xe8] sm:$0xff] }
  0xbb   : > { %v566_v9 = vsel %vm562_vm0, %v555_v53, %v556_v63  ;;  %v567_v52 = vsel %vm562_vm0, %v554_v7, %v555_v53  ;;  %v5093_v33 = vunpack.i.l.bf16 %v5092_v38  ;;  %v775_v18 = vsel %vm757_vm3, %v738_v34, %v739_v62 }
  0xbc   : > { %v631_v13 = vsel %vm627_vm2, %v622_v22, %v623_v23  ;;  %v5215_v55 = vpack.i.bf16 %v566_v9, %v567_v52  ;;  %v698_v7 = vsel %vm692_vm1, %v685_v0, %v686_v15  ;;  %v699_v17 = vsel %vm692_vm1, %v684_v51, %v685_v0 }
  0xbd   : > { %v5220_v57 = vpack.i.bf16 %v631_v13, %v632_v16  ;;  %v1306_v59 = vpack.c.bf16 %v775_v18, %v776_v6  ;;  %v5210_v29 = vpack.i.bf16 %v698_v7, %v699_v17  ;;  %v741_v38 = vrot.slane %v5867_v27, 4 }
  0xbe   : > { %5216 = vrot.lane.b32.xlu0 %v5215_v55, %s7900_s0  ;;  %v5097_v20 = vpop.permute.xlu0 %5096  ;;  %v687_v34 = vrot.slane %v6166_v4, 3  ;;  %v688_v0 = vrot.slane %v6169_v39, 3  ;;  %v557_v53 = vrot.slane %v6211_v37, 1 }
  0xbf   : > { %v5099_v58 = vunpack.i.h.bf16 %v5097_v20  ;;  %v5098_v54 = vunpack.i.l.bf16 %v5097_v20  ;;  %v5107_v52 = vpop.permute.xlu2 %5106 }
  0xc0   : > { %v696_v18 = vsel %vm692_vm1, %v687_v34, %v688_v0  ;;  %v5108_v6 = vunpack.i.l.bf16 %v5107_v52 }
  0xc1   : > { %5221 = vrot.lane.b32.xlu1 %v5220_v57, %s7899_s17  ;;  %5211 = vrot.lane.b32.xlu2 %v5210_v29, %s7898_s16  ;;  %v1185_v9 = vsel %vm1174_vm4, %v5769_v19, %v5098_v54  ;;  %v743_v54 = vrot.slane %v5938_v14, 4 }
  0xc5   : > { %1455 = vmatmul.bf16.gmra.mxu0 %v1297_v36  ;;  %1745 = vmatmul.bf16.gmra.mxu2 %v1297_v36  ;;  %v5087_v36 = vpop.permute.xlu1 %5086 }
  0xc6   : > { %4384 = vmatmul.msk.bf16.gmra.mxu3 %vm1174_vm4, %v1304_v10  ;;  %v5088_v21 = vunpack.i.l.bf16 %v5087_v36  ;;  %4328 = vmatmul.msk.bf16.gmra.mxu1 %vm1174_vm4, %v1304_v10  ;;  %v5089_v32 = vunpack.i.h.bf16 %v5087_v36 }
  0xc8   : > { %v1216_v28 = vsel %vm1207_vm5, %v1183_v47, %v5088_v21  ;;  %v1217_v10 = vsel %vm1207_vm5, %v1184_v24, %v5089_v32  ;;  %v6214_v47 = vld [vmem:[%s5632_s25 + $0xf0] sm:$0xff]  ;;  %v740_v21 = vrot.slane %v5864_v26, 4  ;;  %v624_v24 = vrot.slane %v6211_v37, 2 }
  0xc9   : > { %v1249_v56 = vsel %vm1240_vm6, %v1216_v28, %v5093_v33  ;;  %v1250_v31 = vsel %vm1240_vm6, %v1217_v10, %v5094_v25  ;;  %v558_v22 = vrot.slane %v6214_v47, 1  ;;  %v625_v32 = vrot.slane %v6214_v47, 2 }
  0xca   : > { %v1301_v51 = vpack.c.bf16 %v1250_v31, %v1249_v56  ;;  %v1186_v25 = vsel %vm1174_vm4, %v5805_v41, %v5099_v58  ;;  %v773_v13 = vsel %vm757_vm3, %v740_v21, %v741_v38  ;;  %v774_v16 = vsel %vm757_vm3, %v739_v62, %v740_v21  ;;  %v5112_v56 = vpop.permute.xlu0 %5111 }
  0xcb   : > { %v564_v33 = vsel %vm562_vm0, %v557_v53, %v558_v22  ;;  %v565_v28 = vsel %vm562_vm0, %v556_v63, %v557_v53  ;;  %v629_v55 = vsel %vm627_vm2, %v624_v24, %v625_v32  ;;  %v630_v41 = vsel %vm627_vm2, %v623_v23, %v624_v24 }
  0xcc   : > { %v5230_v19 = vpack.i.bf16 %v564_v33, %v565_v28  ;;  %v5235_v57 = vpack.i.bf16 %v629_v55, %v630_v41  ;;  %v5109_v62 = vunpack.i.h.bf16 %v5107_v52  ;;  %v697_v63 = vsel %vm692_vm1, %v686_v15, %v687_v34 }
  0xcd   : > { %v5102_v45 = vpop.permute.xlu1 %5101  ;;  %v1308_v23 = vpack.c.bf16 %v773_v13, %v774_v16  ;;  %v5225_v10 = vpack.i.bf16 %v696_v18, %v697_v63  ;;  %v5114_v15 = vunpack.i.h.bf16 %v5112_v56  ;;  %v5113_v20 = vunpack.i.l.bf16 %v5112_v56 }
  0xce   : > { %v5103_v36 = vunpack.i.l.bf16 %v5102_v45  ;;  %5231 = vrot.lane.b32.xlu0 %v5230_v19, %s7900_s0  ;;  %5236 = vrot.lane.b32.xlu1 %v5235_v57, %s7899_s17  ;;  %v742_v58 = vrot.slane %v5935_v11, 4  ;;  %v690_v57 = vrot.slane %v6214_v47, 3 }
  0xcf   : > { %5226 = vrot.lane.b32.xlu2 %v5225_v10, %s7898_s16  ;;  %v1188_v53 = vsel %vm1174_vm4, %v5832_v60, %v5114_v15  ;;  %v1187_v24 = vsel %vm1174_vm4, %v5808_v42, %v5113_v20 }
  0xd0   : > { %v1218_v7 = vsel %vm1207_vm5, %v1185_v9, %v5103_v36  ;;  %v771_v9 = vsel %vm757_vm3, %v742_v58, %v743_v54  ;;  %v772_v52 = vsel %vm757_vm3, %v741_v38, %v742_v58 }
  0xd5   : > { %1460 = vmatmul.bf16.gmra.mxu0 %v1299_v35  ;;  %1750 = vmatmul.bf16.gmra.mxu2 %v1299_v35  ;;  %v5104_v35 = vunpack.i.h.bf16 %v5102_v45  ;;  %v6258_v45 = vld [vmem:[%s5632_s25 + $0xf8] sm:$0xff]  ;;  %s7902_s25 = smov 124  }
  0xd6   : > { %4385 = vmatmul.msk.bf16.gmra.mxu3 %vm1174_vm4, %v1306_v59  ;;  %4329 = vmatmul.msk.bf16.gmra.mxu1 %vm1174_vm4, %v1306_v59  ;;  %v1251_v59 = vsel %vm1240_vm6, %v1218_v7, %v5108_v6  ;;  %v559_v21 = vrot.slane %v6258_v45, 1  ;;  %v626_v34 = vrot.slane %v6258_v45, 2  ;;  %v6293_v6 = vpop.f32.mrf.mxu1  ;;  %v6295_v7 = vpop.f32.mrf.mxu3 }
  0xd7   : > { %v1219_v17 = vsel %vm1207_vm5, %v1186_v25, %v5104_v35  ;;  %v5122_v25 = vpop.permute.xlu2 %5121 }
  0xd8   : > { %v1252_v29 = vsel %vm1240_vm6, %v1219_v17, %v5109_v62  ;;  %v563_v13 = vsel %vm562_vm0, %v558_v22, %v559_v21  ;;  %v594_v16 = vsel %vm562_vm0, %v559_v21, %v528_v5  ;;  %v628_v60 = vsel %vm627_vm2, %v625_v32, %v626_v34  ;;  %v5127_v62 = vpop.permute.xlu0 %5126 }
  0xd9   : > { %v1303_v31 = vpack.c.bf16 %v1252_v29, %v1251_v59  ;;  %v659_v42 = vsel %vm627_vm2, %v626_v34, %v595_v12  ;;  %v5245_v33 = vpack.i.bf16 %v594_v16, %v563_v13  ;;  %v5124_v55 = vunpack.i.h.bf16 %v5122_v25 }
  0xda   : > { %v5250_v28 = vpack.i.bf16 %v659_v42, %v628_v60  ;;  %v5123_v38 = vunpack.i.l.bf16 %v5122_v25  ;;  %v1310_v5 = vpack.c.bf16 %v771_v9, %v772_v52  ;;  %v689_v12 = vrot.slane %v6211_v37, 3 }
  0xdb   : > { %5246 = vrot.lane.b32.xlu0 %v5245_v33, %s7900_s0  ;;  %v5129_v10 = vunpack.i.h.bf16 %v5127_v62  ;;  %v5128_v59 = vunpack.i.l.bf16 %v5127_v62  ;;  %v744_v21 = vrot.slane %v5970_v30, 4  ;;  %v745_v34 = vrot.slane %v5973_v44, 4 }
  0xdc   : > { %5251 = vrot.lane.b32.xlu1 %v5250_v28, %s7899_s17  ;;  %v694_v63 = vsel %vm692_vm1, %v689_v12, %v690_v57  ;;  %v695_v17 = vsel %vm692_vm1, %v688_v0, %v689_v12  ;;  %v691_v60 = vrot.slane %v6258_v45, 3 }
  0xdd   : > { %v1190_v20 = vsel %vm1174_vm4, %v5864_v26, %v5129_v10  ;;  %v769_v26 = vsel %vm757_vm3, %v744_v21, %v745_v34 }
  0xde   : > { %v693_v28 = vsel %vm692_vm1, %v690_v57, %v691_v60 }
  0xdf   : > { %v5137_v15 = vpop.permute.xlu2 %5136 }
  0xe0   : > { %v5139_v0 = vunpack.i.h.bf16 %v5137_v15  ;;  %v5138_v58 = vunpack.i.l.bf16 %v5137_v15  ;;  %v5142_v16 = vpop.permute.xlu0 %5141  ;;  %v6358_v15 = vld [vmem:[%s7901_s3] ss:$0 sm:$0xff] }
  0xe5   : > { %1465 = vmatmul.bf16.gmra.mxu0 %v1301_v51  ;;  %1755 = vmatmul.bf16.gmra.mxu2 %v1301_v51  ;;  %v5117_v51 = vpop.permute.xlu1 %5116 }
  0xe6   : > { %4386 = vmatmul.msk.bf16.gmra.mxu3 %vm1174_vm4, %v1308_v23  ;;  %4330 = vmatmul.msk.bf16.gmra.mxu1 %vm1174_vm4, %v1308_v23  ;;  %v5119_v35 = vunpack.i.h.bf16 %v5117_v51  ;;  %v5118_v36 = vunpack.i.l.bf16 %v5117_v51  ;;  %v5240_v23 = vpack.i.bf16 %v694_v63, %v695_v17  ;;  %v1189_v51 = vsel %vm1174_vm4, %v5835_v61, %v5128_v59 }
  0xe7   : > { %v770_v61 = vsel %vm757_vm3, %v743_v54, %v744_v21  ;;  %v724_v54 = vsel %vm692_vm1, %v691_v60, %v660_v8  ;;  %v746_v17 = vrot.slane %v6017_v3, 4 }
  0xe8   : > { %v1220_v41 = vsel %vm1207_vm5, %v1187_v24, %v5118_v36  ;;  %v1221_v22 = vsel %vm1207_vm5, %v1188_v53, %v5119_v35  ;;  %5241 = vrot.lane.b32.xlu2 %v5240_v23, %s7898_s16  ;;  %v6309_v35 = vpop.f32.mrf.mxu1  ;;  %v6311_v36 = vpop.f32.mrf.mxu3  ;;  %v1312_v25 = vpack.c.bf16 %v769_v26, %v770_v61  ;;  %v747_v23 = vrot.slane %v6020_v48, 4 }
  0xe9   : > { %v1253_v32 = vsel %vm1240_vm6, %v1220_v41, %v5123_v38  ;;  %v1254_v19 = vsel %vm1240_vm6, %v1221_v22, %v5124_v55  ;;  %v5144_v55 = vunpack.i.h.bf16 %v5142_v16  ;;  %v5143_v38 = vunpack.i.l.bf16 %v5142_v16 }
  0xea   : > { %v1305_v18 = vpack.c.bf16 %v1254_v19, %v1253_v32  ;;  %v5255_v22 = vpack.i.bf16 %v724_v54, %v693_v28  ;;  %v5152_v19 = vpop.permute.xlu2 %5151 }
  0xeb   : > { %v1192_v12 = vsel %vm1174_vm4, %v5935_v11, %v5144_v55  ;;  %v1191_v57 = vsel %vm1174_vm4, %v5867_v27, %v5143_v38  ;;  %v5154_v8 = vunpack.i.h.bf16 %v5152_v19  ;;  %v767_v11 = vsel %vm757_vm3, %v746_v17, %v747_v23 }
  0xec   : > { %v768_v27 = vsel %vm757_vm3, %v745_v34, %v746_v17 }
  0xed   : > { %v5132_v29 = vpop.permute.xlu1 %5131 }
  0xee   : > { %v5134_v56 = vunpack.i.h.bf16 %v5132_v29 }
  0xf0   : > { %v1223_v24 = vsel %vm1207_vm5, %v1190_v20, %v5134_v56  ;;  %v6325_v42 = vpop.f32.mrf.mxu1  ;;  %v6327_v33 = vpop.f32.mrf.mxu3  ;;  %5256 = vrot.lane.b32.xlu2 %v5255_v22, %s7898_s16  ;;  %v749_v22 = vrot.slane %v6069_v50, 4  ;;  %s7904_s16 = smov 80  }
  0xf1   : > { %v1256_v52 = vsel %vm1240_vm6, %v1223_v24, %v5139_v0 }
  0xf5   : > { %1470 = vmatmul.bf16.gmra.mxu0 %v1303_v31  ;;  %1760 = vmatmul.bf16.gmra.mxu2 %v1303_v31  ;;  %v5133_v31 = vunpack.i.l.bf16 %v5132_v29  ;;  %v5147_v41 = vpop.permute.xlu1 %5146  ;;  %v1314_v29 = vpack.c.bf16 %v767_v11, %v768_v27 }
  0xf6   : > { %4387 = vmatmul.msk.bf16.gmra.mxu3 %vm1174_vm4, %v1310_v5  ;;  %4331 = vmatmul.msk.bf16.gmra.mxu1 %vm1174_vm4, %v1310_v5  ;;  %v5149_v5 = vunpack.i.h.bf16 %v5147_v41  ;;  %v5148_v32 = vunpack.i.l.bf16 %v5147_v41 }
  0xf7   : > { %v1222_v53 = vsel %vm1207_vm5, %v1189_v51, %v5133_v31  ;;  %v5157_v51 = vpop.permute.xlu0 %5156 }
  0xf8   : > { %v1255_v9 = vsel %vm1240_vm6, %v1222_v53, %v5138_v58  ;;  %v6341_v62 = vpop.f32.mrf.mxu1  ;;  %v6343_v63 = vpop.f32.mrf.mxu3  ;;  %v1224_v10 = vsel %vm1207_vm5, %v1191_v57, %v5148_v32  ;;  %v1225_v59 = vsel %vm1207_vm5, %v1192_v12, %v5149_v5  ;;  %v5159_v53 = vunpack.i.h.bf16 %v5157_v51 }
  0xf9   : > { %v1307_v13 = vpack.c.bf16 %v1256_v52, %v1255_v9  ;;  %v1258_v31 = vsel %vm1240_vm6, %v1225_v59, %v5154_v8  ;;  %v5158_v24 = vunpack.i.l.bf16 %v5157_v51 }
  0xfa   : > { %v1194_v16 = vsel %vm1174_vm4, %v5970_v30, %v5159_v53 }
  0xfb   : > { %v1193_v60 = vsel %vm1174_vm4, %v5938_v14, %v5158_v24 }
  0xfd   : > { %v5162_v26 = vpop.permute.xlu1 %5161 }
  0xfe   : > { %v5163_v9 = vunpack.i.l.bf16 %v5162_v26 }
 0x100   : > { %v6361_v58 = vpop.f32.mrf.mxu1  ;;  %v6364_v34 = vpop.f32.mrf.mxu3  ;;  %v1226_v30 = vsel %vm1207_vm5, %v1193_v60, %v5163_v9 }
 0x102   : > { %v5167_v52 = vpop.permute.xlu2 %5166 }
 0x103   : > { %v5169_v55 = vunpack.i.h.bf16 %v5167_v52  ;;  %v5168_v38 = vunpack.i.l.bf16 %v5167_v52 }
 0x105   : > { %1475 = vmatmul.bf16.gmra.mxu0 %v1305_v18  ;;  %1765 = vmatmul.bf16.gmra.mxu2 %v1305_v18  ;;  %v5153_v18 = vunpack.i.l.bf16 %v5152_v19 }
 0x106   : > { %4388 = vmatmul.msk.bf16.gmra.mxu3 %vm1174_vm4, %v1312_v25  ;;  %4332 = vmatmul.msk.bf16.gmra.mxu1 %vm1174_vm4, %v1312_v25  ;;  %v5164_v25 = vunpack.i.h.bf16 %v5162_v26 }
 0x107   : > { %v1257_v56 = vsel %vm1240_vm6, %v1224_v10, %v5153_v18 }
 0x108   : > { %v1309_v20 = vpack.c.bf16 %v1258_v31, %v1257_v56  ;;  %v6373_v41 = vpop.f32.mrf.mxu1  ;;  %v1227_v19 = vsel %vm1207_vm5, %v1194_v16, %v5164_v25  ;;  %v6381_v14 = vpop.f32.mrf.mxu3 }
 0x109   : > { %v1260_v59 = vsel %vm1240_vm6, %v1227_v19, %v5169_v55  ;;  %v751_v19 = vrot.slane %v6118_v43, 4 }
 0x10a   : > { %v5182_v52 = vpop.permute.xlu2 %5181 }
 0x115   : > { %1480 = vmatmul.bf16.gmra.mxu0 %v1307_v13  ;;  %1770 = vmatmul.bf16.gmra.mxu2 %v1307_v13 }
 0x116   : > { %4389 = vmatmul.msk.bf16.gmra.mxu3 %vm1174_vm4, %v1314_v29  ;;  %4333 = vmatmul.msk.bf16.gmra.mxu1 %vm1174_vm4, %v1314_v29  ;;  %v5172_v29 = vpop.permute.xlu0 %5171 }
 0x117   : > { %v5174_v24 = vunpack.i.h.bf16 %v5172_v29 }
 0x122   : > { %v1446_v0 = vpop.f32.mrf.mxu0 }
 0x123   : > { %v1447_v21 = vadd.f32 %v6358_v15, %v1446_v0  ;;  %v5173_v0 = vunpack.i.l.bf16 %v5172_v29 }
 0x125   : > { %v1536_v61 = vadd.f32 %v6293_v6, %v1447_v21  ;;  %1485 = vmatmul.bf16.gmra.mxu0 %v1309_v20  ;;  %1775 = vmatmul.bf16.gmra.mxu2 %v1309_v20  ;;  %v748_v6 = vrot.slane %v6066_v46, 4  ;;  %v5177_v21 = vpop.permute.xlu1 %5176 }
 0x126   : > { %v5178_v9 = vunpack.i.l.bf16 %v5177_v21 }
 0x127   : > { %v765_v12 = vsel %vm757_vm3, %v748_v6, %v749_v22  ;;  %v766_v57 = vsel %vm757_vm3, %v747_v23, %v748_v6  ;;  %v1615_v8 = vmax.f32 %v1536_v61, 0.0  ;;  %v6394_v23 = vpop.f32.mrf.mxu1 }
 0x128   : > { %v1736_v13 = vpop.f32.mrf.mxu2  ;;  %v1316_v10 = vpack.c.bf16 %v765_v12, %v766_v57 }
 0x129   : > { %v1737_v28 = vadd.f32 %v6358_v15, %v1736_v13  ;;  %v6398_v53 = vpop.f32.mrf.mxu3  ;;  %v5179_v13 = vunpack.i.h.bf16 %v5177_v21 }
 0x12a   : > { %v1448_v54 = vpop.f32.mrf.mxu0  ;;  %4390 = vmatmul.msk.bf16.gmra.mxu3 %vm1174_vm4, %v1316_v10  ;;  %4334 = vmatmul.msk.bf16.gmra.mxu1 %vm1174_vm4, %v1316_v10 }
 0x12b   : > { %v1826_v5 = vadd.f32 %v6295_v7, %v1737_v28  ;;  %v1449_v32 = vadd.f32 %v6358_v15, %v1448_v54  ;;  %v1259_v7 = vsel %vm1240_vm6, %v1226_v30, %v5168_v38  ;;  %v1196_v28 = vsel %vm1174_vm4, %v6017_v3, %v5174_v24 }
 0x12c   : > { %v1311_v31 = vpack.c.bf16 %v1260_v59, %v1259_v7  ;;  %v5184_v38 = vunpack.i.h.bf16 %v5182_v52  ;;  %v1229_v57 = vsel %vm1207_vm5, %v1196_v28, %v5179_v13 }
 0x12d   : > { %v1905_v18 = vmax.f32 %v1826_v5, 0.0  ;;  %v1538_v17 = vadd.f32 %v6309_v35, %v1449_v32  ;;  %v5183_v5 = vunpack.i.l.bf16 %v5182_v52 }
 0x12f   : > { %v6390_v11 = vmax.f32 %v1615_v8, %v1905_v18  ;;  %v1616_v26 = vmax.f32 %v1538_v17, 0.0  ;;  %v6409_v30 = vpop.f32.mrf.mxu1 }
 0x130   : > { %v1738_v27 = vpop.f32.mrf.mxu2 }
 0x131   : > { %v1739_v56 = vadd.f32 %v6358_v15, %v1738_v27  ;;  %v1969_v54 = vrot.slane %v6390_v11, 1  ;;  %v6416_v8 = vpop.f32.mrf.mxu3 }
 0x132   : > { %v1451_v20 = vpop.f32.mrf.mxu0 }
 0x133   : > { %v1828_v51 = vadd.f32 %v6311_v36, %v1739_v56  ;;  %v1452_v35 = vadd.f32 %v6358_v15, %v1451_v20  ;;  %v1195_v36 = vsel %vm1174_vm4, %v5973_v44, %v5173_v0  ;;  %v750_v44 = vrot.slane %v6115_v40, 4 }
 0x134   : > { %v1228_v32 = vsel %vm1207_vm5, %v1195_v36, %v5178_v9  ;;  %v5192_v9 = vpop.permute.xlu1 %5191 }
 0x135   : > { %v1906_v61 = vmax.f32 %v1828_v51, 0.0  ;;  %v1541_v25 = vadd.f32 %v6325_v42, %v1452_v35  ;;  %1490 = vmatmul.bf16.gmra.mxu0 %v1311_v31  ;;  %1780 = vmatmul.bf16.gmra.mxu2 %v1311_v31  ;;  %v763_v17 = vsel %vm757_vm3, %v750_v44, %v751_v19  ;;  %v764_v10 = vsel %vm757_vm3, %v749_v22, %v750_v44  ;;  %v5187_v35 = vpop.permute.xlu0 %5186 }
 0x136   : > { %v1318_v29 = vpack.c.bf16 %v763_v17, %v764_v10  ;;  %v1261_v56 = vsel %vm1240_vm6, %v1228_v32, %v5183_v5  ;;  %v1262_v31 = vsel %vm1240_vm6, %v1229_v57, %v5184_v38  ;;  %v5189_v13 = vunpack.i.h.bf16 %v5187_v35 }
 0x137   : > { %v1938_v16 = vmax.f32 %v1616_v26, %v1906_v61  ;;  %v1313_v21 = vpack.c.bf16 %v1262_v31, %v1261_v56  ;;  %v6435_v26 = vpop.f32.mrf.mxu1  ;;  %v5194_v44 = vunpack.i.h.bf16 %v5192_v9 }
 0x138   : > { %v1741_v60 = vpop.f32.mrf.mxu2 }
 0x139   : > { %v1742_v55 = vadd.f32 %v6358_v15, %v1741_v60  ;;  %v1970_v6 = vrot.slane %v1938_v16, 1  ;;  %v6439_v52 = vpop.f32.mrf.mxu3 }
 0x13a   : > { %v1453_v42 = vpop.f32.mrf.mxu0  ;;  %4391 = vmatmul.msk.bf16.gmra.mxu3 %vm1174_vm4, %v1318_v29  ;;  %4335 = vmatmul.msk.bf16.gmra.mxu1 %vm1174_vm4, %v1318_v29 }
 0x13b   : > { %v1831_v12 = vadd.f32 %v6327_v33, %v1742_v55  ;;  %v1454_v3 = vadd.f32 %v6358_v15, %v1453_v42  ;;  %v2031_v18 = vsel %vm562_vm0, %v1969_v54, %v1970_v6  ;;  %v1617_v33 = vmax.f32 %v1541_v25, 0.0  ;;  %v5197_v42 = vpop.permute.xlu2 %5196 }
 0x13c   : > { %v2033_v7 = vmax.f32 %v6390_v11, %v2031_v18  ;;  %v5188_v25 = vunpack.i.l.bf16 %v5187_v35  ;;  %v5199_v57 = vunpack.i.h.bf16 %v5197_v42  ;;  %v5198_v17 = vunpack.i.l.bf16 %v5197_v42 }
 0x13d   : > { %v1907_v59 = vmax.f32 %v1831_v12, 0.0  ;;  %v1543_v27 = vadd.f32 %v6341_v62, %v1454_v3  ;;  %v1198_v3 = vsel %vm1174_vm4, %v6066_v46, %v5189_v13 }
 0x13e   : > { %v1197_v32 = vsel %vm1174_vm4, %v6020_v48, %v5188_v25  ;;  %v753_v48 = vrot.slane %v6169_v39, 4  ;;  %v1231_v46 = vsel %vm1207_vm5, %v1198_v3, %v5194_v44 }
 0x13f   : > { %v6430_v20 = vmax.f32 %v1617_v33, %v1907_v59  ;;  %v1618_v28 = vmax.f32 %v1543_v27, 0.0  ;;  %v6453_v33 = vpop.f32.mrf.mxu1 }
 0x140   : > { %v1743_v51 = vpop.f32.mrf.mxu2 }
 0x141   : > { %v1971_v0 = vrot.slane %v6430_v20, 1  ;;  %v1744_v22 = vadd.f32 %v6358_v15, %v1743_v51  ;;  %v6460_v29 = vpop.f32.mrf.mxu3 }
 0x142   : > { %v1456_v24 = vpop.f32.mrf.mxu0 }
 0x143   : > { %v1833_v62 = vadd.f32 %v6343_v63, %v1744_v22  ;;  %v1457_v61 = vadd.f32 %v6358_v15, %v1456_v24  ;;  %v2030_v36 = vsel %vm562_vm0, %v1970_v6, %v1971_v0  ;;  %v5193_v63 = vunpack.i.l.bf16 %v5192_v9  ;;  %v5202_v9 = vpop.permute.xlu0 %5201 }
 0x144   : > { %v2034_v60 = vmax.f32 %v1938_v16, %v2030_v36 }
 0x145   : > { %v1908_v55 = vmax.f32 %v1833_v62, 0.0  ;;  %v1546_v38 = vadd.f32 %v6361_v58, %v1457_v61  ;;  %1495 = vmatmul.bf16.gmra.mxu0 %v1313_v21  ;;  %1785 = vmatmul.bf16.gmra.mxu2 %v1313_v21  ;;  %v1230_v10 = vsel %vm1207_vm5, %v1197_v32, %v5193_v63  ;;  %v1264_v61 = vsel %vm1240_vm6, %v1231_v46, %v5199_v57  ;;  %v5212_v57 = vpop.permute.xlu2 %5211 }
 0x146   : > { %v6445_v5 = vpack.c.bf16 %v2034_v60, %v2033_v7  ;;  %v752_v7 = vrot.slane %v6166_v4, 4  ;;  %v1263_v62 = vsel %vm1240_vm6, %v1230_v10, %v5198_v17  ;;  %v5204_v32 = vunpack.i.h.bf16 %v5202_v9 }
 0x147   : > { %v1940_v12 = vmax.f32 %v1618_v28, %v1908_v55  ;;  %v1619_v22 = vmax.f32 %v1546_v38, 0.0  ;;  %v6477_v60 = vpop.f32.mrf.mxu1  ;;  %v5203_v55 = vunpack.i.l.bf16 %v5202_v9  ;;  %v5207_v38 = vpop.permute.xlu1 %5206 }
 0x148   : > { %v1746_v6 = vpop.f32.mrf.mxu2  ;;  %v761_v31 = vsel %vm757_vm3, %v752_v7, %v753_v48  ;;  %v762_v51 = vsel %vm757_vm3, %v751_v19, %v752_v7  ;;  %v5209_v10 = vunpack.i.h.bf16 %v5207_v38 }
 0x149   : > { %v1747_v16 = vadd.f32 %v6358_v15, %v1746_v6  ;;  %v1972_v18 = vrot.slane %v1940_v12, 1  ;;  %v1320_v24 = vpack.c.bf16 %v761_v31, %v762_v51  ;;  %v6481_v63 = vpop.f32.mrf.mxu3  ;;  %v1199_v17 = vsel %vm1174_vm4, %v6069_v50, %v5203_v55 }
 0x14a   : > { %v1458_v58 = vpop.f32.mrf.mxu0  ;;  %v5213_v31 = vunpack.i.l.bf16 %v5212_v57  ;;  %v755_v50 = vrot.slane %v6214_v47, 4 }
 0x14b   : > { %v1836_v59 = vadd.f32 %v6364_v34, %v1747_v16  ;;  %v1459_v27 = vadd.f32 %v6358_v15, %v1458_v58  ;;  %v2029_v56 = vsel %vm562_vm0, %v1971_v0, %v1972_v18  ;;  %4392 = vmatmul.msk.bf16.gmra.mxu3 %vm1174_vm4, %v1320_v24  ;;  %4336 = vmatmul.msk.bf16.gmra.mxu1 %vm1174_vm4, %v1320_v24 }
 0x14c   : > { %v2035_v35 = vmax.f32 %v6430_v20, %v2029_v56  ;;  %v1315_v20 = vpack.c.bf16 %v1264_v61, %v1263_v62 }
 0x14d   : > { %v1909_v21 = vmax.f32 %v1836_v59, 0.0  ;;  %v1548_v34 = vadd.f32 %v6373_v41, %v1459_v27  ;;  %v1200_v59 = vsel %vm1174_vm4, %v6115_v40, %v5204_v32  ;;  %v5214_v27 = vunpack.i.h.bf16 %v5212_v57 }
 0x14e   : > { %v1233_v40 = vsel %vm1207_vm5, %v1200_v59, %v5209_v10 }
 0x14f   : > { %v6472_v25 = vmax.f32 %v1619_v22, %v1909_v21  ;;  %v1620_v6 = vmax.f32 %v1548_v34, 0.0  ;;  %v6495_v51 = vpop.f32.mrf.mxu1 }
 0x150   : > { %v1748_v0 = vpop.f32.mrf.mxu2 }
 0x151   : > { %v1973_v36 = vrot.slane %v6472_v25, 1  ;;  %v1749_v19 = vadd.f32 %v6358_v15, %v1748_v0  ;;  %v6502_v34 = vpop.f32.mrf.mxu3 }
 0x152   : > { %v1461_v13 = vpop.f32.mrf.mxu0 }
 0x153   : > { %v1838_v41 = vadd.f32 %v6381_v14, %v1749_v19  ;;  %v1462_v28 = vadd.f32 %v6358_v15, %v1461_v13  ;;  %v2028_v42 = vsel %vm562_vm0, %v1972_v18, %v1973_v36  ;;  %v5208_v14 = vunpack.i.l.bf16 %v5207_v38 }
 0x154   : > { %v2036_v44 = vmax.f32 %v1940_v12, %v2028_v42 }
 0x155   : > { %v1910_v3 = vmax.f32 %v1838_v41, 0.0  ;;  %v1551_v16 = vadd.f32 %v6394_v23, %v1462_v28  ;;  %1500 = vmatmul.bf16.gmra.mxu0 %v1315_v20  ;;  %1790 = vmatmul.bf16.gmra.mxu2 %v1315_v20  ;;  %v1232_v56 = vsel %vm1207_vm5, %v1199_v17, %v5208_v14  ;;  %v1266_v41 = vsel %vm1240_vm6, %v1233_v40, %v5214_v27  ;;  %v5222_v14 = vpop.permute.xlu1 %5221 }
 0x156   : > { %v6487_v58 = vpack.c.bf16 %v2036_v44, %v2035_v35  ;;  %v754_v35 = vrot.slane %v6211_v37, 4  ;;  %v1265_v13 = vsel %vm1240_vm6, %v1232_v56, %v5213_v31  ;;  %v5223_v27 = vunpack.i.l.bf16 %v5222_v14 }
 0x157   : > { %v1942_v7 = vmax.f32 %v1620_v6, %v1910_v3  ;;  %v1621_v9 = vmax.f32 %v1551_v16, 0.0  ;;  %v1317_v38 = vpack.c.bf16 %v1266_v41, %v1265_v13  ;;  %v6519_v32 = vpop.f32.mrf.mxu1 }
 0x158   : > { %v1751_v18 = vpop.f32.mrf.mxu2  ;;  %v759_v62 = vsel %vm757_vm3, %v754_v35, %v755_v50  ;;  %v760_v61 = vsel %vm757_vm3, %v753_v48, %v754_v35 }
 0x159   : > { %v1752_v12 = vadd.f32 %v6358_v15, %v1751_v18  ;;  %v1974_v46 = vrot.slane %v1942_v7, 1  ;;  %v1322_v20 = vpack.c.bf16 %v759_v62, %v760_v61  ;;  %v6525_v57 = vpop.f32.mrf.mxu3 }
 0x15a   : > { %v1463_v23 = vpop.f32.mrf.mxu0 }
 0x15b   : > { %v1841_v22 = vadd.f32 %v6398_v53, %v1752_v12  ;;  %v1464_v21 = vadd.f32 %v6358_v15, %v1463_v23  ;;  %v2027_v24 = vsel %vm562_vm0, %v1973_v36, %v1974_v46  ;;  %4393 = vmatmul.msk.bf16.gmra.mxu3 %vm1174_vm4, %v1322_v20  ;;  %4337 = vmatmul.msk.bf16.gmra.mxu1 %vm1174_vm4, %v1322_v20  ;;  %v5224_v12 = vunpack.i.h.bf16 %v5222_v14  ;;  %v5227_v23 = vpop.permute.xlu2 %5226 }
 0x15c   : > { %v2037_v0 = vmax.f32 %v6472_v25, %v2027_v24  ;;  %v5217_v25 = vpop.permute.xlu0 %5216  ;;  %v5228_v40 = vunpack.i.l.bf16 %v5227_v23  ;;  %v756_v24 = vrot.slane %v6258_v45, 4 }
 0x15d   : > { %v1911_v19 = vmax.f32 %v1841_v22, 0.0  ;;  %v1553_v53 = vadd.f32 %v6409_v30, %v1464_v21  ;;  %v5219_v3 = vunpack.i.h.bf16 %v5217_v25  ;;  %v5218_v16 = vunpack.i.l.bf16 %v5217_v25 }
 0x15f   : > { %v6514_v28 = vmax.f32 %v1621_v9, %v1911_v19  ;;  %v1622_v10 = vmax.f32 %v1553_v53, 0.0  ;;  %v1202_v31 = vsel %vm1174_vm4, %v6166_v4, %v5219_v3  ;;  %v1201_v35 = vsel %vm1174_vm4, %v6118_v43, %v5218_v16  ;;  %v6544_v9 = vpop.f32.mrf.mxu1 }
 0x160   : > { %v1753_v36 = vpop.f32.mrf.mxu2  ;;  %v1234_v61 = vsel %vm1207_vm5, %v1201_v35, %v5223_v27  ;;  %v758_v43 = vsel %vm757_vm3, %v755_v50, %v756_v24  ;;  %v789_v19 = vsel %vm757_vm3, %v756_v24, %v725_v49 }
 0x161   : > { %v1975_v55 = vrot.slane %v6514_v28, 1  ;;  %v1754_v48 = vadd.f32 %v6358_v15, %v1753_v36  ;;  %v1324_v13 = vpack.c.bf16 %v789_v19, %v758_v43  ;;  %v1267_v41 = vsel %vm1240_vm6, %v1234_v61, %v5228_v40 }
 0x162   : > { %v1466_v42 = vpop.f32.mrf.mxu0 }
 0x163   : > { %v1843_v30 = vadd.f32 %v6416_v8, %v1754_v48  ;;  %v1467_v44 = vadd.f32 %v6358_v15, %v1466_v42  ;;  %v2026_v6 = vsel %vm562_vm0, %v1974_v46, %v1975_v55 }
 0x164   : > { %v2038_v17 = vmax.f32 %v1942_v7, %v2026_v6 }
 0x165   : > { %v1912_v18 = vmax.f32 %v1843_v30, 0.0  ;;  %v1556_v59 = vadd.f32 %v6435_v26, %v1467_v44  ;;  %1505 = vmatmul.bf16.gmra.mxu0 %v1317_v38  ;;  %1795 = vmatmul.bf16.gmra.mxu2 %v1317_v38  ;;  %v5229_v26 = vunpack.i.h.bf16 %v5227_v23  ;;  %v5232_v38 = vpop.permute.xlu0 %5231  ;;  %v5237_v44 = vpop.permute.xlu1 %5236 }
 0x166   : > { %v6529_v8 = vpack.c.bf16 %v2038_v17, %v2037_v0  ;;  %v1235_v0 = vsel %vm1207_vm5, %v1202_v31, %v5224_v12  ;;  %v5234_v42 = vunpack.i.h.bf16 %v5232_v38  ;;  %v5233_v30 = vunpack.i.l.bf16 %v5232_v38 }
 0x167   : > { %v1944_v46 = vmax.f32 %v1622_v10, %v1912_v18  ;;  %v1268_v36 = vsel %vm1240_vm6, %v1235_v0, %v5229_v26  ;;  %v6570_v3 = vpop.f32.mrf.mxu1  ;;  %v5239_v14 = vunpack.i.h.bf16 %v5237_v44  ;;  %v5238_v17 = vunpack.i.l.bf16 %v5237_v44  ;;  %v5242_v10 = vpop.permute.xlu2 %5241 }
 0x168   : > { %v1756_v56 = vpop.f32.mrf.mxu2  ;;  %v1319_v49 = vpack.c.bf16 %v1268_v36, %v1267_v41  ;;  %v1203_v12 = vsel %vm1174_vm4, %v6169_v39, %v5233_v30 }
 0x169   : > { %v1757_v7 = vadd.f32 %v6358_v15, %v1756_v56  ;;  %v1976_v22 = vrot.slane %v1944_v46, 1  ;;  %v5243_v56 = vunpack.i.l.bf16 %v5242_v10  ;;  %v1236_v31 = vsel %vm1207_vm5, %v1203_v12, %v5238_v17 }
 0x16a   : > { %v6536_v21 = vpop.f32.mrf.mxu0 }
 0x16b   : > { %v1846_v62 = vadd.f32 %v6439_v52, %v1757_v7  ;;  %v2025_v4 = vsel %vm562_vm0, %v1975_v55, %v1976_v22  ;;  %v1623_v52 = vmax.f32 %v1556_v59, 0.0  ;;  %v6555_v55 = vpop.f32.mrf.mxu3  ;;  %4394 = vmatmul.msk.bf16.gmra.mxu3 %vm1174_vm4, %v1324_v13  ;;  %4338 = vmatmul.msk.bf16.gmra.mxu1 %vm1174_vm4, %v1324_v13  ;;  %v1204_v59 = vsel %vm1174_vm4, %v6211_v37, %v5234_v42 }
 0x16c   : > { %v2039_v53 = vmax.f32 %v6514_v28, %v2025_v4  ;;  %v1237_v35 = vsel %vm1207_vm5, %v1204_v59, %v5239_v14  ;;  %v1269_v7 = vsel %vm1240_vm6, %v1236_v31, %v5243_v56 }
 0x16d   : > { %v1913_v20 = vmax.f32 %v1846_v62, 0.0  ;;  %v5247_v37 = vpop.permute.xlu0 %5246  ;;  %v5252_v4 = vpop.permute.xlu1 %5251 }
 0x16e   : > { %v5249_v39 = vunpack.i.h.bf16 %v5247_v37  ;;  %v5248_v0 = vunpack.i.l.bf16 %v5247_v37  ;;  %v5254_v43 = vunpack.i.h.bf16 %v5252_v4  ;;  %v5253_v19 = vunpack.i.l.bf16 %v5252_v4 }
 0x16f   : > { %v6557_v48 = vmax.f32 %v1623_v52, %v1913_v20  ;;  %v1572_v40 = vpop.f32.mrf.mxu1 }
 0x170   : > { %v6560_v50 = vpop.f32.mrf.mxu2  ;;  %v1206_v20 = vsel %vm1174_vm4, %v6258_v45, %v5249_v39  ;;  %v1205_v13 = vsel %vm1174_vm4, %v6214_v47, %v5248_v0 }
 0x171   : > { %v1977_v2 = vrot.slane %v6557_v48, 1  ;;  %v1239_v42 = vsel %vm1207_vm5, %v1206_v20, %v5254_v43 }
 0x172   : > { %v6563_v28 = vpop.f32.mrf.mxu0 }
 0x173   : > { %v2024_v25 = vsel %vm562_vm0, %v1976_v22, %v1977_v2  ;;  %v1860_v27 = vpop.f32.mrf.mxu3 }
 0x174   : > { %v2040_v6 = vmax.f32 %v1944_v46, %v2024_v25  ;;  %v5244_v46 = vunpack.i.h.bf16 %v5242_v10  ;;  %v1238_v25 = vsel %vm1207_vm5, %v1205_v13, %v5253_v19 }
 0x175   : > { %1510 = vmatmul.bf16.gmra.mxu0 %v1319_v49  ;;  %1800 = vmatmul.bf16.gmra.mxu2 %v1319_v49 }
 0x176   : > { %v6572_v16 = vpack.c.bf16 %v2040_v6, %v2039_v53  ;;  %v1270_v22 = vsel %vm1240_vm6, %v1237_v35, %v5244_v46  ;;  %v5257_v53 = vpop.permute.xlu2 %5256 }
 0x177   : > { %v1321_v24 = vpack.c.bf16 %v1270_v22, %v1269_v7  ;;  %v5259_v36 = vunpack.i.h.bf16 %v5257_v53  ;;  %v5258_v49 = vunpack.i.l.bf16 %v5257_v53  ;;  %v1575_v38 = vpop.f32.mrf.mxu1 }
 0x178   : > { %v6574_v18 = vpop.f32.mrf.mxu2 }
 0x179   : > { %v1271_v44 = vsel %vm1240_vm6, %v1238_v25, %v5258_v49  ;;  %v1272_v6 = vsel %vm1240_vm6, %v1239_v42, %v5259_v36 }
 0x17a   : > { %v6580_v23 = vpop.f32.mrf.mxu0  ;;  %v1323_v17 = vpack.c.bf16 %v1272_v6, %v1271_v44 }
 0x17b   : > { %v1862_v61 = vpop.f32.mrf.mxu3 }
 0x17f   : > { %v6594_v45 = vpop.f32.mrf.mxu1 }
 0x180   : > { %v1763_v26 = vpop.f32.mrf.mxu2 }
 0x181   : > { %v1764_v20 = vadd.f32 %v6358_v15, %v1763_v26  ;;  %v1469_v26 = vadd.f32 %v6358_v15, %v6536_v21 }
 0x182   : > { %v1476_v62 = vpop.f32.mrf.mxu0 }
 0x183   : > { %v1865_v30 = vpop.f32.mrf.mxu3  ;;  %v1477_v13 = vadd.f32 %v6358_v15, %v1476_v62 }
 0x185   : > { %1515 = vmatmul.bf16.gmra.mxu0 %v1321_v24  ;;  %1805 = vmatmul.bf16.gmra.mxu2 %v1321_v24  ;;  %v1566_v44 = vadd.f32 %v6519_v32, %v1477_v13 }
 0x187   : > { %v6598_v46 = vpop.f32.mrf.mxu1 }
 0x188   : > { %v1766_v52 = vpop.f32.mrf.mxu2 }
 0x189   : > { %v1767_v39 = vadd.f32 %v6358_v15, %v1766_v52  ;;  %v1762_v52 = vadd.f32 %v6358_v15, %v6574_v18  ;;  %v1853_v18 = vadd.f32 %v6502_v34, %v1764_v20 }
 0x18a   : > { %v1478_v41 = vpop.f32.mrf.mxu0 }
 0x18b   : > { %v6596_v47 = vpop.f32.mrf.mxu3  ;;  %v1479_v0 = vadd.f32 %v6358_v15, %v1478_v41  ;;  %v1474_v41 = vadd.f32 %v6358_v15, %v6580_v23 }
 0x190   : > { %v1768_v14 = vpop.f32.mrf.mxu2 }
 0x191   : > { %v1769_v35 = vadd.f32 %v6358_v15, %v1768_v14 }
 0x192   : > { %v1481_v10 = vpop.f32.mrf.mxu0 }
 0x193   : > { %v6603_v22 = vpop.f32.mrf.mxu3  ;;  %v1482_v24 = vadd.f32 %v6358_v15, %v1481_v10  ;;  %v1858_v36 = vadd.f32 %v6555_v55, %v1769_v35  ;;  %v1759_v55 = vadd.f32 %v6358_v15, %v6560_v50  ;;  %v1851_v50 = vadd.f32 %v6481_v63, %v1762_v52 }
 0x194   : > { %v1563_v10 = vadd.f32 %v6495_v51, %v1474_v41  ;;  %v1558_v51 = vadd.f32 %v6453_v33, %v1469_v26 }
 0x195   : > { %1520 = vmatmul.bf16.gmra.mxu0 %v1323_v17  ;;  %1810 = vmatmul.bf16.gmra.mxu2 %v1323_v17  ;;  %v1571_v49 = vadd.f32 %v6570_v3, %v1482_v24  ;;  %v1918_v23 = vmax.f32 %v1858_v36, 0.0  ;;  %v1848_v34 = vadd.f32 %v6460_v29, %v1759_v55 }
 0x196   : > { %v1624_v52 = vmax.f32 %v1558_v51, 0.0 }
 0x197   : > { %v1914_v29 = vmax.f32 %v1848_v34, 0.0 }
 0x198   : > { %v1771_v59 = vpop.f32.mrf.mxu2 }
 0x199   : > { %v1772_v56 = vadd.f32 %v6358_v15, %v1771_v59 }
 0x19a   : > { %v1483_v12 = vpop.f32.mrf.mxu0 }
 0x19b   : > { %v1484_v31 = vadd.f32 %v6358_v15, %v1483_v12  ;;  %v1861_v43 = vadd.f32 %v1860_v27, %v1772_v56  ;;  %v1856_v27 = vadd.f32 %v6525_v57, %v1767_v39  ;;  %v6628_v57 = vpop.f32.mrf.mxu1  ;;  %v6633_v56 = vpop.f32.mrf.mxu3 }
 0x19d   : > { %v1573_v19 = vadd.f32 %v1572_v40, %v1484_v31  ;;  %v1568_v40 = vadd.f32 %v6544_v9, %v1479_v0  ;;  %v1919_v3 = vmax.f32 %v1861_v43, 0.0  ;;  %v1629_v9 = vmax.f32 %v1571_v49, 0.0 }
 0x19e   : > { %v1917_v59 = vmax.f32 %v1856_v27, 0.0  ;;  %v1626_v43 = vmax.f32 %v1563_v10, 0.0 }
 0x19f   : > { %v1630_v62 = vmax.f32 %v1573_v19, 0.0  ;;  %v1628_v12 = vmax.f32 %v1568_v40, 0.0  ;;  %v1951_v32 = vmax.f32 %v1629_v9, %v1919_v3 }
 0x1a0   : > { %v1773_v7 = vpop.f32.mrf.mxu2 }
 0x1a1   : > { %v1774_v37 = vadd.f32 %v6358_v15, %v1773_v7  ;;  %v1916_v7 = vmax.f32 %v1853_v18, 0.0  ;;  %v1950_v24 = vmax.f32 %v1628_v12, %v1918_v23 }
 0x1a2   : > { %v1486_v4 = vpop.f32.mrf.mxu0 }
 0x1a3   : > { %v1863_v53 = vadd.f32 %v1862_v61, %v1774_v37  ;;  %v1487_v42 = vadd.f32 %v6358_v15, %v1486_v4  ;;  %v1472_v61 = vadd.f32 %v6358_v15, %v6563_v28  ;;  %v1915_v4 = vmax.f32 %v1851_v50, 0.0  ;;  %v1585_v26 = vpop.f32.mrf.mxu1  ;;  %v1875_v23 = vpop.f32.mrf.mxu3 }
 0x1a4   : > { %v1948_v36 = vmax.f32 %v1626_v43, %v1916_v7 }
 0x1a5   : > { %v1920_v25 = vmax.f32 %v1863_v53, 0.0  ;;  %v1576_v14 = vadd.f32 %v1575_v38, %v1487_v42  ;;  %v1561_v35 = vadd.f32 %v6477_v60, %v1472_v61  ;;  %v1627_v38 = vmax.f32 %v1566_v44, 0.0 }
 0x1a6   : > { %v1983_v53 = vrot.slane %v1951_v32, 1  ;;  %v1982_v60 = vrot.slane %v1950_v24, 1  ;;  %v1980_v44 = vrot.slane %v1948_v36, 1 }
 0x1a7   : > { %v1952_v17 = vmax.f32 %v1630_v62, %v1920_v25  ;;  %v1631_v37 = vmax.f32 %v1576_v14, 0.0  ;;  %v1949_v19 = vmax.f32 %v1627_v38, %v1917_v59 }
 0x1a8   : > { %v1776_v6 = vpop.f32.mrf.mxu2 }
 0x1a9   : > { %v1777_v21 = vadd.f32 %v6358_v15, %v1776_v6  ;;  %v1984_v0 = vrot.slane %v1952_v17, 1  ;;  %v1981_v27 = vrot.slane %v1949_v19, 1  ;;  %v1946_v6 = vmax.f32 %v1624_v52, %v1914_v29 }
 0x1aa   : > { %v1488_v28 = vpop.f32.mrf.mxu0 }
 0x1ab   : > { %v1866_v31 = vadd.f32 %v1865_v30, %v1777_v21  ;;  %v1489_v63 = vadd.f32 %v6358_v15, %v1488_v28  ;;  %v1625_v30 = vmax.f32 %v1561_v35, 0.0  ;;  %v2017_v33 = vsel %vm562_vm0, %v1983_v53, %v1984_v0  ;;  %v1587_v51 = vpop.f32.mrf.mxu1 }
 0x1ac   : > { %v2047_v61 = vmax.f32 %v1951_v32, %v2017_v33  ;;  %v2020_v12 = vsel %vm562_vm0, %v1980_v44, %v1981_v27  ;;  %v1978_v35 = vrot.slane %v1946_v6, 1 }
 0x1ad   : > { %v1921_v39 = vmax.f32 %v1866_v31, 0.0  ;;  %v1578_v25 = vadd.f32 %v6594_v45, %v1489_v63  ;;  %v1947_v41 = vmax.f32 %v1625_v30, %v1915_v4  ;;  %v2018_v45 = vsel %vm562_vm0, %v1982_v60, %v1983_v53  ;;  %v1877_v30 = vpop.f32.mrf.mxu3 }
 0x1ae   : > { %v2046_v10 = vmax.f32 %v1950_v24, %v2018_v45  ;;  %v2023_v53 = vsel %vm562_vm0, %v1977_v2, %v1978_v35 }
 0x1af   : > { %v6639_v20 = vmax.f32 %v1631_v37, %v1921_v39  ;;  %v1632_v9 = vmax.f32 %v1578_v25, 0.0  ;;  %v1979_v59 = vrot.slane %v1947_v41, 1  ;;  %v2044_v37 = vmax.f32 %v1948_v36, %v2020_v12 }
 0x1b0   : > { %v1778_v13 = vpop.f32.mrf.mxu2 }
 0x1b1   : > { %v1985_v49 = vrot.slane %v6639_v20, 1  ;;  %v1779_v42 = vadd.f32 %v6358_v15, %v1778_v13  ;;  %v2021_v31 = vsel %vm562_vm0, %v1979_v59, %v1980_v44  ;;  %v2022_v39 = vsel %vm562_vm0, %v1978_v35, %v1979_v59 }
 0x1b2   : > { %v1491_v40 = vpop.f32.mrf.mxu0 }
 0x1b3   : > { %v1868_v55 = vadd.f32 %v6596_v47, %v1779_v42  ;;  %v1492_v3 = vadd.f32 %v6358_v15, %v1491_v40  ;;  %v2016_v62 = vsel %vm562_vm0, %v1984_v0, %v1985_v49  ;;  %v2019_v47 = vsel %vm562_vm0, %v1981_v27, %v1982_v60 }
 0x1b4   : > { %v2048_v18 = vmax.f32 %v1952_v17, %v2016_v62  ;;  %v2045_v17 = vmax.f32 %v1949_v19, %v2019_v47  ;;  %v2043_v0 = vmax.f32 %v1947_v41, %v2021_v31  ;;  %v1590_v62 = vpop.f32.mrf.mxu1 }
 0x1b5   : > { %v1922_v14 = vmax.f32 %v1868_v55, 0.0  ;;  %v1581_v21 = vadd.f32 %v6598_v46, %v1492_v3 }
 0x1b6   : > { %v2088_v50 = vpack.c.bf16 %v2048_v18, %v2047_v61  ;;  %v2087_v38 = vpack.c.bf16 %v2046_v10, %v2045_v17  ;;  %v2086_v29 = vpack.c.bf16 %v2044_v37, %v2043_v0  ;;  %v1880_v18 = vpop.f32.mrf.mxu3 }
 0x1b7   : > { %v1954_v28 = vmax.f32 %v1632_v9, %v1922_v14  ;;  %v1633_v43 = vmax.f32 %v1581_v21, 0.0 }
 0x1b8   : > { %v1781_v34 = vpop.f32.mrf.mxu2  ;;  %2177 = vmatpush.bf16.msrb.mxu1 %v2088_v50 }
 0x1b9   : > { %v1782_v32 = vadd.f32 %v6358_v15, %v1781_v34  ;;  %v1986_v46 = vrot.slane %v1954_v28, 1 }
 0x1ba   : > { %v1493_v7 = vpop.f32.mrf.mxu0 }
 0x1bb   : > { %v1871_v24 = vadd.f32 %v6603_v22, %v1782_v32  ;;  %v2015_v63 = vsel %vm562_vm0, %v1985_v49, %v1986_v46  ;;  %v2042_v22 = vmax.f32 %v1946_v6, %v2022_v39  ;;  %v1494_v60 = vadd.f32 %v6358_v15, %v1493_v7 }
 0x1bc   : > { %2178 = vmatpush.bf16.msrb.mxu1 %v2087_v38  ;;  %v2049_v4 = vmax.f32 %v6639_v20, %v2015_v63  ;;  %v2041_v49 = vmax.f32 %v6557_v48, %v2023_v53  ;;  %v1592_v10 = vpop.f32.mrf.mxu1 }
 0x1bd   : > { %v1923_v19 = vmax.f32 %v1871_v24, 0.0  ;;  %v1583_v52 = vadd.f32 %v6628_v57, %v1494_v60 }
 0x1be   : > { %v2085_v33 = vpack.c.bf16 %v2042_v22, %v2041_v49 }
 0x1bf   : > { %v1955_v13 = vmax.f32 %v1633_v43, %v1923_v19  ;;  %v1634_v45 = vmax.f32 %v1583_v52, 0.0 }
 0x1c0   : > { %v1783_v36 = vpop.f32.mrf.mxu2  ;;  %2179 = vmatpush.bf16.msrb.mxu1 %v2086_v29 }
 0x1c1   : > { %v1987_v25 = vrot.slane %v1955_v13, 1  ;;  %v1784_v20 = vadd.f32 %v6358_v15, %v1783_v36 }
 0x1c2   : > { %v1496_v42 = vpop.f32.mrf.mxu0 }
 0x1c3   : > { %v1873_v41 = vadd.f32 %v6633_v56, %v1784_v20  ;;  %v1497_v2 = vadd.f32 %v6358_v15, %v1496_v42  ;;  %v2014_v27 = vsel %vm562_vm0, %v1986_v46, %v1987_v25 }
 0x1c4   : > { %2180 = vmatpush.bf16.msrb.mxu1 %v2085_v33  ;;  %v2050_v40 = vmax.f32 %v1954_v28, %v2014_v27  ;;  %v1595_v0 = vpop.f32.mrf.mxu1 }
 0x1c5   : > { %v1924_v55 = vmax.f32 %v1873_v41, 0.0  ;;  %v1586_v3 = vadd.f32 %v1585_v26, %v1497_v2 }
 0x1c6   : > { %v6678_v48 = vpack.c.bf16 %v2050_v40, %v2049_v4 }
 0x1c7   : > { %v1956_v56 = vmax.f32 %v1634_v45, %v1924_v55  ;;  %v1635_v9 = vmax.f32 %v1586_v3, 0.0  ;;  %v6711_v45 = vld [vmem:[%s7901_s3] ss:$0 sm:$0xff] }
 0x1c8   : > { %v1786_v61 = vpop.f32.mrf.mxu2  ;;  %2181 = vmatpush.bf16.msrb.mxu1 %v6572_v16 }
 0x1c9   : > { %v1787_v57 = vadd.f32 %v6358_v15, %v1786_v61  ;;  %v1988_v21 = vrot.slane %v1956_v56, 1 }
 0x1ca   : > { %v1498_v44 = vpop.f32.mrf.mxu0 }
 0x1cb   : > { %v1876_v6 = vadd.f32 %v1875_v23, %v1787_v57  ;;  %v1499_v26 = vadd.f32 %v6358_v15, %v1498_v44  ;;  %v2013_v12 = vsel %vm562_vm0, %v1987_v25, %v1988_v21  ;;  %v1882_v23 = vpop.f32.mrf.mxu3 }
 0x1cc   : > { %2182 = vmatpush.bf16.msrb.mxu1 %v6529_v8  ;;  %v2051_v31 = vmax.f32 %v1955_v13, %v2013_v12  ;;  %v6702_v33 = vpop.f32.mrf.mxu1 }
 0x1cd   : > { %v1925_v14 = vmax.f32 %v1876_v6, 0.0  ;;  %v1588_v34 = vadd.f32 %v1587_v51, %v1499_v26 }
 0x1cf   : > { %v1957_v47 = vmax.f32 %v1635_v9, %v1925_v14  ;;  %v1636_v38 = vmax.f32 %v1588_v34, 0.0 }
 0x1d0   : > { %v1788_v50 = vpop.f32.mrf.mxu2  ;;  %2183 = vmatpush.bf16.msrb.mxu1 %v6487_v58 }
 0x1d1   : > { %v1989_v59 = vrot.slane %v1957_v47, 1  ;;  %v1789_v16 = vadd.f32 %v6358_v15, %v1788_v50 }
 0x1d2   : > { %v1501_v28 = vpop.f32.mrf.mxu0 }
 0x1d3   : > { %v1878_v8 = vadd.f32 %v1877_v30, %v1789_v16  ;;  %v1502_v17 = vadd.f32 %v6358_v15, %v1501_v28  ;;  %v2012_v32 = vsel %vm562_vm0, %v1988_v21, %v1989_v59  ;;  %v1885_v4 = vpop.f32.mrf.mxu3 }
 0x1d4   : > { %2184 = vmatpush.bf16.msrb.mxu1 %v6445_v5  ;;  %v2052_v58 = vmax.f32 %v1956_v56, %v2012_v32  ;;  %v6714_v9 = vpop.f32.mrf.mxu1 }
 0x1d5   : > { %v1926_v35 = vmax.f32 %v1878_v8, 0.0  ;;  %v1591_v46 = vadd.f32 %v1590_v62, %v1502_v17 }
 0x1d6   : > { %v6692_v7 = vpack.c.bf16 %v2052_v58, %v2051_v31 }
 0x1d7   : > { %v1958_v39 = vmax.f32 %v1636_v38, %v1926_v35  ;;  %v1637_v43 = vmax.f32 %v1591_v46, 0.0 }
 0x1d8   : > { %v1791_v37 = vpop.f32.mrf.mxu2 }
 0x1d9   : > { %v1792_v24 = vadd.f32 %v6358_v15, %v1791_v37  ;;  %v1990_v53 = vrot.slane %v1958_v39, 1 }
 0x1da   : > { %v1503_v63 = vpop.f32.mrf.mxu0 }
 0x1db   : > { %v1881_v51 = vadd.f32 %v1880_v18, %v1792_v24  ;;  %v1504_v5 = vadd.f32 %v6358_v15, %v1503_v63  ;;  %v2011_v60 = vsel %vm562_vm0, %v1989_v59, %v1990_v53  ;;  %v6704_v40 = vpop.f32.mrf.mxu3 }
 0x1dc   : > { %v2053_v52 = vmax.f32 %v1957_v47, %v2011_v60  ;;  %v1602_v34 = vpop.f32.mrf.mxu1 }
 0x1dd   : > { %v1927_v19 = vmax.f32 %v1881_v51, 0.0  ;;  %v1593_v49 = vadd.f32 %v1592_v10, %v1504_v5 }
 0x1df   : > { %v1959_v29 = vmax.f32 %v1637_v43, %v1927_v19  ;;  %v1638_v3 = vmax.f32 %v1593_v49, 0.0 }
 0x1e0   : > { %v1793_v22 = vpop.f32.mrf.mxu2 }
 0x1e1   : > { %v1991_v30 = vrot.slane %v1959_v29, 1  ;;  %v1794_v13 = vadd.f32 %v6358_v15, %v1793_v22 }
 0x1e2   : > { %v1506_v36 = vpop.f32.mrf.mxu0 }
 0x1e3   : > { %v1883_v25 = vadd.f32 %v1882_v23, %v1794_v13  ;;  %v1507_v20 = vadd.f32 %v6358_v15, %v1506_v36  ;;  %v2010_v42 = vsel %vm562_vm0, %v1990_v53, %v1991_v30  ;;  %v1890_v47 = vpop.f32.mrf.mxu3 }
 0x1e4   : > { %v2054_v41 = vmax.f32 %v1958_v39, %v2010_v42  ;;  %v1605_v58 = vpop.f32.mrf.mxu1 }
 0x1e5   : > { %v1928_v2 = vmax.f32 %v1883_v25, 0.0  ;;  %v1596_v27 = vadd.f32 %v1595_v0, %v1507_v20 }
 0x1e6   : > { %v6706_v55 = vpack.c.bf16 %v2054_v41, %v2053_v52 }
 0x1e7   : > { %v1960_v61 = vmax.f32 %v1638_v3, %v1928_v2  ;;  %v1639_v56 = vmax.f32 %v1596_v27, 0.0 }
 0x1e8   : > { %v1796_v62 = vpop.f32.mrf.mxu2 }
 0x1e9   : > { %v1797_v15 = vadd.f32 %v6711_v45, %v1796_v62  ;;  %v1992_v6 = vrot.slane %v1960_v61, 1 }
 0x1ea   : > { %v1508_v18 = vpop.f32.mrf.mxu0 }
 0x1eb   : > { %v1886_v57 = vadd.f32 %v1885_v4, %v1797_v15  ;;  %v2009_v50 = vsel %vm562_vm0, %v1991_v30, %v1992_v6  ;;  %v1892_v17 = vpop.f32.mrf.mxu3 }
 0x1ec   : > { %v2055_v16 = vmax.f32 %v1959_v29, %v2009_v50  ;;  %v1607_v37 = vpop.f32.mrf.mxu1 }
 0x1ed   : > { %v1929_v44 = vmax.f32 %v1886_v57, 0.0 }
 0x1ef   : > { %v6716_v14 = vmax.f32 %v1639_v56, %v1929_v44 }
 0x1f0   : > { %v1798_v21 = vpop.f32.mrf.mxu2 }
 0x1f1   : > { %v1993_v26 = vrot.slane %v6716_v14, 1  ;;  %v1799_v27 = vadd.f32 %v6711_v45, %v1798_v21 }
 0x1f2   : > { %v1511_v10 = vpop.f32.mrf.mxu0 }
 0x1f3   : > { %v2008_v59 = vsel %vm562_vm0, %v1992_v6, %v1993_v26  ;;  %v1895_v35 = vpop.f32.mrf.mxu3  ;;  %v1512_v3 = vadd.f32 %v6711_v45, %v1511_v10  ;;  %v1888_v10 = vadd.f32 %v6704_v40, %v1799_v27 }
 0x1f4   : > { %v2056_v12 = vmax.f32 %v1960_v61, %v2008_v59  ;;  %v1610_v0 = vpop.f32.mrf.mxu1  ;;  %v1509_v59 = vadd.f32 %v6711_v45, %v1508_v18 }
 0x1f6   : > { %v6725_v28 = vpack.c.bf16 %v2056_v12, %v2055_v16 }
 0x1f8   : > { %v1801_v23 = vpop.f32.mrf.mxu2 }
 0x1f9   : > { %v1802_v20 = vadd.f32 %v6711_v45, %v1801_v23 }
 0x1fa   : > { %v1513_v8 = vpop.f32.mrf.mxu0 }
 0x1fb   : > { %v1897_v24 = vpop.f32.mrf.mxu3  ;;  %v1514_v52 = vadd.f32 %v6711_v45, %v1513_v8  ;;  %v1891_v16 = vadd.f32 %v1890_v47, %v1802_v20 }
 0x1fc   : > { %v1612_v61 = vpop.f32.mrf.mxu1 }
 0x1fd   : > { %v1603_v8 = vadd.f32 %v1602_v34, %v1514_v52 }
 0x1ff   : > { %v1642_v18 = vmax.f32 %v1603_v8, 0.0  ;;  %v4407_v8 = vld [vmem:[%s7857_s4 + $0x18] sm:$0xf0] }
 0x200   : > { %v1803_v32 = vpop.f32.mrf.mxu2 }
 0x201   : > { %v1804_v13 = vadd.f32 %v6711_v45, %v1803_v32 }
 0x202   : > { %v1516_v31 = vpop.f32.mrf.mxu0 }
 0x203   : > { %v1900_v51 = vpop.f32.mrf.mxu3  ;;  %v1517_v60 = vadd.f32 %v6711_v45, %v1516_v31  ;;  %v1893_v62 = vadd.f32 %v1892_v17, %v1804_v13  ;;  %v1601_v17 = vadd.f32 %v6714_v9, %v1512_v3 }
 0x205   : > { %v1606_v15 = vadd.f32 %v1605_v58, %v1517_v60  ;;  %v1641_v34 = vmax.f32 %v1601_v17, 0.0  ;;  %v4415_v17 = vld [vmem:[%s7857_s4 + $0x28] sm:$0xf0] }
 0x207   : > { %v1643_v58 = vmax.f32 %v1606_v15, 0.0 }
 0x208   : > { %v1806_v46 = vpop.f32.mrf.mxu2 }
 0x209   : > { %v1807_v29 = vadd.f32 %v6711_v45, %v1806_v46 }
 0x20a   : > { %v1518_v38 = vpop.f32.mrf.mxu0 }
 0x20b   : > { %v1519_v22 = vadd.f32 %v6711_v45, %v1518_v38  ;;  %v1896_v42 = vadd.f32 %v1895_v35, %v1807_v29  ;;  %v1902_v23 = vpop.f32.mrf.mxu3  ;;  %v1932_v35 = vmax.f32 %v1893_v62, 0.0 }
 0x20d   : > { %v1608_v41 = vadd.f32 %v1607_v37, %v1519_v22  ;;  %v1933_v12 = vmax.f32 %v1896_v42, 0.0 }
 0x20f   : > { %v1644_v32 = vmax.f32 %v1608_v41, 0.0 }
 0x210   : > { %v1808_v39 = vpop.f32.mrf.mxu2 }
 0x211   : > { %v1809_v43 = vadd.f32 %v6711_v45, %v1808_v39  ;;  %v1931_v39 = vmax.f32 %v1891_v16, 0.0 }
 0x212   : > { %v1521_v63 = vpop.f32.mrf.mxu0 }
 0x213   : > { %v1522_v19 = vadd.f32 %v6711_v45, %v1521_v63  ;;  %v1898_v36 = vadd.f32 %v1897_v24, %v1809_v43  ;;  %v1598_v24 = vadd.f32 %v6702_v33, %v1509_v59  ;;  %v1964_v43 = vmax.f32 %v1642_v18, %v1932_v35  ;;  %v4867_v33 = vld [vmem:[%s7857_s4 + $0x4] sm:$0xf0]  ;;  %v4869_v59 = vld [vmem:[%s7857_s4 + $0x14] sm:$0xf0] }
 0x214   : > { %v4875_v35 = vld [vmem:[%s7857_s4 + $0x44] sm:$0xf0] }
 0x215   : > { %v1611_v49 = vadd.f32 %v1610_v0, %v1522_v19  ;;  %v1934_v56 = vmax.f32 %v1898_v36, 0.0  ;;  %v1930_v0 = vmax.f32 %v1888_v10, 0.0  ;;  %v1640_v40 = vmax.f32 %v1598_v24, 0.0  ;;  %v4870_v10 = vld [vmem:[%s7857_s4 + $0x24] sm:$0xf] }
 0x216   : > { %v1963_v19 = vmax.f32 %v1641_v34, %v1931_v39  ;;  %v4423_v24 = vld [vmem:[%s7857_s4 + $0x38] sm:$0xf0]  ;;  %v4437_v39 = vld [vmem:[%s7857_s4 + $0x50] sm:$0xf]  ;;  %v4431_v34 = vld [vmem:[%s7857_s4 + $0x48] sm:$0xf0] }
 0x217   : > { %v1645_v44 = vmax.f32 %v1611_v49, 0.0  ;;  %v1966_v37 = vmax.f32 %v1644_v32, %v1934_v56  ;;  %v1996_v49 = vrot.slane %v1964_v43, 1  ;;  %v4421_v32 = vld [vmem:[%s7857_s4 + $0x30] sm:$0xf] }
 0x218   : > { %v1811_v4 = vpop.f32.mrf.mxu2  ;;  %v1995_v52 = vrot.slane %v1963_v19, 1 }
 0x219   : > { %v1812_v53 = vadd.f32 %v6711_v45, %v1811_v4  ;;  %v1998_v4 = vrot.slane %v1966_v37, 1 }
 0x21a   : > { %v1523_v5 = vpop.f32.mrf.mxu0  ;;  %v2005_v41 = vsel %vm562_vm0, %v1995_v52, %v1996_v49 }
 0x21b   : > { %v1901_v30 = vadd.f32 %v1900_v51, %v1812_v53  ;;  %v1524_v25 = vadd.f32 %v6711_v45, %v1523_v5  ;;  %v4397_v53 = vld [vmem:[%s7857_s4] sm:$0xf]  ;;  %v2059_v15 = vmax.f32 %v1963_v19, %v2005_v41  ;;  %v4439_v19 = vld [vmem:[%s7857_s4 + $0x58] sm:$0xf0] }
 0x21d   : > { %v1935_v2 = vmax.f32 %v1901_v30, 0.0  ;;  %v1613_v6 = vadd.f32 %v1612_v61, %v1524_v25  ;;  %v4398_v30 = vor.u32 %v4867_v33, %v4397_v53  ;;  %v1962_v25 = vmax.f32 %v1640_v40, %v1930_v0  ;;  %v4445_v0 = vld [vmem:[%s7857_s4 + $0x60] sm:$0xf]  ;;  %v4876_v40 = vld [vmem:[%s7857_s4 + $0x54] sm:$0xf] }
 0x21e   : > { %v4881_v53 = vld [vmem:[%s7857_s4 + $0x74] sm:$0xf0]  ;;  %v4442_v33 = vor.u32 %v4876_v40, %v4439_v19 }
 0x21f   : > { %v1967_v31 = vmax.f32 %v1645_v44, %v1935_v2  ;;  %v1646_v46 = vmax.f32 %v1613_v6, 0.0  ;;  %2185 = vmatmul.bf16.vlgmr.msrb.gmra.mxu1 %v4398_v30  ;;  %v1994_v2 = vrot.slane %v1962_v25, 1 }
 0x220   : > { %v1813_v57 = vpop.f32.mrf.mxu2 }
 0x221   : > { %v1814_v50 = vadd.f32 %v6711_v45, %v1813_v57  ;;  %v1965_v45 = vmax.f32 %v1643_v58, %v1933_v12  ;;  %v1999_v47 = vrot.slane %v1967_v31, 1  ;;  %v2006_v62 = vsel %vm562_vm0, %v1994_v2, %v1995_v52  ;;  %v4413_v12 = vld [vmem:[%s7857_s4 + $0x20] sm:$0xf] }
 0x222   : > { %v2007_v61 = vsel %vm562_vm0, %v1993_v26, %v1994_v2  ;;  %v2058_v56 = vmax.f32 %v1962_v25, %v2006_v62  ;;  %v4399_v26 = vld [vmem:[%s7857_s4 + $0x8] sm:$0xf0]  ;;  %v4429_v58 = vld [vmem:[%s7857_s4 + $0x40] sm:$0xf] }
 0x223   : > { %v1903_v21 = vadd.f32 %v1902_v23, %v1814_v50  ;;  %v1997_v9 = vrot.slane %v1965_v45, 1  ;;  %v2002_v22 = vsel %vm562_vm0, %v1998_v4, %v1999_v47  ;;  %v2057_v44 = vmax.f32 %v6716_v14, %v2007_v61  ;;  %v4405_v50 = vld [vmem:[%s7857_s4 + $0x10] sm:$0xf]  ;;  %v4866_v14 = vld [vmem:[%s7857_s4 + $0x4] sm:$0xf] }
 0x224   : > { %v2062_v42 = vmax.f32 %v1966_v37, %v2002_v22  ;;  %v4406_v16 = vor.u32 %v4869_v59, %v4405_v50  ;;  %v4402_v23 = vor.u32 %v4866_v14, %v4399_v26  ;;  %v4872_v37 = vld [vmem:[%s7857_s4 + $0x34] sm:$0xf]  ;;  %v4447_v22 = vld [vmem:[%s7857_s4 + $0x68] sm:$0xf0] }
 0x225   : > { %v1936_v38 = vmax.f32 %v1903_v21, 0.0  ;;  %v2003_v36 = vsel %vm562_vm0, %v1997_v9, %v1998_v4  ;;  %v2004_v11 = vsel %vm562_vm0, %v1996_v49, %v1997_v9  ;;  %v2093_v6 = vpack.c.bf16 %v2058_v56, %v2057_v44  ;;  %v4453_v9 = vld [vmem:[%s7857_s4 + $0x70] sm:$0xf] }
 0x226   : > { %v2060_v3 = vmax.f32 %v1964_v43, %v2004_v11  ;;  %v4426_v18 = vor.u32 %v4872_v37, %v4423_v24 }
 0x227   : > { %v1968_v63 = vmax.f32 %v1646_v46, %v1936_v38  ;;  %v4418_v46 = vor.u32 %v4870_v10, %v4415_v17  ;;  %v4430_v38 = vor.u32 %v4875_v35, %v4429_v58 }
 0x228   : > { %v2094_v57 = vpack.c.bf16 %v2060_v3, %v2059_v15 }
 0x229   : > { %v2000_v51 = vrot.slane %v1968_v63, 1 }
 0x22b   : > { %v2001_v29 = vsel %vm562_vm0, %v1999_v47, %v2000_v51  ;;  %v2032_v5 = vsel %vm562_vm0, %v2000_v51, %v1969_v54  ;;  %v2061_v54 = vmax.f32 %v1965_v45, %v2003_v36  ;;  %v4877_v45 = vld [vmem:[%s7857_s4 + $0x54] sm:$0xf0]  ;;  %v4879_v51 = vld [vmem:[%s7857_s4 + $0x64] sm:$0xf0]  ;;  %v4455_v36 = vld [vmem:[%s7857_s4 + $0x78] sm:$0xf0] }
 0x22c   : > { %v2063_v13 = vmax.f32 %v1967_v31, %v2001_v29  ;;  %v2064_v60 = vmax.f32 %v1968_v63, %v2032_v5  ;;  %v4873_v31 = vld [vmem:[%s7857_s4 + $0x34] sm:$0xf0]  ;;  %v4438_v47 = vor.u32 %v4877_v45, %v4437_v39  ;;  %v4874_v63 = vld [vmem:[%s7857_s4 + $0x44] sm:$0xf]  ;;  %v4446_v43 = vor.u32 %v4879_v51, %v4445_v0 }
 0x22d   : > { %v2095_v27 = vpack.c.bf16 %v2062_v42, %v2061_v54  ;;  %v4434_v4 = vor.u32 %v4874_v63, %v4431_v34  ;;  %v4454_v29 = vor.u32 %v4881_v53, %v4453_v9  ;;  %v4878_v5 = vld [vmem:[%s7857_s4 + $0x64] sm:$0xf] }
 0x22e   : > { %v2096_v20 = vpack.c.bf16 %v2064_v60, %v2063_v13  ;;  %v4450_v30 = vor.u32 %v4878_v5, %v4447_v22  ;;  %v4880_v60 = vld [vmem:[%s7857_s4 + $0x74] sm:$0xf] }
 0x22f   : > { %2190 = vmatmul.bf16.gmra.mxu1 %v4406_v16  ;;  %v4458_v49 = vor.u32 %v4880_v60, %v4455_v36 }
 0x230   : > { %2226 = vmatpush.bf16.msrb.mxu3 %v2096_v20 }
 0x234   : > { %2227 = vmatpush.bf16.msrb.mxu3 %v2095_v27 }
 0x238   : > { %2228 = vmatpush.bf16.msrb.mxu3 %v2094_v57 }
 0x23c   : > { %2229 = vmatpush.bf16.msrb.mxu3 %v2093_v6 }
 0x240   : > { %2230 = vmatpush.bf16.msrb.mxu3 %v6725_v28  ;;  %v4871_v28 = vld [vmem:[%s7857_s4 + $0x24] sm:$0xf0] }
 0x244   : > { %2231 = vmatpush.bf16.msrb.mxu3 %v6706_v55  ;;  %v4414_v55 = vor.u32 %v4871_v28, %v4413_v12 }
 0x246   : > { %2195 = vmatmul.bf16.gmra.mxu1 %v4414_v55 }
 0x248   : > { %2232 = vmatpush.bf16.msrb.mxu3 %v6692_v7  ;;  %v4868_v7 = vld [vmem:[%s7857_s4 + $0x14] sm:$0xf] }
 0x249   : > { %v4410_v21 = vor.u32 %v4868_v7, %v4407_v8 }
 0x24c   : > { %2233 = vmatpush.bf16.msrb.mxu3 %v6678_v48  ;;  %v4422_v48 = vor.u32 %v4873_v31, %v4421_v32 }
 0x24f   : > { %2234 = vmatmul.bf16.vlgmr.msrb.gmra.mxu3 %v4402_v23 }
 0x256   : > { %2200 = vmatmul.bf16.gmra.mxu1 %v4422_v48 }
 0x25f   : > { %2239 = vmatmul.bf16.gmra.mxu3 %v4410_v21 }
 0x266   : > { %2205 = vmatmul.bf16.gmra.mxu1 %v4430_v38 }
 0x26f   : > { %2244 = vmatmul.bf16.gmra.mxu3 %v4418_v46 }
 0x276   : > { %2210 = vmatmul.bf16.gmra.mxu1 %v4438_v47 }
 0x27f   : > { %2249 = vmatmul.bf16.gmra.mxu3 %v4426_v18 }
 0x286   : > { %2215 = vmatmul.bf16.gmra.mxu1 %v4446_v43 }
 0x28f   : > { %2254 = vmatmul.bf16.gmra.mxu3 %v4434_v4 }
 0x296   : > { %2220 = vmatmul.bf16.gmra.mxu1 %v4454_v29 }
 0x29c   : > { %v2186_v13 = vpop.f32.mrf.mxu1 }
 0x29f   : > { %2259 = vmatmul.bf16.gmra.mxu3 %v4442_v33 }
 0x2a4   : > { %v2188_v25 = vpop.f32.mrf.mxu1 }
 0x2ac   : > { %v2191_v20 = vpop.f32.mrf.mxu1 }
 0x2af   : > { %2264 = vmatmul.bf16.gmra.mxu3 %v4450_v30 }
 0x2b4   : > { %v2193_v52 = vpop.f32.mrf.mxu1 }
 0x2bf   : > { %2269 = vmatmul.bf16.gmra.mxu3 %v4458_v49 }
 0x2c3   : > { %v2196_v54 = vpop.f32.mrf.mxu1 }
 0x2cb   : > { %v2198_v26 = vpop.f32.mrf.mxu1 }
 0x2d2   : > { %v2235_v42 = vpop.f32.mrf.mxu3 }
 0x2d3   : > { %v6867_v2 = vadd.f32 %v2235_v42, %v2186_v13  ;;  %v2201_v38 = vpop.f32.mrf.mxu1 }
 0x2d5   : > { %v2307_v57 = vrot.slane %v6867_v2, 2  ;;  %v2275_v56 = vrot.slane %v6867_v2, 1  ;;  %v2339_v59 = vrot.slane %v6867_v2, 3  ;;  %v2371_v10 = vrot.slane %v6867_v2, 4 }
 0x2da   : > { %v2237_v11 = vpop.f32.mrf.mxu3 }
 0x2db   : > { %v6865_v41 = vadd.f32 %v2237_v11, %v2188_v25  ;;  %v2203_v22 = vpop.f32.mrf.mxu1 }
 0x2dd   : > { %v2308_v3 = vrot.slane %v6865_v41, 2  ;;  %v2276_v62 = vrot.slane %v6865_v41, 1  ;;  %v2340_v61 = vrot.slane %v6865_v41, 3  ;;  %v2372_v48 = vrot.slane %v6865_v41, 4 }
 0x2df   : > { %v2337_v16 = vsel %vm627_vm2, %v2307_v57, %v2308_v3  ;;  %v2305_v14 = vsel %vm562_vm0, %v2275_v56, %v2276_v62  ;;  %v2369_v55 = vsel %vm692_vm1, %v2339_v59, %v2340_v61  ;;  %v2401_v35 = vsel %vm757_vm3, %v2371_v10, %v2372_v48 }
 0x2e2   : > { %v2240_v27 = vpop.f32.mrf.mxu3 }
 0x2e3   : > { %v6871_v15 = vadd.f32 %v2240_v27, %v2191_v20 }
 0x2e5   : > { %v2309_v44 = vrot.slane %v6871_v15, 2  ;;  %v2277_v6 = vrot.slane %v6871_v15, 1  ;;  %v2341_v50 = vrot.slane %v6871_v15, 3  ;;  %v2373_v31 = vrot.slane %v6871_v15, 4 }
 0x2e7   : > { %v2336_v12 = vsel %vm627_vm2, %v2308_v3, %v2309_v44  ;;  %v2304_v28 = vsel %vm562_vm0, %v2276_v62, %v2277_v6  ;;  %v2368_v23 = vsel %vm692_vm1, %v2340_v61, %v2341_v50  ;;  %v2400_v17 = vsel %vm757_vm3, %v2372_v48, %v2373_v31 }
 0x2e8   : > { %v5265_v7 = vpack.i.bf16 %v2336_v12, %v2337_v16  ;;  %v5260_v8 = vpack.i.bf16 %v2304_v28, %v2305_v14  ;;  %v5270_v32 = vpack.i.bf16 %v2368_v23, %v2369_v55  ;;  %v5275_v46 = vpack.i.bf16 %v2400_v17, %v2401_v35 }
 0x2ea   : > { %v2242_v21 = vpop.f32.mrf.mxu3  ;;  %5266 = vrot.lane.b32.xlu1 %v5265_v7, %s7884_s1  ;;  %5261 = vrot.lane.b32.xlu0 %v5260_v8, %s7878_s2 }
 0x2eb   : > { %5271 = vrot.lane.b32.xlu2 %v5270_v32, %s7880_s20  ;;  %v6906_v58 = vadd.f32 %v2242_v21, %v2193_v52 }
 0x2ed   : > { %v2278_v24 = vrot.slane %v6906_v58, 1  ;;  %v2342_v39 = vrot.slane %v6906_v58, 3  ;;  %v2310_v18 = vrot.slane %v6906_v58, 2  ;;  %v2374_v30 = vrot.slane %v6906_v58, 4 }
 0x2ef   : > { %v2303_v0 = vsel %vm562_vm0, %v2277_v6, %v2278_v24  ;;  %v2367_v51 = vsel %vm692_vm1, %v2341_v50, %v2342_v39  ;;  %v2335_v19 = vsel %vm627_vm2, %v2309_v44, %v2310_v18  ;;  %v2399_v36 = vsel %vm757_vm3, %v2373_v31, %v2374_v30 }
 0x2f2   : > { %v2245_v37 = vpop.f32.mrf.mxu3  ;;  %5276 = vrot.lane.b32.xlu0 %v5275_v46, %s7882_s26 }
 0x2f3   : > { %v6915_v45 = vadd.f32 %v2245_v37, %v2196_v54  ;;  %v2206_v54 = vpop.f32.mrf.mxu1 }
 0x2f5   : > { %v2279_v47 = vrot.slane %v6915_v45, 1  ;;  %v2343_v63 = vrot.slane %v6915_v45, 3  ;;  %v2311_v34 = vrot.slane %v6915_v45, 2  ;;  %v2375_v29 = vrot.slane %v6915_v45, 4 }
 0x2f7   : > { %v2302_v4 = vsel %vm562_vm0, %v2278_v24, %v2279_v47  ;;  %v2366_v43 = vsel %vm692_vm1, %v2342_v39, %v2343_v63  ;;  %v2334_v40 = vsel %vm627_vm2, %v2310_v18, %v2311_v34  ;;  %v2398_v13 = vsel %vm757_vm3, %v2374_v30, %v2375_v29 }
 0x2f8   : > { %v5280_v9 = vpack.i.bf16 %v2302_v4, %v2303_v0  ;;  %v5290_v53 = vpack.i.bf16 %v2366_v43, %v2367_v51  ;;  %v5285_v33 = vpack.i.bf16 %v2334_v40, %v2335_v19  ;;  %v5295_v49 = vpack.i.bf16 %v2398_v13, %v2399_v36 }
 0x2fa   : > { %v2247_v5 = vpop.f32.mrf.mxu3  ;;  %5281 = vrot.lane.b32.xlu1 %v5280_v9, %s7878_s2  ;;  %5291 = vrot.lane.b32.xlu0 %v5290_v53, %s7880_s20 }
 0x2fb   : > { %5286 = vrot.lane.b32.xlu2 %v5285_v33, %s7884_s1  ;;  %v6940_v60 = vadd.f32 %v2247_v5, %v2198_v26  ;;  %v2208_v32 = vpop.f32.mrf.mxu1 }
 0x2fd   : > { %v2312_v20 = vrot.slane %v6940_v60, 2  ;;  %v2344_v42 = vrot.slane %v6940_v60, 3  ;;  %v2280_v11 = vrot.slane %v6940_v60, 1  ;;  %v2376_v7 = vrot.slane %v6940_v60, 4 }
 0x2ff   : > { %v2333_v61 = vsel %vm627_vm2, %v2311_v34, %v2312_v20  ;;  %v2365_v44 = vsel %vm692_vm1, %v2343_v63, %v2344_v42  ;;  %v2301_v14 = vsel %vm562_vm0, %v2279_v47, %v2280_v11  ;;  %v2397_v21 = vsel %vm757_vm3, %v2375_v29, %v2376_v7 }
 0x302   : > { %v2250_v25 = vpop.f32.mrf.mxu3  ;;  %5296 = vrot.lane.b32.xlu1 %v5295_v49, %s7882_s26 }
 0x303   : > { %v6947_v52 = vadd.f32 %v2250_v25, %v2201_v38  ;;  %v2211_v19 = vpop.f32.mrf.mxu1 }
 0x305   : > { %v2313_v27 = vrot.slane %v6947_v52, 2  ;;  %v2345_v3 = vrot.slane %v6947_v52, 3  ;;  %v2281_v62 = vrot.slane %v6947_v52, 1  ;;  %v2377_v55 = vrot.slane %v6947_v52, 4 }
 0x307   : > { %v2332_v6 = vsel %vm627_vm2, %v2312_v20, %v2313_v27  ;;  %v2364_v50 = vsel %vm692_vm1, %v2344_v42, %v2345_v3  ;;  %v2300_v16 = vsel %vm562_vm0, %v2280_v11, %v2281_v62  ;;  %v2396_v31 = vsel %vm757_vm3, %v2376_v7, %v2377_v55  ;;  %v4889_v42 = vld [vmem:[%s7858_s5 + $0x38] sm:$0xff] }
 0x308   : > { %v5305_v26 = vpack.i.bf16 %v2332_v6, %v2333_v61  ;;  %v5310_v12 = vpack.i.bf16 %v2364_v50, %v2365_v44  ;;  %v5300_v28 = vpack.i.bf16 %v2300_v16, %v2301_v14  ;;  %v5315_v48 = vpack.i.bf16 %v2396_v31, %v2397_v21  ;;  %3004 = vmatpush.bf16.msrb.mxu0 %v4889_v42  ;;  %v4896_v6 = vld [vmem:[%s7858_s5 + $0x70] sm:$0xff]  ;;  %v4887_v21 = vld [vmem:[%s7858_s5 + $0x28] sm:$0xff] }
 0x30a   : > { %v2252_v23 = vpop.f32.mrf.mxu3  ;;  %5306 = vrot.lane.b32.xlu0 %v5305_v26, %s7884_s1  ;;  %5311 = vrot.lane.b32.xlu1 %v5310_v12, %s7880_s20 }
 0x30b   : > { %5301 = vrot.lane.b32.xlu2 %v5300_v28, %s7878_s2  ;;  %v6970_v8 = vadd.f32 %v2252_v23, %v2203_v22  ;;  %v2213_v25 = vpop.f32.mrf.mxu1 }
 0x30d   : > { %v2314_v35 = vrot.slane %v6970_v8, 2  ;;  %v2282_v46 = vrot.slane %v6970_v8, 1  ;;  %v2346_v37 = vrot.slane %v6970_v8, 3  ;;  %v2378_v29 = vrot.slane %v6970_v8, 4 }
 0x30f   : > { %v2331_v47 = vsel %vm627_vm2, %v2313_v27, %v2314_v35  ;;  %v2299_v63 = vsel %vm562_vm0, %v2281_v62, %v2282_v46  ;;  %v2363_v4 = vsel %vm692_vm1, %v2345_v3, %v2346_v37  ;;  %v2395_v30 = vsel %vm757_vm3, %v2377_v55, %v2378_v29  ;;  %v4897_v27 = vld [vmem:[%s7858_s5 + $0x78] sm:$0xff]  ;;  %v4888_v3 = vld [vmem:[%s7858_s5 + $0x30] sm:$0xff] }
 0x310   : > { %3053 = vmatpush.bf16.msrb.mxu2 %v4897_v27  ;;  %3005 = vmatpush.bf16.msrb.mxu0 %v4888_v3 }
 0x312   : > { %v2255_v17 = vpop.f32.mrf.mxu3 }
 0x313   : > { %v6978_v38 = vadd.f32 %v2255_v17, %v2206_v54  ;;  %5316 = vrot.lane.b32.xlu2 %v5315_v48, %s7882_s26  ;;  %v4905_v48 = vld [vmem:[%s7858_s5 + $0xb8] sm:$0xff] }
 0x314   : > { %3054 = vmatpush.bf16.msrb.mxu2 %v4896_v6  ;;  %3006 = vmatpush.bf16.msrb.mxu0 %v4887_v21  ;;  %v4882_v21 = vld [vmem:[%s7858_s5] sm:$0xff] }
 0x315   : > { %v2315_v24 = vrot.slane %v6978_v38, 2  ;;  %v2283_v39 = vrot.slane %v6978_v38, 1  ;;  %v2347_v18 = vrot.slane %v6978_v38, 3  ;;  %v2379_v53 = vrot.slane %v6978_v38, 4  ;;  %3102 = vmatpush.bf16.msra.mxu1 %v4905_v48  ;;  %v4900_v48 = vld [vmem:[%s7858_s5 + $0x90] sm:$0xff] }
 0x317   : > { %v2330_v34 = vsel %vm627_vm2, %v2314_v35, %v2315_v24  ;;  %v2298_v0 = vsel %vm562_vm0, %v2282_v46, %v2283_v39  ;;  %v2362_v51 = vsel %vm692_vm1, %v2346_v37, %v2347_v18  ;;  %v2394_v5 = vsel %vm757_vm3, %v2378_v29, %v2379_v53  ;;  %v4895_v35 = vld [vmem:[%s7858_s5 + $0x68] sm:$0xff]  ;;  %v2216_v46 = vpop.f32.mrf.mxu1  ;;  %v4886_v37 = vld [vmem:[%s7858_s5 + $0x20] sm:$0xff] }
 0x318   : > { %v5325_v43 = vpack.i.bf16 %v2330_v34, %v2331_v47  ;;  %v5320_v40 = vpack.i.bf16 %v2298_v0, %v2299_v63  ;;  %v5330_v9 = vpack.i.bf16 %v2362_v51, %v2363_v4  ;;  %v5335_v13 = vpack.i.bf16 %v2394_v5, %v2395_v30  ;;  %3055 = vmatpush.bf16.msrb.mxu2 %v4895_v35 }
 0x319   : > { %3007 = vmatpush.bf16.msrb.mxu0 %v4886_v37  ;;  %v4890_v37 = vld [vmem:[%s7858_s5 + $0x40] sm:$0xff] }
 0x31a   : > { %v2257_v33 = vpop.f32.mrf.mxu3  ;;  %5326 = vrot.lane.b32.xlu1 %v5325_v43, %s7884_s1  ;;  %5321 = vrot.lane.b32.xlu0 %v5320_v40, %s7878_s2  ;;  %v4885_v43 = vld [vmem:[%s7858_s5 + $0x18] sm:$0xff]  ;;  %v4903_v40 = vld [vmem:[%s7858_s5 + $0xa8] sm:$0xff] }
 0x31b   : > { %5331 = vrot.lane.b32.xlu2 %v5330_v9, %s7880_s20  ;;  %v7004_v22 = vadd.f32 %v2257_v33, %v2208_v32  ;;  %v4884_v33 = vld [vmem:[%s7858_s5 + $0x10] sm:$0xff] }
 0x31d   : > { %v2284_v49 = vrot.slane %v7004_v22, 1  ;;  %v2348_v20 = vrot.slane %v7004_v22, 3  ;;  %v2316_v54 = vrot.slane %v7004_v22, 2  ;;  %v2380_v17 = vrot.slane %v7004_v22, 4  ;;  %3008 = vmatpush.bf16.msrb.mxu0 %v4885_v43 }
 0x31f   : > { %v2297_v50 = vsel %vm562_vm0, %v2283_v39, %v2284_v49  ;;  %v2361_v16 = vsel %vm692_vm1, %v2347_v18, %v2348_v20  ;;  %v2329_v28 = vsel %vm627_vm2, %v2315_v24, %v2316_v54  ;;  %v4904_v24 = vld [vmem:[%s7858_s5 + $0xb0] sm:$0xff]  ;;  %v4894_v18 = vld [vmem:[%s7858_s5 + $0x60] sm:$0xff]  ;;  %v2393_v63 = vsel %vm757_vm3, %v2379_v53, %v2380_v17 }
 0x320   : > { %3103 = vmatpush.bf16.msra.mxu1 %v4904_v24  ;;  %3056 = vmatpush.bf16.msrb.mxu2 %v4894_v18 }
 0x321   : > { %3009 = vmatpush.bf16.msrb.mxu0 %v4884_v33  ;;  %v4906_v33 = vld [vmem:[%s7858_s5 + $0xc0] sm:$0xff] }
 0x322   : > { %v2260_v36 = vpop.f32.mrf.mxu3  ;;  %5336 = vrot.lane.b32.xlu0 %v5335_v13, %s7882_s26  ;;  %v4902_v13 = vld [vmem:[%s7858_s5 + $0xa0] sm:$0xff] }
 0x323   : > { %v7014_v11 = vadd.f32 %v2260_v36, %v2211_v19  ;;  %v4893_v19 = vld [vmem:[%s7858_s5 + $0x58] sm:$0xff]  ;;  %v4892_v36 = vld [vmem:[%s7858_s5 + $0x50] sm:$0xff] }
 0x324   : > { %3104 = vmatpush.bf16.msra.mxu1 %v4903_v40  ;;  %3057 = vmatpush.bf16.msrb.mxu2 %v4893_v19 }
 0x325   : > { %v2285_v62 = vrot.slane %v7014_v11, 1  ;;  %v2349_v61 = vrot.slane %v7014_v11, 3  ;;  %v2317_v44 = vrot.slane %v7014_v11, 2  ;;  %v2381_v32 = vrot.slane %v7014_v11, 4 }
 0x327   : > { %v2296_v14 = vsel %vm562_vm0, %v2284_v49, %v2285_v62  ;;  %v2360_v26 = vsel %vm692_vm1, %v2348_v20, %v2349_v61  ;;  %v2328_v12 = vsel %vm627_vm2, %v2316_v54, %v2317_v44  ;;  %v2392_v39 = vsel %vm757_vm3, %v2380_v17, %v2381_v32 }
 0x328   : > { %v5340_v23 = vpack.i.bf16 %v2296_v14, %v2297_v50  ;;  %v5350_v55 = vpack.i.bf16 %v2360_v26, %v2361_v16  ;;  %v5345_v7 = vpack.i.bf16 %v2328_v12, %v2329_v28  ;;  %v5355_v34 = vpack.i.bf16 %v2392_v39, %v2393_v63  ;;  %3105 = vmatpush.bf16.msra.mxu1 %v4902_v13  ;;  %v4883_v14 = vld [vmem:[%s7858_s5 + $0x8] sm:$0xff]  ;;  %v2779_v12 = vld [vmem:[%s7858_s5 + $0xd0] sm:$0x3] }
 0x329   : > { %3058 = vmatpush.bf16.msrb.mxu2 %v4892_v36  ;;  %v4891_v26 = vld [vmem:[%s7858_s5 + $0x48] sm:$0xff]  ;;  %3010 = vmatpush.bf16.msrb.mxu0 %v4883_v14 }
 0x32a   : > { %v2262_v31 = vpop.f32.mrf.mxu3  ;;  %5341 = vrot.lane.b32.xlu1 %v5340_v23, %s7878_s2  ;;  %5351 = vrot.lane.b32.xlu0 %v5350_v55, %s7880_s20  ;;  %s7903_s20 = smov 84   ;;  %v2921_v23 = vunpack.c.l.b16 %v2779_v12  ;;  %s4212_s2 = scalar_lea.hbm %s7868_s15, %s4843_s24 }
 0x32b   : > { %5346 = vrot.lane.b32.xlu2 %v5345_v7, %s7884_s1  ;;  %v7070_v47 = vadd.f32 %v2262_v31, %v2213_v25  ;;  %v2218_v25 = vpop.f32.mrf.mxu1 }
 0x32c   : > { %v2948_v31 = vpack.c.b16 %v2921_v23, %v2921_v23 }
 0x32d   : > { %v2318_v51 = vrot.slane %v7070_v47, 2  ;;  %v2350_v4 = vrot.slane %v7070_v47, 3  ;;  %v2286_v53 = vrot.slane %v7070_v47, 1  ;;  %v2382_v28 = vrot.slane %v7070_v47, 4  ;;  %3059 = vmatpush.bf16.msrb.mxu2 %v4891_v26  ;;  %3011 = vmatpush.bf16.msrb.mxu0 %v4882_v21 }
 0x32f   : > { %v2327_v49 = vsel %vm627_vm2, %v2317_v44, %v2318_v51  ;;  %v2359_v20 = vsel %vm692_vm1, %v2349_v61, %v2350_v4  ;;  %v2295_v3 = vsel %vm562_vm0, %v2285_v62, %v2286_v53  ;;  %v4901_v62 = vld [vmem:[%s7858_s5 + $0x98] sm:$0xff]  ;;  %v2391_v35 = vsel %vm757_vm3, %v2381_v32, %v2382_v28  ;;  %v4907_v32 = vld [vmem:[%s7858_s5 + $0xc8] sm:$0xff] }
 0x330   : > { %3106 = vmatpush.bf16.msra.mxu1 %v4901_v62 }
 0x331   : > { %3060 = vmatpush.bf16.msrb.mxu2 %v4890_v37 }
 0x332   : > { %v2265_v0 = vpop.f32.mrf.mxu3  ;;  %5356 = vrot.lane.b32.xlu1 %v5355_v34, %s7882_s26 }
 0x333   : > { %v7086_v9 = vadd.f32 %v2265_v0, %v2216_v46  ;;  %v2221_v17 = vpop.f32.mrf.mxu1  ;;  %v3002_v46 = vsel %vm3000_vm7, %v2948_v31, 0 }
 0x334   : > { %3156 = vmatpush.bf16.msra.mxu3 %v3002_v46  ;;  %3107 = vmatpush.bf16.msra.mxu1 %v4900_v48 }
 0x335   : > { %v2319_v29 = vrot.slane %v7086_v9, 2  ;;  %v2351_v5 = vrot.slane %v7086_v9, 3  ;;  %v2287_v30 = vrot.slane %v7086_v9, 1  ;;  %v2383_v16 = vrot.slane %v7086_v9, 4 }
 0x337   : > { %v2326_v42 = vsel %vm627_vm2, %v2318_v51, %v2319_v29  ;;  %v2358_v54 = vsel %vm692_vm1, %v2350_v4, %v2351_v5  ;;  %v2294_v27 = vsel %vm562_vm0, %v2286_v53, %v2287_v30  ;;  %v2390_v7 = vsel %vm757_vm3, %v2382_v28, %v2383_v16  ;;  %v4899_v51 = vld [vmem:[%s7858_s5 + $0x88] sm:$0xff] }
 0x338   : > { %v5365_v44 = vpack.i.bf16 %v2326_v42, %v2327_v49  ;;  %v5370_v6 = vpack.i.bf16 %v2358_v54, %v2359_v20  ;;  %v5360_v50 = vpack.i.bf16 %v2294_v27, %v2295_v3  ;;  %v5375_v24 = vpack.i.bf16 %v2390_v7, %v2391_v35  ;;  %3157 = vmatpush.bf16.msra.mxu3 %v4907_v32 }
 0x339   : > { %3108 = vmatpush.bf16.msra.mxu1 %v4899_v51 }
 0x33a   : > { %v2267_v61 = vpop.f32.mrf.mxu3  ;;  %5366 = vrot.lane.b32.xlu0 %v5365_v44, %s7884_s1  ;;  %5371 = vrot.lane.b32.xlu1 %v5370_v6, %s7902_s25  ;;  %s5497_s1 = smov 112  }
 0x33b   : > { %5361 = vrot.lane.b32.xlu2 %v5360_v50, %s7903_s20  ;;  %v7134_v55 = vadd.f32 %v2267_v61, %v2218_v25  ;;  %v2223_v3 = vpop.f32.mrf.mxu1 }
 0x33c   : > { %3158 = vmatpush.bf16.msra.mxu3 %v4906_v33 }
 0x33d   : > { %v2320_v18 = vrot.slane %v7134_v55, 2  ;;  %v2288_v63 = vrot.slane %v7134_v55, 1  ;;  %v2352_v0 = vrot.slane %v7134_v55, 3 }
 0x33f   : > { %v2325_v19 = vsel %vm627_vm2, %v2319_v29, %v2320_v18  ;;  %v2293_v53 = vsel %vm562_vm0, %v2287_v30, %v2288_v63  ;;  %v2357_v29 = vsel %vm692_vm1, %v2351_v5, %v2352_v0  ;;  %v4898_v30 = vld [vmem:[%s7858_s5 + $0x80] sm:$0xff]  ;;  %v2384_v5 = vrot.slane %v7134_v55, 4 }
 0x340   : > { %3109 = vmatpush.bf16.msra.mxu1 %v4898_v30 }
 0x341   : > { %v2389_v14 = vsel %vm757_vm3, %v2383_v16, %v2384_v5 }
 0x342   : > { %v2270_v39 = vpop.f32.mrf.mxu3 }
 0x343   : > { %v7159_v34 = vadd.f32 %v2270_v39, %v2221_v17  ;;  %5376 = vrot.lane.b32.xlu2 %v5375_v24, %s7904_s16 }
 0x345   : > { %v2321_v4 = vrot.slane %v7159_v34, 2  ;;  %v2289_v43 = vrot.slane %v7159_v34, 1  ;;  %v2353_v40 = vrot.slane %v7159_v34, 3  ;;  %v2385_v54 = vrot.slane %v7159_v34, 4  ;;  %v5272_v37 = vpop.permute.xlu2 %5271 }
 0x346   : > { %v5273_v51 = vunpack.i.l.bf16 %v5272_v37 }
 0x347   : > { %v2324_v13 = vsel %vm627_vm2, %v2320_v18, %v2321_v4  ;;  %v2292_v36 = vsel %vm562_vm0, %v2288_v63, %v2289_v43  ;;  %v2356_v49 = vsel %vm692_vm1, %v2352_v0, %v2353_v40  ;;  %v2388_v6 = vsel %vm757_vm3, %v2384_v5, %v2385_v54 }
 0x348   : > { %v5385_v25 = vpack.i.bf16 %v2324_v13, %v2325_v19  ;;  %v5380_v20 = vpack.i.bf16 %v2292_v36, %v2293_v53  ;;  %v5390_v42 = vpack.i.bf16 %v2356_v49, %v2357_v29  ;;  %v5395_v12 = vpack.i.bf16 %v2388_v6, %v2389_v14 }
 0x349   : > { %v5274_v0 = vunpack.i.h.bf16 %v5272_v37 }
 0x34a   : > { %v2272_v27 = vpop.f32.mrf.mxu3  ;;  %5386 = vrot.lane.b32.xlu1 %v5385_v25, %s7905_s23  ;;  %5381 = vrot.lane.b32.xlu0 %v5380_v20, %s7903_s20 }
 0x34b   : > { %v7192_v44 = vadd.f32 %v2272_v27, %v2223_v3  ;;  %5391 = vrot.lane.b32.xlu2 %v5390_v42, %s7902_s25 }
 0x34d   : > { %v2290_v50 = vrot.slane %v7192_v44, 1  ;;  %v2322_v61 = vrot.slane %v7192_v44, 2  ;;  %v2354_v16 = vrot.slane %v7192_v44, 3  ;;  %v2386_v21 = vrot.slane %v7192_v44, 4 }
 0x34f   : > { %v2291_v62 = vsel %vm562_vm0, %v2289_v43, %v2290_v50  ;;  %v2306_v26 = vsel %vm562_vm0, %v2290_v50, %v2275_v56  ;;  %v2323_v23 = vsel %vm627_vm2, %v2321_v4, %v2322_v61  ;;  %v2338_v7 = vsel %vm627_vm2, %v2322_v61, %v2307_v57 }
 0x350   : > { %v5400_v28 = vpack.i.bf16 %v2306_v26, %v2291_v62  ;;  %v5405_v31 = vpack.i.bf16 %v2338_v7, %v2323_v23  ;;  %v2355_v56 = vsel %vm692_vm1, %v2353_v40, %v2354_v16  ;;  %v2370_v48 = vsel %vm692_vm1, %v2354_v16, %v2339_v59 }
 0x351   : > { %v2387_v57 = vsel %vm757_vm3, %v2385_v54, %v2386_v21  ;;  %v2402_v17 = vsel %vm757_vm3, %v2386_v21, %v2371_v10  ;;  %v5410_v35 = vpack.i.bf16 %v2370_v48, %v2355_v56 }
 0x352   : > { %5396 = vrot.lane.b32.xlu0 %v5395_v12, %s7904_s16  ;;  %5401 = vrot.lane.b32.xlu1 %v5400_v28, %s7903_s20  ;;  %v5415_v46 = vpack.i.bf16 %v2402_v17, %v2387_v57 }
 0x353   : > { %5406 = vrot.lane.b32.xlu2 %v5405_v31, %s7905_s23 }
 0x355   : > { %v5287_v20 = vpop.permute.xlu2 %5286 }
 0x356   : > { %v5289_v42 = vunpack.i.h.bf16 %v5287_v20  ;;  %v5288_v54 = vunpack.i.l.bf16 %v5287_v20 }
 0x35a   : > { %5411 = vrot.lane.b32.xlu0 %v5410_v35, %s7902_s25  ;;  %5416 = vrot.lane.b32.xlu1 %v5415_v46, %s7904_s16  ;;  %s4216_s25 = sshll.u32 %s4212_s2, 4  ;;  %s4217_s25 = int_to_ptr.hbm [resolvable:$true] %s4216_s25 }
 0x35b   : > { %s5440_s22 = sshra.s32 %s4217_s25, 4  ;;  %s5441_s22 = int_to_ptr.hbm [resolvable:$true] %s5440_s22 }
 0x35c   : > { %v5267_v24 = vpop.permute.xlu1 %5266  ;;  %v5262_v39 = vpop.permute.xlu0 %5261  ;;  %s5442_s3 = scalar_lea.hbm %s5441_s22, 8  ;;  %p5447_p0 = scmp.lt.s32.totalorder %s5441_s22, %s7868_s15 }
 0x35d   : > { %v5269_v59 = vunpack.i.h.bf16 %v5267_v24  ;;  %v5268_v18 = vunpack.i.l.bf16 %v5267_v24  ;;  %v5264_v63 = vunpack.i.h.bf16 %v5262_v39  ;;  %v5263_v32 = vunpack.i.l.bf16 %v5262_v39  ;;  %p5443_p11 = scmp.ne.s32.totalorder %s5441_s22, %s5442_s3  ;;  %p5448_p1 = scmp.lt.s32.totalorder %s5446_s27, %s5442_s3 }
 0x35f   : > { %v2661_v10 = vsel %vm2659_vm8, %v6865_v41, %v5264_v63  ;;  %v2678_v4 = vsel %vm2676_vm9, %v5264_v63, %v5269_v59  ;;  %v2660_v43 = vsel %vm2659_vm8, %v6867_v2, %v5263_v32  ;;  %v2677_v40 = vsel %vm2676_vm9, %v5263_v32, %v5268_v18  ;;  %p5444_p12 = pnand %p5443_p11, %p5616_p5  ;;  %p5449_p2 = por %p5448_p1, %p5447_p0 }
 0x360   : > { %v7241_v19 = vpack.c.bf16 %v2661_v10, %v2660_v43  ;;  %v2694_v53 = vsel %vm2693_vm10, %v2677_v40, %v5273_v51  ;;  %v2695_v33 = vsel %vm2693_vm10, %v2678_v4, %v5274_v0 }
 0x361   : > { %v7245_v13 = vpack.c.bf16 %v2695_v33, %v2694_v53  ;;  %p5445_p13 = pneg %p5444_p12 }
 0x362   : > { %3012 = vmatmul.bf16.vlgmr.msrb.gmra.mxu0 %v7241_v19 }
 0x363   : > { %3061 = vmatmul.bf16.vlgmr.msrb.gmra.mxu2 %v7245_v13  ;;  %p5450_p3 = pnand %p5449_p2, %p5445_p13 }
 0x364   : > { %v5277_v41 = vpop.permute.xlu0 %5276 }
 0x365   : > { %v5279_v36 = vunpack.i.h.bf16 %v5277_v41  ;;  %v5278_v49 = vunpack.i.l.bf16 %v5277_v41  ;;  %v5302_v21 = vpop.permute.xlu2 %5301 }
 0x366   : > { %v5304_v17 = vunpack.i.h.bf16 %v5302_v21  ;;  %v5303_v35 = vunpack.i.l.bf16 %v5302_v21 }
 0x367   : > { %v2712_v2 = vsel %vm2710_vm11, %v5274_v0, %v5279_v36  ;;  %v2711_v29 = vsel %vm2710_vm11, %v5273_v51, %v5278_v49  ;;  %v7251_v30 = vpack.c.bf16 %v5279_v36, %v5278_v49 }
 0x368   : > { %v7253_v25 = vpack.c.bf16 %v2712_v2, %v2711_v29  ;;  %v2664_v39 = vsel %vm2659_vm8, %v6915_v45, %v5303_v35  ;;  %v2665_v59 = vsel %vm2659_vm8, %v6940_v60, %v5304_v17 }
 0x369   : > { %4563 = vmatmul.msk.bf16.vlgmr.msra.gmra.mxu3 %vm2975_vm12, %v7251_v30  ;;  %v7287_v4 = vpack.c.bf16 %v2665_v59, %v2664_v39 }
 0x36a   : > { %3110 = vmatmul.bf16.vlgmr.msra.gmra.mxu1 %v7253_v25 }
 0x36c   : > { %v5282_v27 = vpop.permute.xlu1 %5281  ;;  %v5292_v3 = vpop.permute.xlu0 %5291 }
 0x36d   : > { %v5284_v5 = vunpack.i.h.bf16 %v5282_v27  ;;  %v5283_v6 = vunpack.i.l.bf16 %v5282_v27  ;;  %v5294_v50 = vunpack.i.h.bf16 %v5292_v3  ;;  %v5293_v61 = vunpack.i.l.bf16 %v5292_v3  ;;  %v5317_v53 = vpop.permute.xlu2 %5316 }
 0x36e   : > { %v5319_v45 = vunpack.i.h.bf16 %v5317_v53  ;;  %v5318_v60 = vunpack.i.l.bf16 %v5317_v53 }
 0x36f   : > { %v2680_v14 = vsel %vm2676_vm9, %v5284_v5, %v5289_v42  ;;  %v2679_v62 = vsel %vm2676_vm9, %v5283_v6, %v5288_v54  ;;  %v2662_v26 = vsel %vm2659_vm8, %v6871_v15, %v5283_v6  ;;  %v2663_v12 = vsel %vm2659_vm8, %v6906_v58, %v5284_v5 }
 0x370   : > { %v7264_v28 = vpack.c.bf16 %v2663_v12, %v2662_v26  ;;  %v2696_v23 = vsel %vm2693_vm10, %v2679_v62, %v5293_v61  ;;  %v2697_v7 = vsel %vm2693_vm10, %v2680_v14, %v5294_v50  ;;  %v7297_v49 = vpack.c.bf16 %v5319_v45, %v5318_v60 }
 0x371   : > { %v7268_v16 = vpack.c.bf16 %v2697_v7, %v2696_v23 }
 0x372   : > { %3017 = vmatmul.bf16.gmra.mxu0 %v7264_v28 }
 0x373   : > { %3066 = vmatmul.bf16.gmra.mxu2 %v7268_v16 }
 0x374   : > { %v5297_v31 = vpop.permute.xlu1 %5296 }
 0x375   : > { %v5299_v56 = vunpack.i.h.bf16 %v5297_v31  ;;  %v5298_v48 = vunpack.i.l.bf16 %v5297_v31  ;;  %v5332_v29 = vpop.permute.xlu2 %5331 }
 0x376   : > { %v5334_v6 = vunpack.i.h.bf16 %v5332_v29 }
 0x377   : > { %v7272_v15 = vpack.c.bf16 %v5299_v56, %v5298_v48  ;;  %v2713_v58 = vsel %vm2710_vm11, %v5293_v61, %v5298_v48  ;;  %v2714_v57 = vsel %vm2710_vm11, %v5294_v50, %v5299_v56  ;;  %v5333_v50 = vunpack.i.l.bf16 %v5332_v29 }
 0x378   : > { %v7276_v46 = vpack.c.bf16 %v2714_v57, %v2713_v58 }
 0x379   : > { %4564 = vmatmul.msk.bf16.gmra.mxu3 %vm2975_vm12, %v7272_v15 }
 0x37a   : > { %3115 = vmatmul.bf16.gmra.mxu1 %v7276_v46 }
 0x37c   : > { %v5307_v37 = vpop.permute.xlu0 %5306  ;;  %v5312_v24 = vpop.permute.xlu1 %5311 }
 0x37d   : > { %v5309_v18 = vunpack.i.h.bf16 %v5307_v37  ;;  %v5308_v63 = vunpack.i.l.bf16 %v5307_v37  ;;  %v5314_v32 = vunpack.i.h.bf16 %v5312_v24  ;;  %v5313_v0 = vunpack.i.l.bf16 %v5312_v24 }
 0x37f   : > { %v2681_v51 = vsel %vm2676_vm9, %v5303_v35, %v5308_v63  ;;  %v2682_v10 = vsel %vm2676_vm9, %v5304_v17, %v5309_v18  ;;  %v2715_v41 = vsel %vm2710_vm11, %v5313_v0, %v5318_v60  ;;  %v2716_v36 = vsel %vm2710_vm11, %v5314_v32, %v5319_v45 }
 0x380   : > { %v2698_v43 = vsel %vm2693_vm10, %v2681_v51, %v5313_v0  ;;  %v2699_v40 = vsel %vm2693_vm10, %v2682_v10, %v5314_v32  ;;  %v7299_v2 = vpack.c.bf16 %v2716_v36, %v2715_v41  ;;  %v4915_v41 = vld [vmem:[%s7859_s6 + $0x38] sm:$0xff] }
 0x381   : > { %v7291_v33 = vpack.c.bf16 %v2699_v40, %v2698_v43  ;;  %3431 = vmatpush.bf16.msra.mxu0 %v4915_v41 }
 0x382   : > { %3022 = vmatmul.bf16.gmra.mxu0 %v7287_v4 }
 0x383   : > { %3071 = vmatmul.bf16.gmra.mxu2 %v7291_v33 }
 0x385   : > { %v5347_v17 = vpop.permute.xlu2 %5346 }
 0x386   : > { %v5349_v35 = vunpack.i.h.bf16 %v5347_v17  ;;  %v5348_v37 = vunpack.i.l.bf16 %v5347_v17 }
 0x389   : > { %4565 = vmatmul.msk.bf16.gmra.mxu3 %vm2975_vm12, %v7297_v49 }
 0x38a   : > { %3120 = vmatmul.bf16.gmra.mxu1 %v7299_v2 }
 0x38c   : > { %v5327_v20 = vpop.permute.xlu1 %5326  ;;  %v5322_v42 = vpop.permute.xlu0 %5321 }
 0x38d   : > { %v5329_v54 = vunpack.i.h.bf16 %v5327_v20  ;;  %v5328_v27 = vunpack.i.l.bf16 %v5327_v20  ;;  %v5324_v3 = vunpack.i.h.bf16 %v5322_v42  ;;  %v5323_v5 = vunpack.i.l.bf16 %v5322_v42 }
 0x38f   : > { %v2684_v61 = vsel %vm2676_vm9, %v5324_v3, %v5329_v54  ;;  %v2683_v14 = vsel %vm2676_vm9, %v5323_v5, %v5328_v27  ;;  %v2666_v62 = vsel %vm2659_vm8, %v6947_v52, %v5323_v5  ;;  %v2667_v26 = vsel %vm2659_vm8, %v6970_v8, %v5324_v3  ;;  %v4914_v3 = vld [vmem:[%s7859_s6 + $0x30] sm:$0xff] }
 0x390   : > { %v7310_v12 = vpack.c.bf16 %v2667_v26, %v2666_v62  ;;  %v2700_v23 = vsel %vm2693_vm10, %v2683_v14, %v5333_v50  ;;  %v2701_v7 = vsel %vm2693_vm10, %v2684_v61, %v5334_v6  ;;  %v4922_v5 = vld [vmem:[%s7859_s6 + $0x70] sm:$0xff]  ;;  %3432 = vmatpush.bf16.msra.mxu0 %v4914_v3  ;;  %v4913_v14 = vld [vmem:[%s7859_s6 + $0x28] sm:$0xff]  ;;  %v4931_v62 = vld [vmem:[%s7859_s6 + $0xb8] sm:$0xff] }
 0x391   : > { %v7314_v31 = vpack.c.bf16 %v2701_v7, %v2700_v23  ;;  %v4921_v26 = vld [vmem:[%s7859_s6 + $0x68] sm:$0xff]  ;;  %3529 = vmatpush.bf16.msrb.mxu1 %v4931_v62 }
 0x392   : > { %3027 = vmatmul.bf16.gmra.mxu0 %v7310_v12  ;;  %v4909_v3 = vld [vmem:[%s7859_s6 + $0x8] sm:$0xff] }
 0x393   : > { %3076 = vmatmul.bf16.gmra.mxu2 %v7314_v31 }
 0x394   : > { %v5337_v21 = vpop.permute.xlu0 %5336  ;;  %3433 = vmatpush.bf16.msra.mxu0 %v4913_v14 }
 0x395   : > { %v5339_v56 = vunpack.i.h.bf16 %v5337_v21  ;;  %v5338_v48 = vunpack.i.l.bf16 %v5337_v21  ;;  %v5362_v36 = vpop.permute.xlu2 %5361 }
 0x397   : > { %v7318_v58 = vpack.c.bf16 %v5339_v56, %v5338_v48  ;;  %v2717_v52 = vsel %vm2710_vm11, %v5333_v50, %v5338_v48  ;;  %v2718_v8 = vsel %vm2710_vm11, %v5334_v6, %v5339_v56  ;;  %v5364_v6 = vunpack.i.h.bf16 %v5362_v36 }
 0x398   : > { %v7322_v57 = vpack.c.bf16 %v2718_v8, %v2717_v52  ;;  %v5363_v50 = vunpack.i.l.bf16 %v5362_v36 }
 0x399   : > { %4566 = vmatmul.msk.bf16.gmra.mxu3 %vm2975_vm12, %v7318_v58  ;;  %v2671_v56 = vsel %vm2659_vm8, %v7070_v47, %v5364_v6  ;;  %v4920_v47 = vld [vmem:[%s7859_s6 + $0x60] sm:$0xff] }
 0x39a   : > { %3125 = vmatmul.bf16.gmra.mxu1 %v7322_v57  ;;  %v2670_v21 = vsel %vm2659_vm8, %v7014_v11, %v5363_v50  ;;  %v4930_v11 = vld [vmem:[%s7859_s6 + $0xb0] sm:$0xff] }
 0x39b   : > { %3530 = vmatpush.bf16.msrb.mxu1 %v4930_v11  ;;  %v4926_v11 = vld [vmem:[%s7859_s6 + $0x90] sm:$0xff] }
 0x39c   : > { %v5342_v24 = vpop.permute.xlu1 %5341  ;;  %v5352_v39 = vpop.permute.xlu0 %5351 }
 0x39d   : > { %v5344_v59 = vunpack.i.h.bf16 %v5342_v24  ;;  %v5343_v18 = vunpack.i.l.bf16 %v5342_v24  ;;  %v5354_v63 = vunpack.i.h.bf16 %v5352_v39  ;;  %v5353_v32 = vunpack.i.l.bf16 %v5352_v39  ;;  %v4912_v24 = vld [vmem:[%s7859_s6 + $0x20] sm:$0xff]  ;;  %v5377_v39 = vpop.permute.xlu2 %5376 }
 0x39e   : > { %3434 = vmatpush.bf16.msra.mxu0 %v4912_v24  ;;  %v4908_v24 = vld [vmem:[%s7859_s6] sm:$0xff] }
 0x39f   : > { %v2686_v0 = vsel %vm2676_vm9, %v5344_v59, %v5349_v35  ;;  %v2685_v51 = vsel %vm2676_vm9, %v5343_v18, %v5348_v37  ;;  %v2668_v10 = vsel %vm2659_vm8, %v6978_v38, %v5343_v18  ;;  %v2669_v43 = vsel %vm2659_vm8, %v7004_v22, %v5344_v59  ;;  %v4923_v38 = vld [vmem:[%s7859_s6 + $0x78] sm:$0xff] }
 0x3a0   : > { %v7333_v40 = vpack.c.bf16 %v2669_v43, %v2668_v10  ;;  %v2702_v53 = vsel %vm2693_vm10, %v2685_v51, %v5353_v32  ;;  %v2703_v45 = vsel %vm2693_vm10, %v2686_v0, %v5354_v63  ;;  %3480 = vmatpush.bf16.msra.mxu2 %v4923_v38  ;;  %v7386_v59 = vpack.c.bf16 %v2671_v56, %v2670_v21  ;;  %v4911_v10 = vld [vmem:[%s7859_s6 + $0x18] sm:$0xff]  ;;  %v4929_v43 = vld [vmem:[%s7859_s6 + $0xa8] sm:$0xff]  ;;  %v4910_v38 = vld [vmem:[%s7859_s6 + $0x10] sm:$0xff] }
 0x3a1   : > { %v7337_v60 = vpack.c.bf16 %v2703_v45, %v2702_v53  ;;  %v5379_v0 = vunpack.i.h.bf16 %v5377_v39  ;;  %v5378_v51 = vunpack.i.l.bf16 %v5377_v39  ;;  %v4919_v53 = vld [vmem:[%s7859_s6 + $0x58] sm:$0xff]  ;;  %3531 = vmatpush.bf16.msrb.mxu1 %v4929_v43 }
 0x3a2   : > { %3032 = vmatmul.bf16.gmra.mxu0 %v7333_v40 }
 0x3a3   : > { %3081 = vmatmul.bf16.gmra.mxu2 %v7337_v60  ;;  %3435 = vmatpush.bf16.msra.mxu0 %v4911_v10  ;;  %v7411_v36 = vpack.c.bf16 %v5379_v0, %v5378_v51 }
 0x3a4   : > { %v5357_v22 = vpop.permute.xlu1 %5356  ;;  %3481 = vmatpush.bf16.msra.mxu2 %v4922_v5  ;;  %v4927_v5 = vld [vmem:[%s7859_s6 + $0x98] sm:$0xff] }
 0x3a5   : > { %v5359_v29 = vunpack.i.h.bf16 %v5357_v22  ;;  %v5358_v20 = vunpack.i.l.bf16 %v5357_v22  ;;  %v4918_v22 = vld [vmem:[%s7859_s6 + $0x50] sm:$0xff] }
 0x3a7   : > { %v7347_v42 = vpack.c.bf16 %v5359_v29, %v5358_v20  ;;  %v2719_v54 = vsel %vm2710_vm11, %v5353_v32, %v5358_v20  ;;  %v2720_v27 = vsel %vm2710_vm11, %v5354_v63, %v5359_v29  ;;  %v4928_v29 = vld [vmem:[%s7859_s6 + $0xa0] sm:$0xff]  ;;  %3436 = vmatpush.bf16.msra.mxu0 %v4910_v38 }
 0x3a8   : > { %v7357_v61 = vpack.c.bf16 %v2720_v27, %v2719_v54  ;;  %3482 = vmatpush.bf16.msra.mxu2 %v4921_v26  ;;  %v3268_v54 = vld [vmem:[%s7859_s6 + $0xd0] sm:$0x3]  ;;  %v5392_v27 = vpop.permute.xlu2 %5391  ;;  %3532 = vmatpush.bf16.msrb.mxu1 %v4928_v29 }
 0x3a9   : > { %4567 = vmatmul.msk.bf16.gmra.mxu3 %vm2975_vm12, %v7347_v42  ;;  %v5394_v56 = vunpack.i.h.bf16 %v5392_v27 }
 0x3aa   : > { %3130 = vmatmul.bf16.gmra.mxu1 %v7357_v61 }
 0x3ab   : > { %3437 = vmatpush.bf16.msra.mxu0 %v4909_v3 }
 0x3ac   : > { %v5367_v23 = vpop.permute.xlu0 %5366  ;;  %v5372_v7 = vpop.permute.xlu1 %5371  ;;  %3483 = vmatpush.bf16.msra.mxu2 %v4920_v47  ;;  %3533 = vmatpush.bf16.msrb.mxu1 %v4927_v5 }
 0x3ad   : > { %v5369_v48 = vunpack.i.h.bf16 %v5367_v23  ;;  %v5368_v52 = vunpack.i.l.bf16 %v5367_v23  ;;  %v5374_v8 = vunpack.i.h.bf16 %v5372_v7  ;;  %v5373_v17 = vunpack.i.l.bf16 %v5372_v7 }
 0x3af   : > { %v2687_v35 = vsel %vm2676_vm9, %v5363_v50, %v5368_v52  ;;  %v2688_v37 = vsel %vm2676_vm9, %v5364_v6, %v5369_v48  ;;  %v2721_v45 = vsel %vm2710_vm11, %v5373_v17, %v5378_v51  ;;  %v2722_v41 = vsel %vm2710_vm11, %v5374_v8, %v5379_v0  ;;  %v4917_v6 = vld [vmem:[%s7859_s6 + $0x48] sm:$0xff]  ;;  %3438 = vmatpush.bf16.msra.mxu0 %v4908_v24 }
 0x3b0   : > { %v2704_v18 = vsel %vm2693_vm10, %v2687_v35, %v5373_v17  ;;  %v2705_v63 = vsel %vm2693_vm10, %v2688_v37, %v5374_v8  ;;  %3484 = vmatpush.bf16.msra.mxu2 %v4919_v53  ;;  %v7416_v20 = vpack.c.bf16 %v2722_v41, %v2721_v45  ;;  %v3374_v50 = vunpack.c.l.b16 %v3268_v54  ;;  %v4933_v0 = vld [vmem:[%s7859_s6 + $0xc8] sm:$0xff]  ;;  %3534 = vmatpush.bf16.msrb.mxu1 %v4926_v11  ;;  %v4932_v41 = vld [vmem:[%s7859_s6 + $0xc0] sm:$0xff] }
 0x3b1   : > { %v7390_v32 = vpack.c.bf16 %v2705_v63, %v2704_v18  ;;  %v5393_v48 = vunpack.i.l.bf16 %v5392_v27  ;;  %v4925_v51 = vld [vmem:[%s7859_s6 + $0x88] sm:$0xff]  ;;  %v4924_v54 = vld [vmem:[%s7859_s6 + $0x80] sm:$0xff]  ;;  %v5407_v27 = vpop.permute.xlu2 %5406 }
 0x3b2   : > { %3037 = vmatmul.bf16.gmra.mxu0 %v7386_v59  ;;  %v3401_v52 = vpack.c.b16 %v3374_v50, %v3374_v50  ;;  %v5409_v50 = vunpack.i.h.bf16 %v5407_v27 }
 0x3b3   : > { %3086 = vmatmul.bf16.gmra.mxu2 %v7390_v32 }
 0x3b4   : > { %3485 = vmatpush.bf16.msra.mxu2 %v4918_v22  ;;  %3535 = vmatpush.bf16.msrb.mxu1 %v4925_v51 }
 0x3b8   : > { %3486 = vmatpush.bf16.msra.mxu2 %v4917_v6  ;;  %3536 = vmatpush.bf16.msrb.mxu1 %v4924_v54 }
 0x3b9   : > { %4568 = vmatmul.msk.bf16.gmra.mxu3 %vm2975_vm12, %v7411_v36 }
 0x3ba   : > { %3135 = vmatmul.bf16.gmra.mxu1 %v7416_v20 }
 0x3bc   : > { %v5387_v14 = vpop.permute.xlu1 %5386  ;;  %v5382_v62 = vpop.permute.xlu0 %5381 }
 0x3bd   : > { %v5389_v26 = vunpack.i.h.bf16 %v5387_v14  ;;  %v5388_v23 = vunpack.i.l.bf16 %v5387_v14  ;;  %v5384_v7 = vunpack.i.h.bf16 %v5382_v62  ;;  %v5383_v21 = vunpack.i.l.bf16 %v5382_v62 }
 0x3be   : > { %v5408_v14 = vunpack.i.l.bf16 %v5407_v27 }
 0x3bf   : > { %v2690_v8 = vsel %vm2676_vm9, %v5384_v7, %v5389_v26  ;;  %v2689_v17 = vsel %vm2676_vm9, %v5383_v21, %v5388_v23  ;;  %v2672_v35 = vsel %vm2659_vm8, %v7086_v9, %v5383_v21  ;;  %v2673_v37 = vsel %vm2659_vm8, %v7134_v55, %v5384_v7  ;;  %v4916_v55 = vld [vmem:[%s7859_s6 + $0x40] sm:$0xff] }
 0x3c0   : > { %v7445_v47 = vpack.c.bf16 %v2673_v37, %v2672_v35  ;;  %v2706_v39 = vsel %vm2693_vm10, %v2689_v17, %v5393_v48  ;;  %v2707_v18 = vsel %vm2693_vm10, %v2690_v8, %v5394_v56  ;;  %v3429_v9 = vsel %vm3000_vm7, %v3401_v52, 0  ;;  %3487 = vmatpush.bf16.msra.mxu2 %v4916_v55  ;;  %v7504_v55 = vld [vmem:[%s7860_s7] ss:$0 sm:$0xff] }
 0x3c1   : > { %v7453_v63 = vpack.c.bf16 %v2707_v18, %v2706_v39  ;;  %3583 = vmatpush.bf16.msrb.mxu3 %v3429_v9 }
 0x3c2   : > { %3042 = vmatmul.bf16.gmra.mxu0 %v7445_v47 }
 0x3c3   : > { %3091 = vmatmul.bf16.gmra.mxu2 %v7453_v63 }
 0x3c4   : > { %v5397_v10 = vpop.permute.xlu0 %5396  ;;  %v5402_v45 = vpop.permute.xlu1 %5401 }
 0x3c5   : > { %v5399_v43 = vunpack.i.h.bf16 %v5397_v10  ;;  %v5398_v53 = vunpack.i.l.bf16 %v5397_v10  ;;  %3584 = vmatpush.bf16.msrb.mxu3 %v4933_v0  ;;  %v5404_v3 = vunpack.i.h.bf16 %v5402_v45  ;;  %v5403_v5 = vunpack.i.l.bf16 %v5402_v45 }
 0x3c7   : > { %v7466_v38 = vpack.c.bf16 %v5399_v43, %v5398_v53  ;;  %v2723_v22 = vsel %vm2710_vm11, %v5393_v48, %v5398_v53  ;;  %v2724_v29 = vsel %vm2710_vm11, %v5394_v56, %v5399_v43  ;;  %v2674_v7 = vsel %vm2659_vm8, %v7159_v34, %v5403_v5 }
 0x3c8   : > { %v7475_v6 = vpack.c.bf16 %v2724_v29, %v2723_v22  ;;  %v2675_v21 = vsel %vm2659_vm8, %v7192_v44, %v5404_v3  ;;  %v2692_v56 = vsel %vm2676_vm9, %v5404_v3, %v5409_v50  ;;  %v2691_v48 = vsel %vm2676_vm9, %v5403_v5, %v5408_v14 }
 0x3c9   : > { %4569 = vmatmul.msk.bf16.gmra.mxu3 %vm2975_vm12, %v7466_v38  ;;  %v7486_v35 = vpack.c.bf16 %v2675_v21, %v2674_v7 }
 0x3ca   : > { %3585 = vmatpush.bf16.msrb.mxu3 %v4932_v41  ;;  %3140 = vmatmul.bf16.gmra.mxu1 %v7475_v6 }
 0x3cc   : > { %v5412_v62 = vpop.permute.xlu0 %5411  ;;  %v5417_v52 = vpop.permute.xlu1 %5416 }
 0x3cd   : > { %v5414_v26 = vunpack.i.h.bf16 %v5412_v62  ;;  %v5413_v23 = vunpack.i.l.bf16 %v5412_v62  ;;  %v5419_v24 = vunpack.i.h.bf16 %v5417_v52  ;;  %v5418_v11 = vunpack.i.l.bf16 %v5417_v52 }
 0x3cf   : > { %v2708_v8 = vsel %vm2693_vm10, %v2691_v48, %v5413_v23  ;;  %v2709_v17 = vsel %vm2693_vm10, %v2692_v56, %v5414_v26  ;;  %v2725_v34 = vsel %vm2710_vm11, %v5413_v23, %v5418_v11  ;;  %v2726_v44 = vsel %vm2710_vm11, %v5414_v26, %v5419_v24 }
 0x3d0   : > { %v7488_v37 = vpack.c.bf16 %v2709_v17, %v2708_v8  ;;  %v7494_v39 = vpack.c.bf16 %v5419_v24, %v5418_v11  ;;  %v7498_v18 = vpack.c.bf16 %v2726_v44, %v2725_v34 }
 0x3d2   : > { %3047 = vmatmul.bf16.gmra.mxu0 %v7486_v35 }
 0x3d3   : > { %3096 = vmatmul.bf16.gmra.mxu2 %v7488_v37 }
 0x3d9   : > { %4570 = vmatmul.msk.bf16.gmra.mxu3 %vm2975_vm12, %v7494_v39 }
 0x3da   : > { %3145 = vmatmul.bf16.gmra.mxu1 %v7498_v18 }
 0x3df   : > { %v3013_v9 = vpop.f32.mrf.mxu0 }
 0x3e0   : > { %v3014_v0 = vadd.f32 %v7504_v55, %v3013_v9 }
 0x3e2   : > { %3439 = vmatmul.bf16.vlgmr.msra.gmra.mxu0 %v7241_v19 }
 0x3e3   : > { %3488 = vmatmul.bf16.vlgmr.msra.gmra.mxu2 %v7245_v13 }
 0x3e6   : > { %v3062_v51 = vpop.f32.mrf.mxu2 }
 0x3e7   : > { %v3063_v10 = vadd.f32 %v3062_v51, %v3014_v0  ;;  %v3015_v43 = vpop.f32.mrf.mxu0  ;;  %v3111_v53 = vpop.f32.mrf.mxu1 }
 0x3e8   : > { %v3016_v22 = vadd.f32 %v7504_v55, %v3015_v43 }
 0x3e9   : > { %v3112_v45 = vadd.f32 %v3111_v53, %v3063_v10  ;;  %4675 = vmatmul.msk.bf16.vlgmr.msrb.gmra.mxu3 %vm2975_vm12, %v7251_v30 }
 0x3ea   : > { %3537 = vmatmul.bf16.vlgmr.msrb.gmra.mxu1 %v7253_v25 }
 0x3ec   : > { %v3160_v41 = vpop.f32.mrf.mxu3 }
 0x3ed   : > { %v7513_v29 = vadd.f32 %v3160_v41, %v3112_v45 }
 0x3ee   : > { %v3064_v19 = vpop.f32.mrf.mxu2 }
 0x3ef   : > { %v3065_v54 = vadd.f32 %v3064_v19, %v3016_v22  ;;  %v3018_v13 = vpop.f32.mrf.mxu0  ;;  %v3113_v27 = vpop.f32.mrf.mxu1 }
 0x3f0   : > { %v3019_v50 = vadd.f32 %v7504_v55, %v3018_v13 }
 0x3f1   : > { %v3114_v3 = vadd.f32 %v3113_v27, %v3065_v54 }
 0x3f2   : > { %3444 = vmatmul.bf16.gmra.mxu0 %v7264_v28 }
 0x3f3   : > { %3493 = vmatmul.bf16.gmra.mxu2 %v7268_v16 }
 0x3f4   : > { %v3162_v5 = vpop.f32.mrf.mxu3 }
 0x3f5   : > { %v7518_v30 = vadd.f32 %v3162_v5, %v3114_v3 }
 0x3f6   : > { %v3067_v25 = vpop.f32.mrf.mxu2 }
 0x3f7   : > { %v3068_v14 = vadd.f32 %v3067_v25, %v3019_v50  ;;  %v3020_v62 = vpop.f32.mrf.mxu0  ;;  %v3116_v26 = vpop.f32.mrf.mxu1 }
 0x3f8   : > { %v3021_v28 = vadd.f32 %v7504_v55, %v3020_v62 }
 0x3f9   : > { %v3117_v23 = vadd.f32 %v3116_v26, %v3068_v14  ;;  %4676 = vmatmul.msk.bf16.gmra.mxu3 %vm2975_vm12, %v7272_v15 }
 0x3fa   : > { %3542 = vmatmul.bf16.gmra.mxu1 %v7276_v46 }
 0x3fc   : > { %v3165_v7 = vpop.f32.mrf.mxu3 }
 0x3fd   : > { %v7524_v21 = vadd.f32 %v3165_v7, %v3117_v23 }
 0x3fe   : > { %v3069_v16 = vpop.f32.mrf.mxu2 }
 0x3ff   : > { %v3070_v56 = vadd.f32 %v3069_v16, %v3021_v28  ;;  %v3023_v48 = vpop.f32.mrf.mxu0  ;;  %v3118_v52 = vpop.f32.mrf.mxu1 }
 0x400   : > { %v3024_v24 = vadd.f32 %v7504_v55, %v3023_v48 }
 0x401   : > { %v3119_v8 = vadd.f32 %v3118_v52, %v3070_v56 }
 0x402   : > { %3449 = vmatmul.bf16.gmra.mxu0 %v7287_v4 }
 0x403   : > { %3498 = vmatmul.bf16.gmra.mxu2 %v7291_v33 }
 0x404   : > { %v3167_v17 = vpop.f32.mrf.mxu3 }
 0x405   : > { %v7529_v15 = vadd.f32 %v3167_v17, %v3119_v8 }
 0x406   : > { %v3072_v46 = vpop.f32.mrf.mxu2 }
 0x407   : > { %v3073_v11 = vadd.f32 %v3072_v46, %v3024_v24  ;;  %v3025_v34 = vpop.f32.mrf.mxu0  ;;  %v3121_v44 = vpop.f32.mrf.mxu1 }
 0x408   : > { %v3026_v4 = vadd.f32 %v7504_v55, %v3025_v34 }
 0x409   : > { %v3122_v9 = vadd.f32 %v3121_v44, %v3073_v11  ;;  %4677 = vmatmul.msk.bf16.gmra.mxu3 %vm2975_vm12, %v7297_v49 }
 0x40a   : > { %3547 = vmatmul.bf16.gmra.mxu1 %v7299_v2 }
 0x40c   : > { %v3170_v0 = vpop.f32.mrf.mxu3 }
 0x40d   : > { %v7535_v51 = vadd.f32 %v3170_v0, %v3122_v9 }
 0x40e   : > { %v3074_v33 = vpop.f32.mrf.mxu2 }
 0x40f   : > { %v3075_v10 = vadd.f32 %v3074_v33, %v3026_v4  ;;  %v3028_v43 = vpop.f32.mrf.mxu0  ;;  %v3123_v53 = vpop.f32.mrf.mxu1 }
 0x410   : > { %v3029_v22 = vadd.f32 %v7504_v55, %v3028_v43 }
 0x411   : > { %v3124_v45 = vadd.f32 %v3123_v53, %v3075_v10 }
 0x412   : > { %3454 = vmatmul.bf16.gmra.mxu0 %v7310_v12 }
 0x413   : > { %3503 = vmatmul.bf16.gmra.mxu2 %v7314_v31 }
 0x414   : > { %v3172_v41 = vpop.f32.mrf.mxu3 }
 0x415   : > { %v7540_v49 = vadd.f32 %v3172_v41, %v3124_v45 }
 0x416   : > { %v3077_v2 = vpop.f32.mrf.mxu2 }
 0x417   : > { %v3078_v19 = vadd.f32 %v3077_v2, %v3029_v22  ;;  %v3030_v54 = vpop.f32.mrf.mxu0  ;;  %v3126_v13 = vpop.f32.mrf.mxu1 }
 0x418   : > { %v3031_v12 = vadd.f32 %v7504_v55, %v3030_v54 }
 0x419   : > { %v3127_v27 = vadd.f32 %v3126_v13, %v3078_v19  ;;  %4678 = vmatmul.msk.bf16.gmra.mxu3 %vm2975_vm12, %v7318_v58 }
 0x41a   : > { %3552 = vmatmul.bf16.gmra.mxu1 %v7322_v57 }
 0x41c   : > { %v3175_v3 = vpop.f32.mrf.mxu3 }
 0x41d   : > { %v7546_v5 = vadd.f32 %v3175_v3, %v3127_v27 }
 0x41e   : > { %v3079_v31 = vpop.f32.mrf.mxu2 }
 0x41f   : > { %v3080_v50 = vadd.f32 %v3079_v31, %v3031_v12  ;;  %v3033_v25 = vpop.f32.mrf.mxu0  ;;  %v3128_v14 = vpop.f32.mrf.mxu1 }
 0x420   : > { %v3034_v23 = vadd.f32 %v7504_v55, %v3033_v25 }
 0x421   : > { %v3129_v62 = vadd.f32 %v3128_v14, %v3080_v50 }
 0x422   : > { %3459 = vmatmul.bf16.gmra.mxu0 %v7333_v40 }
 0x423   : > { %3508 = vmatmul.bf16.gmra.mxu2 %v7337_v60 }
 0x424   : > { %v3177_v26 = vpop.f32.mrf.mxu3 }
 0x425   : > { %v7551_v58 = vadd.f32 %v3177_v26, %v3129_v62 }
 0x426   : > { %v3082_v57 = vpop.f32.mrf.mxu2 }
 0x427   : > { %v3083_v7 = vadd.f32 %v3082_v57, %v3034_v23  ;;  %v3035_v28 = vpop.f32.mrf.mxu0  ;;  %v3131_v16 = vpop.f32.mrf.mxu1 }
 0x428   : > { %v3036_v40 = vadd.f32 %v7504_v55, %v3035_v28 }
 0x429   : > { %v3132_v56 = vadd.f32 %v3131_v16, %v3083_v7  ;;  %4679 = vmatmul.msk.bf16.gmra.mxu3 %vm2975_vm12, %v7347_v42 }
 0x42a   : > { %3557 = vmatmul.bf16.gmra.mxu1 %v7357_v61 }
 0x42c   : > { %v3180_v48 = vpop.f32.mrf.mxu3 }
 0x42d   : > { %v7557_v52 = vadd.f32 %v3180_v48, %v3132_v56 }
 0x42e   : > { %v3084_v60 = vpop.f32.mrf.mxu2 }
 0x42f   : > { %v3085_v8 = vadd.f32 %v3084_v60, %v3036_v40  ;;  %v3038_v17 = vpop.f32.mrf.mxu0  ;;  %v3133_v24 = vpop.f32.mrf.mxu1 }
 0x430   : > { %v3039_v34 = vadd.f32 %v7504_v55, %v3038_v17 }
 0x431   : > { %v3134_v46 = vadd.f32 %v3133_v24, %v3085_v8 }
 0x432   : > { %3464 = vmatmul.bf16.gmra.mxu0 %v7386_v59 }
 0x433   : > { %3513 = vmatmul.bf16.gmra.mxu2 %v7390_v32 }
 0x434   : > { %v3182_v11 = vpop.f32.mrf.mxu3 }
 0x435   : > { %v7562_v42 = vadd.f32 %v3182_v11, %v3134_v46 }
 0x436   : > { %v3087_v61 = vpop.f32.mrf.mxu2 }
 0x437   : > { %v3088_v44 = vadd.f32 %v3087_v61, %v3039_v34  ;;  %v3040_v9 = vpop.f32.mrf.mxu0  ;;  %v3136_v0 = vpop.f32.mrf.mxu1 }
 0x438   : > { %v3041_v59 = vadd.f32 %v7504_v55, %v3040_v9 }
 0x439   : > { %v3137_v4 = vadd.f32 %v3136_v0, %v3088_v44  ;;  %4680 = vmatmul.msk.bf16.gmra.mxu3 %vm2975_vm12, %v7411_v36 }
 0x43a   : > { %3562 = vmatmul.bf16.gmra.mxu1 %v7416_v20 }
 0x43c   : > { %v3185_v33 = vpop.f32.mrf.mxu3 }
 0x43d   : > { %v7568_v10 = vadd.f32 %v3185_v33, %v3137_v4  ;;  %v3200_v33 = vmax.f32 %v7513_v29, 0.0 }
 0x43e   : > { %v3089_v32 = vpop.f32.mrf.mxu2 }
 0x43f   : > { %v3090_v43 = vadd.f32 %v3089_v32, %v3041_v59  ;;  %v3043_v53 = vpop.f32.mrf.mxu0  ;;  %v3138_v45 = vpop.f32.mrf.mxu1 }
 0x440   : > { %v3044_v2 = vadd.f32 %v7504_v55, %v3043_v53 }
 0x441   : > { %v3139_v41 = vadd.f32 %v3138_v45, %v3090_v43 }
 0x442   : > { %3469 = vmatmul.bf16.gmra.mxu0 %v7445_v47 }
 0x443   : > { %3518 = vmatmul.bf16.gmra.mxu2 %v7453_v63 }
 0x444   : > { %v3187_v22 = vpop.f32.mrf.mxu3 }
 0x445   : > { %v7573_v36 = vadd.f32 %v3187_v22, %v3139_v41 }
 0x446   : > { %v3092_v20 = vpop.f32.mrf.mxu2 }
 0x447   : > { %v3093_v19 = vadd.f32 %v3092_v20, %v3044_v2  ;;  %v3045_v54 = vpop.f32.mrf.mxu0  ;;  %v3141_v13 = vpop.f32.mrf.mxu1 }
 0x448   : > { %v3046_v47 = vadd.f32 %v7504_v55, %v3045_v54  ;;  %v3201_v54 = vmax.f32 %v7518_v30, 0.0 }
 0x449   : > { %v3142_v27 = vadd.f32 %v3141_v13, %v3093_v19  ;;  %4681 = vmatmul.msk.bf16.gmra.mxu3 %vm2975_vm12, %v7466_v38 }
 0x44a   : > { %3567 = vmatmul.bf16.gmra.mxu1 %v7475_v6 }
 0x44c   : > { %v3190_v3 = vpop.f32.mrf.mxu3 }
 0x44d   : > { %v7579_v12 = vadd.f32 %v3190_v3, %v3142_v27 }
 0x44e   : > { %v3094_v63 = vpop.f32.mrf.mxu2 }
 0x44f   : > { %v3095_v31 = vadd.f32 %v3094_v63, %v3046_v47  ;;  %v3048_v50 = vpop.f32.mrf.mxu0  ;;  %v3143_v25 = vpop.f32.mrf.mxu1 }
 0x450   : > { %v3049_v26 = vadd.f32 %v7504_v55, %v3048_v50 }
 0x451   : > { %v3144_v14 = vadd.f32 %v3143_v25, %v3095_v31 }
 0x452   : > { %3474 = vmatmul.bf16.gmra.mxu0 %v7486_v35 }
 0x453   : > { %3523 = vmatmul.bf16.gmra.mxu2 %v7488_v37 }
 0x454   : > { %v3192_v62 = vpop.f32.mrf.mxu3 }
 0x455   : > { %v7584_v38 = vadd.f32 %v3192_v62, %v3144_v14 }
 0x456   : > { %v3097_v6 = vpop.f32.mrf.mxu2 }
 0x457   : > { %v3098_v23 = vadd.f32 %v3097_v6, %v3049_v26  ;;  %v3050_v57 = vpop.f32.mrf.mxu0  ;;  %v3146_v7 = vpop.f32.mrf.mxu1 }
 0x458   : > { %v3051_v35 = vadd.f32 %v7504_v55, %v3050_v57 }
 0x459   : > { %v3147_v28 = vadd.f32 %v3146_v7, %v3098_v23  ;;  %4682 = vmatmul.msk.bf16.gmra.mxu3 %vm2975_vm12, %v7494_v39  ;;  %v3202_v23 = vmax.f32 %v7524_v21, 0.0 }
 0x45a   : > { %3572 = vmatmul.bf16.gmra.mxu1 %v7498_v18 }
 0x45c   : > { %v3195_v16 = vpop.f32.mrf.mxu3 }
 0x45d   : > { %v7590_v56 = vadd.f32 %v3195_v16, %v3147_v28 }
 0x45e   : > { %v3099_v37 = vpop.f32.mrf.mxu2 }
 0x45f   : > { %v3100_v48 = vadd.f32 %v3099_v37, %v3051_v35  ;;  %v3440_v40 = vpop.f32.mrf.mxu0  ;;  %v3148_v60 = vpop.f32.mrf.mxu1 }
 0x460   : > { %v3441_v24 = vadd.f32 %v7504_v55, %v3440_v40 }
 0x461   : > { %v3149_v8 = vadd.f32 %v3148_v60, %v3100_v48 }
 0x464   : > { %v3197_v17 = vpop.f32.mrf.mxu3 }
 0x465   : > { %v7593_v46 = vadd.f32 %v3197_v17, %v3149_v8 }
 0x466   : > { %v3489_v11 = vpop.f32.mrf.mxu2 }
 0x467   : > { %v3490_v34 = vadd.f32 %v3489_v11, %v3441_v24  ;;  %v3442_v39 = vpop.f32.mrf.mxu0  ;;  %v3538_v61 = vpop.f32.mrf.mxu1 }
 0x468   : > { %v3443_v9 = vadd.f32 %v7504_v55, %v3442_v39 }
 0x469   : > { %v3539_v18 = vadd.f32 %v3538_v61, %v3490_v34  ;;  %v3203_v34 = vmax.f32 %v7529_v15, 0.0  ;;  %v3204_v15 = vmax.f32 %v7535_v51, 0.0 }
 0x46c   : > { %v3587_v44 = vpop.f32.mrf.mxu3 }
 0x46d   : > { %v3588_v0 = vadd.f32 %v3587_v44, %v3539_v18 }
 0x46e   : > { %v3491_v4 = vpop.f32.mrf.mxu2 }
 0x46f   : > { %v3627_v59 = vmax.f32 %v3588_v0, 0.0  ;;  %v3492_v32 = vadd.f32 %v3491_v4, %v3443_v9  ;;  %v3445_v43 = vpop.f32.mrf.mxu0  ;;  %v3540_v53 = vpop.f32.mrf.mxu1 }
 0x470   : > { %v3446_v2 = vadd.f32 %v7504_v55, %v3445_v43 }
 0x471   : > { %v7597_v45 = vmax.f32 %v3200_v33, %v3627_v59  ;;  %v3541_v41 = vadd.f32 %v3540_v53, %v3492_v32 }
 0x473   : > { %v3659_v31 = vrot.slane %v7597_v45, 1 }
 0x474   : > { %v3589_v22 = vpop.f32.mrf.mxu3 }
 0x475   : > { %v3590_v20 = vadd.f32 %v3589_v22, %v3541_v41 }
 0x476   : > { %v3494_v19 = vpop.f32.mrf.mxu2 }
 0x477   : > { %v3628_v13 = vmax.f32 %v3590_v20, 0.0  ;;  %v3495_v27 = vadd.f32 %v3494_v19, %v3446_v2  ;;  %v3447_v3 = vpop.f32.mrf.mxu0  ;;  %v3543_v47 = vpop.f32.mrf.mxu1 }
 0x478   : > { %v3448_v14 = vadd.f32 %v7504_v55, %v3447_v3 }
 0x479   : > { %v3644_v63 = vmax.f32 %v3201_v54, %v3628_v13  ;;  %v3544_v29 = vadd.f32 %v3543_v47, %v3495_v27 }
 0x47b   : > { %v3660_v50 = vrot.slane %v3644_v63, 1 }
 0x47c   : > { %v3592_v25 = vpop.f32.mrf.mxu3 }
 0x47d   : > { %v3593_v62 = vadd.f32 %v3592_v25, %v3544_v29  ;;  %v3689_v26 = vsel %vm562_vm0, %v3659_v31, %v3660_v50 }
 0x47e   : > { %v3496_v6 = vpop.f32.mrf.mxu2  ;;  %v3691_v30 = vmax.f32 %v7597_v45, %v3689_v26  ;;  %v3711_v45 = vld [vmem:[%s7861_s8 + $0x10] sm:$0xf] }
 0x47f   : > { %v3629_v57 = vmax.f32 %v3593_v62, 0.0  ;;  %v3497_v7 = vadd.f32 %v3496_v6, %v3448_v14  ;;  %v3450_v28 = vpop.f32.mrf.mxu0  ;;  %v3545_v16 = vpop.f32.mrf.mxu1  ;;  %v3205_v14 = vmax.f32 %v7540_v49, 0.0  ;;  %v3206_v49 = vmax.f32 %v7546_v5, 0.0 }
 0x480   : > { %v3451_v60 = vadd.f32 %v7504_v55, %v3450_v28 }
 0x481   : > { %v3645_v35 = vmax.f32 %v3202_v23, %v3629_v57  ;;  %v3546_v37 = vadd.f32 %v3545_v16, %v3497_v7 }
 0x483   : > { %v3661_v48 = vrot.slane %v3645_v35, 1 }
 0x484   : > { %v3594_v40 = vpop.f32.mrf.mxu3 }
 0x485   : > { %v3595_v8 = vadd.f32 %v3594_v40, %v3546_v37  ;;  %v3688_v17 = vsel %vm562_vm0, %v3660_v50, %v3661_v48 }
 0x486   : > { %v3499_v24 = vpop.f32.mrf.mxu2  ;;  %v3692_v11 = vmax.f32 %v3644_v63, %v3688_v17 }
 0x487   : > { %v3630_v39 = vmax.f32 %v3595_v8, 0.0  ;;  %v3500_v21 = vadd.f32 %v3499_v24, %v3451_v60  ;;  %v3452_v61 = vpop.f32.mrf.mxu0  ;;  %v3548_v18 = vpop.f32.mrf.mxu1 }
 0x488   : > { %v7613_v44 = vpack.c.bf16 %v3692_v11, %v3691_v30  ;;  %v3453_v59 = vadd.f32 %v7504_v55, %v3452_v61 }
 0x489   : > { %v3646_v9 = vmax.f32 %v3203_v34, %v3630_v39  ;;  %v3549_v0 = vadd.f32 %v3548_v18, %v3500_v21 }
 0x48b   : > { %v3662_v4 = vrot.slane %v3646_v9, 1 }
 0x48c   : > { %v3597_v33 = vpop.f32.mrf.mxu3 }
 0x48d   : > { %v3598_v32 = vadd.f32 %v3597_v33, %v3549_v0  ;;  %v3687_v43 = vsel %vm562_vm0, %v3661_v48, %v3662_v4  ;;  %v3207_v33 = vmax.f32 %v7551_v58, 0.0  ;;  %v3208_v58 = vmax.f32 %v7557_v52, 0.0 }
 0x48e   : > { %v3501_v53 = vpop.f32.mrf.mxu2  ;;  %v3693_v41 = vmax.f32 %v3645_v35, %v3687_v43 }
 0x48f   : > { %v3631_v22 = vmax.f32 %v3598_v32, 0.0  ;;  %v3502_v2 = vadd.f32 %v3501_v53, %v3453_v59  ;;  %v3455_v20 = vpop.f32.mrf.mxu0  ;;  %v3550_v19 = vpop.f32.mrf.mxu1 }
 0x490   : > { %v3456_v47 = vadd.f32 %v7504_v55, %v3455_v20 }
 0x491   : > { %v3647_v54 = vmax.f32 %v3204_v15, %v3631_v22  ;;  %v3551_v13 = vadd.f32 %v3550_v19, %v3502_v2 }
 0x493   : > { %v3663_v27 = vrot.slane %v3647_v54, 1 }
 0x494   : > { %v3599_v3 = vpop.f32.mrf.mxu3 }
 0x495   : > { %v3600_v63 = vadd.f32 %v3599_v3, %v3551_v13  ;;  %v3686_v29 = vsel %vm562_vm0, %v3662_v4, %v3663_v27 }
 0x496   : > { %v3504_v50 = vpop.f32.mrf.mxu2  ;;  %v3694_v25 = vmax.f32 %v3646_v9, %v3686_v29 }
 0x497   : > { %v3632_v62 = vmax.f32 %v3600_v63, 0.0  ;;  %v3505_v51 = vadd.f32 %v3504_v50, %v3456_v47  ;;  %v3457_v26 = vpop.f32.mrf.mxu0  ;;  %v3553_v6 = vpop.f32.mrf.mxu1 }
 0x498   : > { %v7623_v30 = vpack.c.bf16 %v3694_v25, %v3693_v41  ;;  %v3458_v16 = vadd.f32 %v7504_v55, %v3457_v26 }
 0x499   : > { %v3648_v23 = vmax.f32 %v3205_v14, %v3632_v62  ;;  %v3554_v57 = vadd.f32 %v3553_v6, %v3505_v51 }
 0x49b   : > { %v3664_v7 = vrot.slane %v3648_v23, 1 }
 0x49c   : > { %v3602_v28 = vpop.f32.mrf.mxu3 }
 0x49d   : > { %v3603_v35 = vadd.f32 %v3602_v28, %v3554_v57  ;;  %v3685_v37 = vsel %vm562_vm0, %v3663_v27, %v3664_v7 }
 0x49e   : > { %v3506_v48 = vpop.f32.mrf.mxu2  ;;  %v3695_v40 = vmax.f32 %v3647_v54, %v3685_v37 }
 0x49f   : > { %v3633_v60 = vmax.f32 %v3603_v35, 0.0  ;;  %v3507_v8 = vadd.f32 %v3506_v48, %v3458_v16  ;;  %v3460_v17 = vpop.f32.mrf.mxu0  ;;  %v3555_v24 = vpop.f32.mrf.mxu1 }
 0x4a0   : > { %v3461_v61 = vadd.f32 %v7504_v55, %v3460_v17 }
 0x4a1   : > { %v3649_v11 = vmax.f32 %v3206_v49, %v3633_v60  ;;  %v3556_v34 = vadd.f32 %v3555_v24, %v3507_v8 }
 0x4a3   : > { %v3665_v39 = vrot.slane %v3649_v11, 1 }
 0x4a4   : > { %v3604_v21 = vpop.f32.mrf.mxu3 }
 0x4a5   : > { %v3605_v18 = vadd.f32 %v3604_v21, %v3556_v34  ;;  %v3684_v9 = vsel %vm562_vm0, %v3664_v7, %v3665_v39  ;;  %v3209_v7 = vmax.f32 %v7562_v42, 0.0  ;;  %v3210_v42 = vmax.f32 %v7568_v10, 0.0 }
 0x4a6   : > { %v3509_v0 = vpop.f32.mrf.mxu2  ;;  %v3696_v4 = vmax.f32 %v3648_v23, %v3684_v9 }
 0x4a7   : > { %v3634_v59 = vmax.f32 %v3605_v18, 0.0  ;;  %v3510_v5 = vadd.f32 %v3509_v0, %v3461_v61  ;;  %v3462_v32 = vpop.f32.mrf.mxu0  ;;  %v3558_v43 = vpop.f32.mrf.mxu1 }
 0x4a8   : > { %v7633_v53 = vpack.c.bf16 %v3696_v4, %v3695_v40  ;;  %v3463_v20 = vadd.f32 %v7504_v55, %v3462_v32 }
 0x4a9   : > { %v3650_v41 = vmax.f32 %v3207_v33, %v3634_v59  ;;  %v3559_v15 = vadd.f32 %v3558_v43, %v3510_v5 }
 0x4ab   : > { %v3666_v22 = vrot.slane %v3650_v41, 1 }
 0x4ac   : > { %v3607_v2 = vpop.f32.mrf.mxu3 }
 0x4ad   : > { %v3608_v19 = vadd.f32 %v3607_v2, %v3559_v15  ;;  %v3683_v54 = vsel %vm562_vm0, %v3665_v39, %v3666_v22  ;;  %v3211_v15 = vmax.f32 %v7573_v36, 0.0 }
 0x4ae   : > { %v3511_v13 = vpop.f32.mrf.mxu2  ;;  %v3697_v27 = vmax.f32 %v3649_v11, %v3683_v54 }
 0x4af   : > { %v3635_v3 = vmax.f32 %v3608_v19, 0.0  ;;  %v3512_v47 = vadd.f32 %v3511_v13, %v3463_v20  ;;  %v3465_v63 = vpop.f32.mrf.mxu0  ;;  %v3560_v29 = vpop.f32.mrf.mxu1 }
 0x4b0   : > { %v3466_v51 = vadd.f32 %v7504_v55, %v3465_v63 }
 0x4b1   : > { %v3651_v50 = vmax.f32 %v3208_v58, %v3635_v3  ;;  %v3561_v14 = vadd.f32 %v3560_v29, %v3512_v47 }
 0x4b3   : > { %v3667_v25 = vrot.slane %v3651_v50, 1 }
 0x4b4   : > { %v3609_v62 = vpop.f32.mrf.mxu3 }
 0x4b5   : > { %v3610_v26 = vadd.f32 %v3609_v62, %v3561_v14  ;;  %v3682_v6 = vsel %vm562_vm0, %v3666_v22, %v3667_v25 }
 0x4b6   : > { %v3514_v23 = vpop.f32.mrf.mxu2  ;;  %v3698_v57 = vmax.f32 %v3650_v41, %v3682_v6 }
 0x4b7   : > { %v3636_v28 = vmax.f32 %v3610_v26, 0.0  ;;  %v3515_v52 = vadd.f32 %v3514_v23, %v3466_v51  ;;  %v3467_v16 = vpop.f32.mrf.mxu0  ;;  %v3563_v35 = vpop.f32.mrf.mxu1 }
 0x4b8   : > { %v7643_v37 = vpack.c.bf16 %v3698_v57, %v3697_v27  ;;  %v3468_v8 = vadd.f32 %v7504_v55, %v3467_v16 }
 0x4b9   : > { %v3652_v48 = vmax.f32 %v3209_v7, %v3636_v28  ;;  %v3564_v49 = vadd.f32 %v3563_v35, %v3515_v52 }
 0x4bb   : > { %v3668_v40 = vrot.slane %v3652_v48, 1 }
 0x4bc   : > { %v3612_v60 = vpop.f32.mrf.mxu3 }
 0x4bd   : > { %v3613_v17 = vadd.f32 %v3612_v60, %v3564_v49  ;;  %v3681_v24 = vsel %vm562_vm0, %v3667_v25, %v3668_v40  ;;  %v3212_v25 = vmax.f32 %v7579_v12, 0.0 }
 0x4be   : > { %v3516_v11 = vpop.f32.mrf.mxu2  ;;  %v3699_v34 = vmax.f32 %v3651_v50, %v3681_v24 }
 0x4bf   : > { %v3637_v39 = vmax.f32 %v3613_v17, 0.0  ;;  %v3517_v21 = vadd.f32 %v3516_v11, %v3468_v8  ;;  %v3470_v61 = vpop.f32.mrf.mxu0  ;;  %v3565_v18 = vpop.f32.mrf.mxu1 }
 0x4c0   : > { %v3471_v59 = vadd.f32 %v7504_v55, %v3470_v61 }
 0x4c1   : > { %v3653_v9 = vmax.f32 %v3210_v42, %v3637_v39  ;;  %v3566_v4 = vadd.f32 %v3565_v18, %v3517_v21 }
 0x4c3   : > { %v3669_v0 = vrot.slane %v3653_v9, 1 }
 0x4c4   : > { %v3614_v33 = vpop.f32.mrf.mxu3 }
 0x4c5   : > { %v3615_v5 = vadd.f32 %v3614_v33, %v3566_v4  ;;  %v3680_v32 = vsel %vm562_vm0, %v3668_v40, %v3669_v0 }
 0x4c6   : > { %v3519_v43 = vpop.f32.mrf.mxu2  ;;  %v3700_v41 = vmax.f32 %v3652_v48, %v3680_v32  ;;  %v3213_v48 = vmax.f32 %v7584_v38, 0.0 }
 0x4c7   : > { %v3638_v22 = vmax.f32 %v3615_v5, 0.0  ;;  %v3520_v10 = vadd.f32 %v3519_v43, %v3471_v59  ;;  %v3472_v2 = vpop.f32.mrf.mxu0  ;;  %v3568_v20 = vpop.f32.mrf.mxu1 }
 0x4c8   : > { %v3716_v19 = vpack.c.bf16 %v3700_v41, %v3699_v34  ;;  %v3473_v3 = vadd.f32 %v7504_v55, %v3472_v2 }
 0x4c9   : > { %v3654_v54 = vmax.f32 %v3211_v15, %v3638_v22  ;;  %v3569_v27 = vadd.f32 %v3568_v20, %v3520_v10  ;;  %v3215_v15 = vmax.f32 %v7593_v46, 0.0  ;;  %v4934_v46 = vld [vmem:[%s7861_s8] sm:$0xff] }
 0x4cb   : > { %v3670_v13 = vrot.slane %v3654_v54, 1 }
 0x4cc   : > { %v3617_v58 = vpop.f32.mrf.mxu3 }
 0x4cd   : > { %v3618_v47 = vadd.f32 %v3617_v58, %v3569_v27  ;;  %v3679_v63 = vsel %vm562_vm0, %v3669_v0, %v3670_v13 }
 0x4ce   : > { %v3521_v29 = vpop.f32.mrf.mxu2  ;;  %v3701_v50 = vmax.f32 %v3653_v9, %v3679_v63  ;;  %v3214_v9 = vmax.f32 %v7590_v56, 0.0  ;;  %v4939_v63 = vld [vmem:[%s7862_s9 + $0x18] sm:$0xff] }
 0x4cf   : > { %v3639_v36 = vmax.f32 %v3618_v47, 0.0  ;;  %v3522_v14 = vadd.f32 %v3521_v29, %v3473_v3  ;;  %v3475_v62 = vpop.f32.mrf.mxu0  ;;  %v3570_v51 = vpop.f32.mrf.mxu1  ;;  %v4940_v47 = vld [vmem:[%s7862_s9 + $0x20] sm:$0xff] }
 0x4d0   : > { %v3476_v7 = vadd.f32 %v7504_v55, %v3475_v62  ;;  %v4951_v62 = vld [vmem:[%s7862_s9 + $0x78] sm:$0xff] }
 0x4d1   : > { %v3655_v26 = vmax.f32 %v3212_v25, %v3639_v36  ;;  %v3571_v23 = vadd.f32 %v3570_v51, %v3522_v14  ;;  %v4937_v25 = vld [vmem:[%s7862_s9 + $0x8] sm:$0xff]  ;;  %v4936_v14 = vld [vmem:[%s7862_s9] sm:$0xff] }
 0x4d3   : > { %v3671_v6 = vrot.slane %v3655_v26, 1 }
 0x4d4   : > { %v3619_v57 = vpop.f32.mrf.mxu3 }
 0x4d5   : > { %v3620_v28 = vadd.f32 %v3619_v57, %v3571_v23  ;;  %v3678_v52 = vsel %vm562_vm0, %v3670_v13, %v3671_v6  ;;  %v4948_v57 = vld [vmem:[%s7862_s9 + $0x60] sm:$0xff] }
 0x4d6   : > { %v3524_v16 = vpop.f32.mrf.mxu2  ;;  %v3702_v35 = vmax.f32 %v3654_v54, %v3678_v52  ;;  %v4958_v52 = vld [vmem:[%s7862_s9 + $0xb0] sm:$0xff] }
 0x4d7   : > { %v3640_v40 = vmax.f32 %v3620_v28, 0.0  ;;  %v3525_v12 = vadd.f32 %v3524_v16, %v3476_v7  ;;  %v3573_v49 = vpop.f32.mrf.mxu1  ;;  %v3477_v17 = vpop.f32.mrf.mxu0  ;;  %v4947_v7 = vld [vmem:[%s7862_s9 + $0x58] sm:$0xff]  ;;  %v4946_v16 = vld [vmem:[%s7862_s9 + $0x50] sm:$0xff] }
 0x4d8   : > { %v3717_v60 = vpack.c.bf16 %v3702_v35, %v3701_v50  ;;  %v3478_v42 = vadd.f32 %v7504_v55, %v3477_v17  ;;  %v4938_v50 = vld [vmem:[%s7862_s9 + $0x10] sm:$0xff]  ;;  %v4959_v28 = vld [vmem:[%s7862_s9 + $0xb8] sm:$0xff]  ;;  %v4945_v35 = vld [vmem:[%s7862_s9 + $0x48] sm:$0xff] }
 0x4d9   : > { %v3656_v8 = vmax.f32 %v3213_v48, %v3640_v40  ;;  %v3574_v11 = vadd.f32 %v3573_v49, %v3525_v12  ;;  %v4957_v48 = vld [vmem:[%s7862_s9 + $0xa8] sm:$0xff]  ;;  %v4956_v40 = vld [vmem:[%s7862_s9 + $0xa0] sm:$0xff]  ;;  %v4955_v12 = vld [vmem:[%s7862_s9 + $0x98] sm:$0xff] }
 0x4db   : > { %v3672_v24 = vrot.slane %v3656_v8, 1 }
 0x4dc   : > { %v3622_v34 = vpop.f32.mrf.mxu3 }
 0x4dd   : > { %v3623_v39 = vadd.f32 %v3622_v34, %v3574_v11  ;;  %v3677_v21 = vsel %vm562_vm0, %v3671_v6, %v3672_v24  ;;  %v4949_v6 = vld [vmem:[%s7862_s9 + $0x68] sm:$0xff]  ;;  %v4944_v11 = vld [vmem:[%s7862_s9 + $0x40] sm:$0xff] }
 0x4de   : > { %v3526_v61 = vpop.f32.mrf.mxu2  ;;  %v3703_v18 = vmax.f32 %v3655_v26, %v3677_v21  ;;  %v4950_v26 = vld [vmem:[%s7862_s9 + $0x70] sm:$0xff]  ;;  %v4952_v34 = vld [vmem:[%s7862_s9 + $0x80] sm:$0xff] }
 0x4df   : > { %v3641_v38 = vmax.f32 %v3623_v39, 0.0  ;;  %v3527_v0 = vadd.f32 %v3526_v61, %v3478_v42  ;;  %v3575_v4 = vpop.f32.mrf.mxu1  ;;  %v4960_v42 = vld [vmem:[%s7862_s9 + $0xc0] sm:$0xff] }
 0x4e1   : > { %v3657_v33 = vmax.f32 %v3214_v9, %v3641_v38  ;;  %v3576_v5 = vadd.f32 %v3575_v4, %v3527_v0 }
 0x4e3   : > { %v3673_v59 = vrot.slane %v3657_v33, 1 }
 0x4e4   : > { %v3624_v32 = vpop.f32.mrf.mxu3 }
 0x4e5   : > { %v3625_v43 = vadd.f32 %v3624_v32, %v3576_v5  ;;  %v3676_v41 = vsel %vm562_vm0, %v3672_v24, %v3673_v59  ;;  %v4953_v24 = vld [vmem:[%s7862_s9 + $0x88] sm:$0xff] }
 0x4e6   : > { %v3704_v55 = vmax.f32 %v3656_v8, %v3676_v41  ;;  %v4954_v8 = vld [vmem:[%s7862_s9 + $0x90] sm:$0xff] }
 0x4e7   : > { %v3642_v22 = vmax.f32 %v3625_v43, 0.0  ;;  %v4967_v41 = vld [vmem:[%s7864_s11 + $0x30] sm:$0xff] }
 0x4e8   : > { %v3718_v10 = vpack.c.bf16 %v3704_v55, %v3703_v18 }
 0x4e9   : > { %v3658_v2 = vmax.f32 %v3215_v15, %v3642_v22  ;;  %v4966_v22 = vld [vmem:[%s7864_s11 + $0x28] sm:$0xff] }
 0x4eb   : > { %v3674_v20 = vrot.slane %v3658_v2, 1 }
 0x4ed   : > { %v3675_v56 = vsel %vm562_vm0, %v3673_v59, %v3674_v20  ;;  %v3690_v54 = vsel %vm562_vm0, %v3674_v20, %v3659_v31  ;;  %v3729_v31 = vunpack.c.l.b16 %v3711_v45  ;;  %v4059_v59 = vld [vmem:[%s7864_s11 + $0x38] sm:$0xf]  ;;  %v4963_v20 = vld [vmem:[%s7864_s11 + $0x10] sm:$0xff]  ;;  %v4972_v45 = vld [vmem:[%s7866_s13 + $0x20] sm:$0xff]  ;;  %vm4110_vm0 = vcmask 982016  }
 0x4ee   : > { %v3705_v13 = vmax.f32 %v3657_v33, %v3675_v56  ;;  %v3706_v27 = vmax.f32 %v3658_v2, %v3690_v54  ;;  %v4094_v5 = vunpack.c.l.b16 %v4059_v59  ;;  %v4964_v2 = vld [vmem:[%s7864_s11 + $0x18] sm:$0xff]  ;;  %v4962_v56 = vld [vmem:[%s7864_s11 + $0x8] sm:$0xff]  ;;  %v4961_v54 = vld [vmem:[%s7864_s11] sm:$0xff] }
 0x4f0   : > { %v3719_v58 = vpack.c.bf16 %v3706_v27, %v3705_v13  ;;  %v4102_v32 = vpack.c.b16 %v4094_v5, %v4094_v5  ;;  %v4142_v13 = vld [vmem:[%s7866_s13 + $0x28] sm:$0x3] }
 0x4f1   : > { %v4169_v27 = vunpack.c.l.b16 %v4142_v13 }
 0x4f2   : > { %3736 = vmatpush.bf16.msrb.mxu0 %v3719_v58  ;;  %v4116_v43 = vsel %vm4114_vm15, %v4102_v32, 0 }
 0x4f6   : > { %3737 = vmatpush.bf16.msrb.mxu0 %v3718_v10  ;;  %v4965_v10 = vld [vmem:[%s7864_s11 + $0x20] sm:$0xff] }
 0x4fa   : > { %3738 = vmatpush.bf16.msrb.mxu0 %v3717_v60 }
 0x4fe   : > { %3739 = vmatpush.bf16.msrb.mxu0 %v3716_v19  ;;  %v4941_v19 = vld [vmem:[%s7862_s9 + $0x28] sm:$0xff] }
 0x502   : > { %3740 = vmatpush.bf16.msrb.mxu0 %v7643_v37  ;;  %v4943_v37 = vld [vmem:[%s7862_s9 + $0x38] sm:$0xff] }
 0x503   : > { %3992 = vmatpush.bf16.msrb.mxu2 %v4943_v37  ;;  %v5422_v37 = vld [vmem:[%s7863_s10] ss:$0 sm:$0xff] }
 0x506   : > { %3741 = vmatpush.bf16.msrb.mxu0 %v7633_v53  ;;  %v3732_v53 = vpack.c.b16 %v3729_v31, %v3729_v31 }
 0x50a   : > { %3742 = vmatpush.bf16.msrb.mxu0 %v7623_v30 }
 0x50e   : > { %3743 = vmatpush.bf16.msrb.mxu0 %v7613_v44  ;;  %v4942_v44 = vld [vmem:[%s7862_s9 + $0x30] sm:$0xff] }
 0x50f   : > { %3993 = vmatpush.bf16.msrb.mxu2 %v4942_v44  ;;  %v4970_v44 = vld [vmem:[%s7866_s13 + $0x10] sm:$0xff] }
 0x511   : > { %3744 = vmatmul.bf16.vlgmr.msrb.gmra.mxu0 %v4934_v46  ;;  %v4175_v46 = vpack.c.b16 %v4169_v27, %v4169_v27 }
 0x512   : > { %4018 = vmatpush.bf16.msra.mxu0 %v4959_v28 }
 0x513   : > { %3994 = vmatpush.bf16.msrb.mxu2 %v4941_v19 }
 0x516   : > { %4019 = vmatpush.bf16.msra.mxu0 %v4958_v52  ;;  %v5424_v52 = vld [vmem:[%s7867_s14] ss:$0 sm:$0xff] }
 0x517   : > { %3995 = vmatpush.bf16.msrb.mxu2 %v4940_v47 }
 0x51a   : > { %4020 = vmatpush.bf16.msra.mxu0 %v4957_v48 }
 0x51b   : > { %3996 = vmatpush.bf16.msrb.mxu2 %v4939_v63 }
 0x51e   : > { %4021 = vmatpush.bf16.msra.mxu0 %v4956_v40 }
 0x51f   : > { %3997 = vmatpush.bf16.msrb.mxu2 %v4938_v50 }
 0x521   : > { %3749 = vmatmul.bf16.gmra.mxu0 %v4935_v1  ;;  %v4185_v1 = vsel %vm3000_vm7, %v4175_v46, 0 }
 0x522   : > { %4022 = vmatpush.bf16.msra.mxu0 %v4955_v12 }
 0x523   : > { %3998 = vmatpush.bf16.msrb.mxu2 %v4937_v25 }
 0x526   : > { %4023 = vmatpush.bf16.msra.mxu0 %v4954_v8 }
 0x527   : > { %3999 = vmatpush.bf16.msrb.mxu2 %v4936_v14 }
 0x52a   : > { %4024 = vmatpush.bf16.msra.mxu0 %v4953_v24 }
 0x52b   : > { %4005 = vmatpush.bf16.msra.mxu2 %v4951_v62  ;;  %v4969_v62 = vld [vmem:[%s7866_s13 + $0x8] sm:$0xff] }
 0x52e   : > { %4025 = vmatpush.bf16.msra.mxu0 %v4952_v34 }
 0x52f   : > { %4006 = vmatpush.bf16.msra.mxu2 %v4950_v26  ;;  %v5423_v26 = vld [vmem:[%s7865_s12] ss:$0 sm:$0xff] }
 0x531   : > { %3754 = vmatmul.bf16.gmra.mxu0 %v3732_v53  ;;  %v4971_v53 = vld [vmem:[%s7866_s13 + $0x18] sm:$0xff] }
 0x532   : > { %4118 = vmatpush.bf16.msrb.mxu0 %v4116_v43 }
 0x533   : > { %4007 = vmatpush.bf16.msra.mxu2 %v4949_v6 }
 0x536   : > { %4119 = vmatpush.bf16.msrb.mxu0 %v4967_v41 }
 0x537   : > { %4008 = vmatpush.bf16.msra.mxu2 %v4948_v57 }
 0x53a   : > { %4120 = vmatpush.bf16.msrb.mxu0 %v4966_v22 }
 0x53b   : > { %4009 = vmatpush.bf16.msra.mxu2 %v4947_v7 }
 0x53e   : > { %4121 = vmatpush.bf16.msrb.mxu0 %v4965_v10 }
 0x53f   : > { %4010 = vmatpush.bf16.msra.mxu2 %v4946_v16 }
 0x542   : > { %4122 = vmatpush.bf16.msrb.mxu0 %v4964_v2 }
 0x543   : > { %4011 = vmatpush.bf16.msra.mxu2 %v4945_v35 }
 0x546   : > { %4123 = vmatpush.bf16.msrb.mxu0 %v4963_v20 }
 0x547   : > { %4012 = vmatpush.bf16.msra.mxu2 %v4944_v11 }
 0x54a   : > { %4124 = vmatpush.bf16.msrb.mxu0 %v4962_v56 }
 0x54e   : > { %4125 = vmatpush.bf16.msrb.mxu0 %v4961_v54 }
 0x58e   : > { %v3745_v30 = vpop.f32.mrf.mxu0 }
 0x596   : > { %v3747_v3 = vpop.f32.mrf.mxu0 }
 0x597   : > { %3760 = vrot.lane.b32.xlu2 %v3747_v3, %s7904_s16  ;;  %s486_s16 = sand.u32 1, %s5480_s19  }
 0x598   : > { %s4202_s20 = scalar_lea.sflag [#allocation3], %s486_s16 }
 0x59e   : > { %v3750_v29 = vpop.f32.mrf.mxu0 }
 0x59f   : > { %3764 = vrot.lane.b32.xlu0 %v3750_v29, %s7900_s0 }
 0x5a6   : > { %v3752_v36 = vpop.f32.mrf.mxu0 }
 0x5a7   : > { %3768 = vrot.lane.b32.xlu1 %v3752_v36, %s5497_s1  ;;  %s4280_s1 = sshll.u32 %s486_s16, 3 }
 0x5a8   : > { %s488_s30 = scalar_lea.vmem [#allocation2], %s4280_s1 }
 0x5a9   : > { %s4214_s23 = sshll.u32 %s488_s30, 4  ;;  %s4215_s23 = int_to_ptr.vmem [resolvable:$true] %s4214_s23 }
 0x5ae   : > { %v3755_v51 = vpop.f32.mrf.mxu0 }
 0x5af   : > { %3772 = vrot.lane.b32.xlu2 %v3755_v51, %s7899_s17  ;;  %v4968_v51 = vld [vmem:[%s7866_s13] sm:$0xff] }
 0x5b6   : > { %v3757_v23 = vpop.f32.mrf.mxu0 }
 0x5f1   : > { %v3761_v49 = vpop.permute.xlu2 %3760 }
 0x5f2   : > { %v3775_v60 = vsel %vm2710_vm11, %v3745_v30, %v3761_v49 }
 0x5f3   : > { %v3830_v17 = vpack.c.bf16 %v3775_v60, %v3775_v60 }
 0x5f5   : > { %4000 = vmatmul.bf16.vlgmr.msrb.gmra.mxu2 %v3830_v17 }
 0x5f6   : > { %4038 = vmatpush.bf16.msrb.mxu2 %v4960_v42 }
 0x609   : > { %v3773_v21 = vpop.permute.xlu2 %3772 }
 0x60a   : > { %v3833_v33 = vpack.c.bf16 %v3773_v21, %v3773_v21 }
 0x611   : > { %v3765_v39 = vpop.permute.xlu0 %3764 }
 0x612   : > { %v3776_v61 = vsel %vm1174_vm4, %v3761_v49, %v3765_v39 }
 0x619   : > { %v3769_v18 = vpop.permute.xlu1 %3768 }
 0x61a   : > { %v3778_v9 = vsel %vm3777_vm13, %v3776_v61, %v3769_v18  ;;  %v3779_v38 = vsel %vm1207_vm5, %v3769_v18, %v3773_v21 }
 0x61b   : > { %v3831_v0 = vpack.c.bf16 %v3778_v9, %v3778_v9  ;;  %v3832_v4 = vpack.c.bf16 %v3779_v38, %v3779_v38 }
 0x61d   : > { %4013 = vmatmul.bf16.vlgmr.msra.gmra.mxu2 %v3831_v0  ;;  %4026 = vmatmul.bf16.vlgmr.msra.gmra.mxu0 %v3832_v4 }
 0x61e   : > { %4189 = vmatpush.bf16.msra.mxu2 %v4185_v1 }
 0x622   : > { %4190 = vmatpush.bf16.msra.mxu2 %v4972_v45 }
 0x626   : > { %4191 = vmatpush.bf16.msra.mxu2 %v4971_v53 }
 0x62a   : > { %4192 = vmatpush.bf16.msra.mxu2 %v4970_v44 }
 0x62d   : > { %4791 = vmatmul.msk.bf16.vlgmr.msrb.gmra.mxu2 %vm3988_vm14, %v3833_v33 }
 0x62e   : > { %4193 = vmatpush.bf16.msra.mxu2 %v4969_v62 }
 0x632   : > { %4194 = vmatpush.bf16.msra.mxu2 %v4968_v51 }
 0x678   : > { %v4001_v55 = vpop.f32.mrf.mxu2 }
 0x679   : > { %v4002_v3 = vadd.f32 %v5422_v37, %v4001_v55 }
 0x680   : > { %v4003_v15 = vpop.f32.mrf.mxu2 }
 0x69a   : > { %v4027_v58 = vpop.f32.mrf.mxu0 }
 0x6a0   : > { %v4014_v31 = vpop.f32.mrf.mxu2 }
 0x6a1   : > { %v4015_v47 = vadd.f32 %v4014_v31, %v4002_v3 }
 0x6a2   : > { %v4029_v30 = vpop.f32.mrf.mxu0 }
 0x6a3   : > { %v4028_v63 = vadd.f32 %v4027_v58, %v4015_v47 }
 0x6a8   : > { %v4016_v19 = vpop.f32.mrf.mxu2 }
 0x6b0   : > { %v4040_v29 = vpop.f32.mrf.mxu2 }
 0x6b1   : > { %v4041_v50 = vadd.f32 %v4040_v29, %v4028_v63 }
 0x6b3   : > { %v4044_v25 = vmax.f32 %v4041_v50, 0.0 }
 0x6b5   : > { %v4060_v36 = vpack.c.bf16 %v4044_v25, %v4044_v25 }
 0x6b7   : > { %4820 = vmatmul.msk.bf16.vlgmr.msrb.gmra.mxu0 %vm4110_vm0, %v4060_v36 }
 0x6b8   : > { %v4042_v14 = vpop.f32.mrf.mxu2 }
 0x734   : > { %v4127_v6 = vpop.f32.mrf.mxu0 }
 0x735   : > { %v4128_v23 = vadd.f32 %v5423_v26, %v4127_v6 }
 0x737   : > { %v4131_v57 = vmax.f32 %v4128_v23, 0.0 }
 0x739   : > { %v4143_v7 = vpack.c.bf16 %v4131_v57, %v4131_v57 }
 0x73b   : > { %4841 = vmatmul.msk.bf16.vlgmr.msra.gmra.mxu2 %vm2659_vm8, %v4143_v7 }
 0x73c   : > { %v4129_v28 = vpop.f32.mrf.mxu0 }
 0x7be   : > { %v4196_v16 = vpop.f32.mrf.mxu2 }
 0x7bf   : > { %v4197_v35 = vadd.f32 %v5424_v52, %v4196_v16 }
 0x7c1   : > { %4200 = vst [vmem:[%s488_s30] sm:$0xff] %v4197_v35 }
 0x7c2   : > { %5453 = shalt.err (!%p5450_p3)
}
 0x7c3   : > { %4973 = dma.vmem_to_hbm [thread:$0]  (%p5616_p5), %s4215_s23, 128, %s4217_s25, %s4202_s20  }
 0x7c6   : > { %v4198_v48 = vpop.f32.mrf.mxu2 }
 0x7c7 PF: > { %p4979_p4 = scmp.ge.s32.totalorder %s5488_s21, 2  ;;  %s4228_s16 = sand.u32 1, %s5476_s18  }
 0x7c8   : > { %s4229_s2 = scalar_lea.sflag [#allocation3], %s4228_s16 }
 0x7c9   : > { %p4976_p7 = pnand %p4979_p4, %p5620_p6 }
 0x7cb   : > { %p4977_p8 = pneg %p4976_p7 }
 0x7cd   : > { %5471 = dma.done.wait (%p4977_p8), %s4229_s2, 128  }
 0x7ce   : > { %5473 = vsyncadd (%p4977_p8), %s4229_s2, 4294967168  ;;  %s7906_s21 = sld [smem:[#allocation6_spill]]  ;;  %s7909_s18 = smov %s5480_s19 }
 0x7cf   : > { %s7907_s3 = sld [smem:[#allocation5_spill]] }
 0x7d0   : > { %s7908_s20 = sld [smem:[#allocation7_spill]] }
 0x7d4   : > { %p25_p9 = scmp.ge.s32.totalorder %s7906_s21, 4  }
 0x7d5   : > { %s7910_s19 = smov %s7907_s3 }
 0x7d6   :  { %27 = sbr.rel (!%p25_p9) target bundleno = 8 (0x8), region = 115 }
 0x7db   :  { %4235 = vsyncpa [#allocation3], 1 }
 0x7dc   :  { %4237 = vsyncpa [#allocation3 + $0x1], 1 }

</bundles_post_ra>
